<compile_context>
chip_gen: v7x
topology: tpu7x:2x2x1
jax: 0.10.0
libtpu: 0.0.40
codegen_flags: <defaults>
</compile_context>

<pallas_src>
import math

import jax
import jax.numpy as jnp
import numpy as np
from jax import lax
from jax.experimental import pallas as pl
from jax.experimental.pallas import tpu as pltpu

# ----- model hyper-parameters (scaled-down but shape-consistent) -------------
TOKEN_DIM = 16    # token_embed_dim
Z_DIM = 32        # decoder_embed_dim
WIDTH = 128       # head_width (default 1024, scaled down)
DEPTH = 2         # head_depth (default 6, scaled down)
FREQ_DIM = 256    # TimestepEmbedder frequency_embedding_size
LN_EPS = 1e-6

B = 256           # batch of flattened tokens
TB = 128          # batch tile per grid step (full MXU M tile; 2 grid steps)


def _silu(x):
    return x * jax.nn.sigmoid(x)


def _layernorm_1pass(x, eps=LN_EPS):
    # one-pass stats: E[x], E[x^2]; var = E[x^2] - mu^2 ; single rsqrt
    mu = jnp.mean(x, axis=-1, keepdims=True)
    m2 = jnp.mean(x * x, axis=-1, keepdims=True)
    var = m2 - mu * mu
    return (x - mu) * lax.rsqrt(var + eps)


# ----------------------------- Pallas kernel --------------------------------
def rect_flow_kernel(
    target_ref, x0_ref, t_ref, temb_ref, z_ref,
    t_w1_ref, t_b1_ref, t_w2_ref, t_b2_ref,
    xz_w_ref, xz_b_ref,
    ln_g_ref, ln_b_ref, ada_w_ref, ada_b_ref,
    m_w1_ref, m_b1_ref, m_w2_ref, m_b2_ref,
    f_ada_w_ref, f_ada_b_ref, f_w_ref, f_b_ref,
    loss_ref,
):
    f32 = jnp.float32
    bf16 = jnp.bfloat16

    x1 = target_ref[...].astype(f32)                    # (TB, TOKEN_DIM)
    x0 = x0_ref[...].astype(f32)
    t = t_ref[...].astype(f32)                          # (TB, 1)

    # xt = t * x1 + (1 - t) * x0
    xt = t * x1 + (1.0 - t) * x0

    def mm(a, w_ref, b_ref):
        # bf16 operands, f32 accumulation, f32 bias add
        return (jnp.dot(a.astype(bf16), w_ref[...], preferred_element_type=f32)
                + b_ref[...].astype(f32))

    # --- TimestepEmbedder MLP: Linear(256,W) -> SiLU -> Linear(W,W) ---
    h_t = mm(temb_ref[...], t_w1_ref, t_b1_ref)
    h_t = _silu(h_t)
    h_t = mm(h_t, t_w2_ref, t_b2_ref)

    # --- fused input_proj + cond_embed (block-diagonal (48, 2W) weight) ---
    xz = jnp.concatenate([xt, z_ref[...].astype(f32)], axis=-1)   # (TB, 48)
    xc = mm(xz, xz_w_ref, xz_b_ref)                               # (TB, 2W)
    x = xc[:, :WIDTH]                                             # input_proj(xt)
    c = xc[:, WIDTH:]                                             # cond_embed(z)

    y_cond = h_t + c
    sy = _silu(y_cond)                                  # SiLU(y), reused by every AdaLN
    sy_bf = sy.astype(bf16)                             # hoisted cast

    # --- AdaLN residual blocks ---
    for k in range(DEPTH):
        ada = (jnp.dot(sy_bf, ada_w_ref[k], preferred_element_type=f32)
               + ada_b_ref[k].astype(f32))
        shift = ada[:, 0 * WIDTH:1 * WIDTH]
        scale = ada[:, 1 * WIDTH:2 * WIDTH]
        gate = ada[:, 2 * WIDTH:3 * WIDTH]

        h = _layernorm_1pass(x) * ln_g_ref[k].astype(f32) + ln_b_ref[k].astype(f32)
        h = h * (1.0 + scale) + shift                   # modulate
        h = (jnp.dot(h.astype(bf16), m_w1_ref[k], preferred_element_type=f32)
             + m_b1_ref[k].astype(f32))
        h = _silu(h)
        h = (jnp.dot(h.astype(bf16), m_w2_ref[k], preferred_element_type=f32)
             + m_b2_ref[k].astype(f32))
        x = x + gate * h

    # --- FinalLayer ---
    ada = (jnp.dot(sy_bf, f_ada_w_ref[...], preferred_element_type=f32)
           + f_ada_b_ref[...].astype(f32))
    shift = ada[:, :WIDTH]
    scale = ada[:, WIDTH:]
    h = _layernorm_1pass(x) * (1.0 + scale) + shift     # norm_final has no affine
    velocity = (jnp.dot(h.astype(bf16), f_w_ref[...], preferred_element_type=f32)
                + f_b_ref[...].astype(f32))

    # --- rectified-flow loss: mean((v - (x1 - x0))^2, axis=-1), lane-dense ---
    diff = velocity - (x1 - x0)
    dsq = diff * diff                                   # (TB, TOKEN_DIM) f32
    inv_d = jnp.full((1, TOKEN_DIM), 1.0 / TOKEN_DIM, dtype=f32)
    # (1, TOKEN_DIM) x (TB, TOKEN_DIM)^T  -> (1, TB): per-row mean directly in
    # lane-major layout (unmasked stores, no transpose/relayout, no divide).
    loss_ref[...] = lax.dot_general(
        inv_d, dsq, (((1,), (1,)), ((), ())), preferred_element_type=f32)


# ------------------------------- wrapper -------------------------------------
def rect_flow_head_loss(target, x0, t, z, params):
    Bn, _ = target.shape
    assert Bn % TB == 0

    # sinusoidal timestep embedding (matches timestep_embedding, max_period=1e4)
    half = FREQ_DIM // 2
    freqs = jnp.exp(-math.log(10000.0) * jnp.arange(half, dtype=jnp.float32) / half)
    args = t[:, None].astype(jnp.float32) * freqs[None, :]
    temb = jnp.concatenate([jnp.cos(args), jnp.sin(args)], axis=-1)   # (B, 256)
    temb = temb.astype(jnp.bfloat16)                                  # halve its DMA

    t2d = t[:, None].astype(jnp.float32)                              # (B, 1)

    # fused block-diagonal input_proj + cond_embed weight: [xt | z] @ W -> [x | c]
    xz_w = jnp.zeros((TOKEN_DIM + Z_DIM, 2 * WIDTH), jnp.float32)
    xz_w = xz_w.at[:TOKEN_DIM, :WIDTH].set(params["in_w"])
    xz_w = xz_w.at[TOKEN_DIM:, WIDTH:].set(params["c_w"])
    xz_b = jnp.concatenate([params["in_b"], params["c_b"]], axis=-1)

    weights = [
        params["t_w1"], params["t_b1"], params["t_w2"], params["t_b2"],
        xz_w, xz_b,
        params["ln_g"], params["ln_b"], params["ada_w"], params["ada_b"],
        params["m_w1"], params["m_b1"], params["m_w2"], params["m_b2"],
        params["f_ada_w"], params["f_ada_b"], params["f_w"], params["f_b"],
    ]
    # bf16 weights, f32 accumulation inside the kernel.
    weights = [w.astype(jnp.bfloat16) for w in weights]

    def batch_spec(shape):
        nd = len(shape)
        return pl.BlockSpec((TB,) + tuple(shape[1:]),
                            lambda i, _nd=nd: (i,) + (0,) * (_nd - 1))

    # Grid-invariant weights: whole array resident in VMEM for the duration of
    # the kernel -- single copy, no per-step double-buffering.
    w_spec = pl.BlockSpec(memory_space=pltpu.MemorySpace.VMEM)

    in_specs = [
        batch_spec(target.shape), batch_spec(x0.shape), batch_spec(t2d.shape),
        batch_spec(temb.shape), batch_spec(z.shape),
    ] + [w_spec] * len(weights)

    # advisory cost estimate so XLA schedules the RNG / temb glue around us
    per_sample_flops = 2 * (
        FREQ_DIM * WIDTH + WIDTH * WIDTH                       # time MLP
        + (TOKEN_DIM + Z_DIM) * (2 * WIDTH)                    # fused in/cond proj
        + DEPTH * (WIDTH * 3 * WIDTH + 2 * WIDTH * WIDTH)      # ResBlocks
        + WIDTH * 2 * WIDTH + WIDTH * TOKEN_DIM                # final layer
        + TOKEN_DIM                                            # loss reduce
    )
    transcendentals = Bn * ((2 + DEPTH) * WIDTH + WIDTH + 2 * DEPTH + 3)
    bytes_accessed = int(
        sum(a.size * a.dtype.itemsize for a in (target, x0, t2d, temb, z))
        + sum(w.size * w.dtype.itemsize for w in weights)
        + Bn * 4)
    cost = pl.CostEstimate(flops=int(Bn * per_sample_flops),
                           transcendentals=int(transcendentals),
                           bytes_accessed=bytes_accessed)

    out = pl.pallas_call(
        rect_flow_kernel,
        out_shape=jax.ShapeDtypeStruct((1, Bn), jnp.float32),   # lane-dense loss
        grid_spec=pltpu.PrefetchScalarGridSpec(
            num_scalar_prefetch=0,
            grid=(Bn // TB,),
            in_specs=in_specs,
            out_specs=pl.BlockSpec((1, TB), lambda i: (0, i)),
        ),
        compiler_params=pltpu.CompilerParams(dimension_semantics=("parallel",)),
        cost_estimate=cost,
    )(target, x0, t2d, temb, z, *weights)
    return out[0]


# --------------------------- pure-JAX reference ------------------------------
def _layernorm_ref(x, eps=LN_EPS):
    mu = jnp.mean(x, axis=-1, keepdims=True)
    var = jnp.mean(jnp.square(x - mu), axis=-1, keepdims=True)
    return (x - mu) * lax.rsqrt(var + eps)


def reference_loss(target, x0, t, z, p):
    half = FREQ_DIM // 2
    freqs = jnp.exp(-math.log(10000.0) * jnp.arange(half, dtype=jnp.float32) / half)
    args = t[:, None] * freqs[None, :]
    temb = jnp.concatenate([jnp.cos(args), jnp.sin(args)], axis=-1)

    xt = t[:, None] * target + (1.0 - t[:, None]) * x0
    h_t = _silu(temb @ p["t_w1"] + p["t_b1"]) @ p["t_w2"] + p["t_b2"]
    c = z @ p["c_w"] + p["c_b"]
    y = h_t + c
    x = xt @ p["in_w"] + p["in_b"]
    sy = _silu(y)
    for k in range(DEPTH):
        ada = sy @ p["ada_w"][k] + p["ada_b"][k]
        shift, scale, gate = (ada[:, :WIDTH], ada[:, WIDTH:2 * WIDTH], ada[:, 2 * WIDTH:])
        h = _layernorm_ref(x) * p["ln_g"][k] + p["ln_b"][k]
        h = h * (1.0 + scale) + shift
        h = _silu(h @ p["m_w1"][k] + p["m_b1"][k]) @ p["m_w2"][k] + p["m_b2"][k]
        x = x + gate * h
    ada = sy @ p["f_ada_w"] + p["f_ada_b"]
    shift, scale = ada[:, :WIDTH], ada[:, WIDTH:]
    h = _layernorm_ref(x) * (1.0 + scale) + shift
    v = h @ p["f_w"] + p["f_b"]
    return jnp.mean(jnp.square(v - (target - x0)), axis=-1)


# --------------------------- deterministic params ----------------------------
def init_params(key):
    ks = jax.random.split(key, 18)
    s = 0.05

    def nrm(k, shape):
        return jax.random.normal(k, shape, jnp.float32) * s

    return dict(
        t_w1=nrm(ks[0], (FREQ_DIM, WIDTH)), t_b1=nrm(ks[1], (1, WIDTH)),
        t_w2=nrm(ks[2], (WIDTH, WIDTH)), t_b2=nrm(ks[3], (1, WIDTH)),
        c_w=nrm(ks[4], (Z_DIM, WIDTH)), c_b=nrm(ks[5], (1, WIDTH)),
        in_w=nrm(ks[6], (TOKEN_DIM, WIDTH)), in_b=nrm(ks[7], (1, WIDTH)),
        ln_g=jnp.ones((DEPTH, 1, WIDTH), jnp.float32),
        ln_b=jnp.zeros((DEPTH, 1, WIDTH), jnp.float32),
        ada_w=nrm(ks[8], (DEPTH, WIDTH, 3 * WIDTH)), ada_b=nrm(ks[9], (DEPTH, 1, 3 * WIDTH)),
        m_w1=nrm(ks[10], (DEPTH, WIDTH, WIDTH)), m_b1=nrm(ks[11], (DEPTH, 1, WIDTH)),
        m_w2=nrm(ks[12], (DEPTH, WIDTH, WIDTH)), m_b2=nrm(ks[13], (DEPTH, 1, WIDTH)),
        f_ada_w=nrm(ks[14], (WIDTH, 2 * WIDTH)), f_ada_b=nrm(ks[15], (1, 2 * WIDTH)),
        f_w=nrm(ks[16], (WIDTH, TOKEN_DIM)), f_b=nrm(ks[17], (1, TOKEN_DIM)),
    )


if __name__ == "__main__":
    root = jax.random.PRNGKey(0)
    k_param, k_target, k_z, k_x0, k_t = jax.random.split(root, 5)

    params = init_params(k_param)
    target = jax.random.normal(k_target, (B, TOKEN_DIM), jnp.float32)
    z = jax.random.normal(k_z, (B, Z_DIM), jnp.float32)
    # stochastic parts of the forward (torch.randn_like / torch.rand) as glue:
    x0 = jax.random.normal(k_x0, (B, TOKEN_DIM), jnp.float32)
    t = jax.random.uniform(k_t, (B,), jnp.float32)

    # mask=None path of the reference module (per-sample loss, shape (B,)).
    rec_loss = jax.block_until_ready(rect_flow_head_loss(target, x0, t, z, params))

    ref = jax.block_until_ready(reference_loss(target, x0, t, z, params))
    # bf16 matmuls (f32 accumulation) vs pure-f32 reference.
    np.testing.assert_allclose(np.asarray(rec_loss), np.asarray(ref),
                               rtol=3e-2, atol=1e-2)

    # TODO(synk): optional `mask` reduction ((loss*mask).sum()/mask.sum()) is a
    # trivial scalar epilogue; left in plain JAX / not exercised here.
    print("KERNEL_OK")
</pallas_src>

<mosaic_0001>
module attributes {stable_mosaic.version = 11 : i64} {
  func.func @rect_flow_kernel(%arg0: i32, %arg1: memref<128x16xf32, #tpu.memory_space<vmem>>, %arg2: memref<128x16xf32, #tpu.memory_space<vmem>>, %arg3: memref<128x1xf32, #tpu.memory_space<vmem>>, %arg4: memref<128x256xbf16, #tpu.memory_space<vmem>>, %arg5: memref<128x32xf32, #tpu.memory_space<vmem>>, %arg6: memref<256x128xbf16, #tpu.memory_space<vmem>>, %arg7: memref<1x128xbf16, #tpu.memory_space<vmem>>, %arg8: memref<128x128xbf16, #tpu.memory_space<vmem>>, %arg9: memref<1x128xbf16, #tpu.memory_space<vmem>>, %arg10: memref<48x256xbf16, #tpu.memory_space<vmem>>, %arg11: memref<1x256xbf16, #tpu.memory_space<vmem>>, %arg12: memref<2x1x128xbf16, #tpu.memory_space<vmem>>, %arg13: memref<2x1x128xbf16, #tpu.memory_space<vmem>>, %arg14: memref<2x128x384xbf16, #tpu.memory_space<vmem>>, %arg15: memref<2x1x384xbf16, #tpu.memory_space<vmem>>, %arg16: memref<2x128x128xbf16, #tpu.memory_space<vmem>>, %arg17: memref<2x1x128xbf16, #tpu.memory_space<vmem>>, %arg18: memref<2x128x128xbf16, #tpu.memory_space<vmem>>, %arg19: memref<2x1x128xbf16, #tpu.memory_space<vmem>>, %arg20: memref<128x256xbf16, #tpu.memory_space<vmem>>, %arg21: memref<1x256xbf16, #tpu.memory_space<vmem>>, %arg22: memref<128x16xbf16, #tpu.memory_space<vmem>>, %arg23: memref<1x16xbf16, #tpu.memory_space<vmem>>, %arg24: memref<1x128xf32, #tpu.memory_space<vmem>>) attributes {dimension_semantics = [#tpu.dimension_semantics<parallel>], iteration_bounds = array<i64: 2>, scalar_prefetch = 0 : i64, scratch_operands = 0 : i64, tpu.core_type = #tpu.core_type<tc>, window_params = [{transform_indices = @transform_0, window_bounds = array<i64: 128, 16>}, {transform_indices = @transform_1, window_bounds = array<i64: 128, 16>}, {transform_indices = @transform_2, window_bounds = array<i64: 128, 1>}, {transform_indices = @transform_3, window_bounds = array<i64: 128, 256>}, {transform_indices = @transform_4, window_bounds = array<i64: 128, 32>}, {pipeline_mode = #tpu.pipeline_mode<synchronous>, transform_indices = @transform_5, window_bounds = array<i64: 256, 128>}, {pipeline_mode = #tpu.pipeline_mode<synchronous>, transform_indices = @transform_6, window_bounds = array<i64: 1, 128>}, {pipeline_mode = #tpu.pipeline_mode<synchronous>, transform_indices = @transform_7, window_bounds = array<i64: 128, 128>}, {pipeline_mode = #tpu.pipeline_mode<synchronous>, transform_indices = @transform_8, window_bounds = array<i64: 1, 128>}, {pipeline_mode = #tpu.pipeline_mode<synchronous>, transform_indices = @transform_9, window_bounds = array<i64: 48, 256>}, {pipeline_mode = #tpu.pipeline_mode<synchronous>, transform_indices = @transform_10, window_bounds = array<i64: 1, 256>}, {pipeline_mode = #tpu.pipeline_mode<synchronous>, transform_indices = @transform_11, window_bounds = array<i64: 2, 1, 128>}, {pipeline_mode = #tpu.pipeline_mode<synchronous>, transform_indices = @transform_12, window_bounds = array<i64: 2, 1, 128>}, {pipeline_mode = #tpu.pipeline_mode<synchronous>, transform_indices = @transform_13, window_bounds = array<i64: 2, 128, 384>}, {pipeline_mode = #tpu.pipeline_mode<synchronous>, transform_indices = @transform_14, window_bounds = array<i64: 2, 1, 384>}, {pipeline_mode = #tpu.pipeline_mode<synchronous>, transform_indices = @transform_15, window_bounds = array<i64: 2, 128, 128>}, {pipeline_mode = #tpu.pipeline_mode<synchronous>, transform_indices = @transform_16, window_bounds = array<i64: 2, 1, 128>}, {pipeline_mode = #tpu.pipeline_mode<synchronous>, transform_indices = @transform_17, window_bounds = array<i64: 2, 128, 128>}, {pipeline_mode = #tpu.pipeline_mode<synchronous>, transform_indices = @transform_18, window_bounds = array<i64: 2, 1, 128>}, {pipeline_mode = #tpu.pipeline_mode<synchronous>, transform_indices = @transform_19, window_bounds = array<i64: 128, 256>}, {pipeline_mode = #tpu.pipeline_mode<synchronous>, transform_indices = @transform_20, window_bounds = array<i64: 1, 256>}, {pipeline_mode = #tpu.pipeline_mode<synchronous>, transform_indices = @transform_21, window_bounds = array<i64: 128, 16>}, {pipeline_mode = #tpu.pipeline_mode<synchronous>, transform_indices = @transform_22, window_bounds = array<i64: 1, 16>}, {transform_indices = @transform_23, window_bounds = array<i64: 1, 128>}]} {
    %c0 = arith.constant 0 : index
    %c0_0 = arith.constant 0 : index
    %0 = vector.load %arg1[%c0, %c0_0] : memref<128x16xf32, #tpu.memory_space<vmem>>, vector<128x16xf32>
    %c0_1 = arith.constant 0 : index
    %c0_2 = arith.constant 0 : index
    %1 = vector.load %arg2[%c0_1, %c0_2] : memref<128x16xf32, #tpu.memory_space<vmem>>, vector<128x16xf32>
    %c0_3 = arith.constant 0 : index
    %c0_4 = arith.constant 0 : index
    %2 = vector.load %arg3[%c0_3, %c0_4] : memref<128x1xf32, #tpu.memory_space<vmem>>, vector<128x1xf32>
    %3 = vector.broadcast %2 : vector<128x1xf32> to vector<128x16xf32>
    %4 = arith.mulf %3, %0 : vector<128x16xf32>
    %cst = arith.constant 1.000000e+00 : f32
    %5 = vector.broadcast %cst : f32 to vector<128x1xf32>
    %6 = arith.subf %5, %2 : vector<128x1xf32>
    %7 = vector.broadcast %6 : vector<128x1xf32> to vector<128x16xf32>
    %8 = arith.mulf %7, %1 : vector<128x16xf32>
    %9 = arith.addf %4, %8 : vector<128x16xf32>
    %c0_5 = arith.constant 0 : index
    %c0_6 = arith.constant 0 : index
    %10 = vector.load %arg4[%c0_5, %c0_6] : memref<128x256xbf16, #tpu.memory_space<vmem>>, vector<128x256xbf16>
    %c0_7 = arith.constant 0 : index
    %c0_8 = arith.constant 0 : index
    %11 = vector.load %arg6[%c0_7, %c0_8] : memref<256x128xbf16, #tpu.memory_space<vmem>>, vector<256x128xbf16>
    %cst_9 = arith.constant dense<0.000000e+00> : vector<128x128xf32>
    %12 = tpu.matmul %10, %11, %cst_9 {dimension_numbers = #tpu.dot_dimension_numbers<[1], [0], [0], [1], [0, 0, 1, 1], [], []>} : vector<128x256xbf16>, vector<256x128xbf16>, vector<128x128xf32> -> vector<128x128xf32>
    %c0_10 = arith.constant 0 : index
    %c0_11 = arith.constant 0 : index
    %13 = vector.load %arg7[%c0_10, %c0_11] : memref<1x128xbf16, #tpu.memory_space<vmem>>, vector<1x128xbf16>
    %14 = arith.extf %13 : vector<1x128xbf16> to vector<1x128xf32>
    %15 = vector.broadcast %14 : vector<1x128xf32> to vector<128x128xf32>
    %16 = arith.addf %12, %15 : vector<128x128xf32>
    %17 = arith.negf %16 : vector<128x128xf32>
    %18 = math.exp %17 : vector<128x128xf32>
    %cst_12 = arith.constant 1.000000e+00 : f32
    %19 = vector.broadcast %cst_12 : f32 to vector<128x128xf32>
    %20 = arith.addf %19, %18 : vector<128x128xf32>
    %21 = arith.divf %19, %20 : vector<128x128xf32>
    %22 = arith.mulf %16, %21 : vector<128x128xf32>
    %23 = arith.truncf %22 : vector<128x128xf32> to vector<128x128xbf16>
    %c0_13 = arith.constant 0 : index
    %c0_14 = arith.constant 0 : index
    %24 = vector.load %arg8[%c0_13, %c0_14] : memref<128x128xbf16, #tpu.memory_space<vmem>>, vector<128x128xbf16>
    %cst_15 = arith.constant dense<0.000000e+00> : vector<128x128xf32>
    %25 = tpu.matmul %23, %24, %cst_15 {dimension_numbers = #tpu.dot_dimension_numbers<[1], [0], [0], [1], [0, 0, 1, 1], [], []>} : vector<128x128xbf16>, vector<128x128xbf16>, vector<128x128xf32> -> vector<128x128xf32>
    %c0_16 = arith.constant 0 : index
    %c0_17 = arith.constant 0 : index
    %26 = vector.load %arg9[%c0_16, %c0_17] : memref<1x128xbf16, #tpu.memory_space<vmem>>, vector<1x128xbf16>
    %27 = arith.extf %26 : vector<1x128xbf16> to vector<1x128xf32>
    %28 = vector.broadcast %27 : vector<1x128xf32> to vector<128x128xf32>
    %29 = arith.addf %25, %28 : vector<128x128xf32>
    %c0_18 = arith.constant 0 : index
    %c0_19 = arith.constant 0 : index
    %30 = vector.load %arg5[%c0_18, %c0_19] : memref<128x32xf32, #tpu.memory_space<vmem>>, vector<128x32xf32>
    %31 = tpu.concatenate %9, %30 in 1 : vector<128x16xf32>, vector<128x32xf32> -> vector<128x48xf32>
    %32 = arith.truncf %31 : vector<128x48xf32> to vector<128x48xbf16>
    %c0_20 = arith.constant 0 : index
    %c0_21 = arith.constant 0 : index
    %33 = vector.load %arg10[%c0_20, %c0_21] : memref<48x256xbf16, #tpu.memory_space<vmem>>, vector<48x256xbf16>
    %cst_22 = arith.constant dense<0.000000e+00> : vector<128x256xf32>
    %34 = tpu.matmul %32, %33, %cst_22 {dimension_numbers = #tpu.dot_dimension_numbers<[1], [0], [0], [1], [0, 0, 1, 1], [], []>} : vector<128x48xbf16>, vector<48x256xbf16>, vector<128x256xf32> -> vector<128x256xf32>
    %c0_23 = arith.constant 0 : index
    %c0_24 = arith.constant 0 : index
    %35 = vector.load %arg11[%c0_23, %c0_24] : memref<1x256xbf16, #tpu.memory_space<vmem>>, vector<1x256xbf16>
    %36 = arith.extf %35 : vector<1x256xbf16> to vector<1x256xf32>
    %37 = vector.broadcast %36 : vector<1x256xf32> to vector<128x256xf32>
    %38 = arith.addf %34, %37 : vector<128x256xf32>
    %39 = vector.extract_strided_slice %38 {offsets = [0, 0], sizes = [128, 128], strides = [1, 1]} : vector<128x256xf32> to vector<128x128xf32>
    %40 = vector.extract_strided_slice %38 {offsets = [0, 128], sizes = [128, 128], strides = [1, 1]} : vector<128x256xf32> to vector<128x128xf32>
    %41 = arith.addf %29, %40 : vector<128x128xf32>
    %42 = arith.negf %41 : vector<128x128xf32>
    %43 = math.exp %42 : vector<128x128xf32>
    %cst_25 = arith.constant 1.000000e+00 : f32
    %44 = vector.broadcast %cst_25 : f32 to vector<128x128xf32>
    %45 = arith.addf %44, %43 : vector<128x128xf32>
    %46 = arith.divf %44, %45 : vector<128x128xf32>
    %47 = arith.mulf %41, %46 : vector<128x128xf32>
    %48 = arith.truncf %47 : vector<128x128xf32> to vector<128x128xbf16>
    %c0_26 = arith.constant 0 : index
    %c0_27 = arith.constant 0 : index
    %c0_28 = arith.constant 0 : index
    %49 = vector.load %arg14[%c0_26, %c0_27, %c0_28] : memref<2x128x384xbf16, #tpu.memory_space<vmem>>, vector<1x128x384xbf16>
    %50 = vector.shape_cast %49 : vector<1x128x384xbf16> to vector<128x384xbf16>
    %cst_29 = arith.constant dense<0.000000e+00> : vector<128x384xf32>
    %51 = tpu.matmul %48, %50, %cst_29 {dimension_numbers = #tpu.dot_dimension_numbers<[1], [0], [0], [1], [0, 0, 1, 1], [], []>} : vector<128x128xbf16>, vector<128x384xbf16>, vector<128x384xf32> -> vector<128x384xf32>
    %c0_30 = arith.constant 0 : index
    %c0_31 = arith.constant 0 : index
    %c0_32 = arith.constant 0 : index
    %52 = vector.load %arg15[%c0_30, %c0_31, %c0_32] : memref<2x1x384xbf16, #tpu.memory_space<vmem>>, vector<1x1x384xbf16>
    %53 = vector.shape_cast %52 : vector<1x1x384xbf16> to vector<1x384xbf16>
    %54 = arith.extf %53 : vector<1x384xbf16> to vector<1x384xf32>
    %55 = vector.broadcast %54 : vector<1x384xf32> to vector<128x384xf32>
    %56 = arith.addf %51, %55 : vector<128x384xf32>
    %57 = vector.extract_strided_slice %56 {offsets = [0, 0], sizes = [128, 128], strides = [1, 1]} : vector<128x384xf32> to vector<128x128xf32>
    %58 = vector.extract_strided_slice %56 {offsets = [0, 128], sizes = [128, 128], strides = [1, 1]} : vector<128x384xf32> to vector<128x128xf32>
    %59 = vector.extract_strided_slice %56 {offsets = [0, 256], sizes = [128, 128], strides = [1, 1]} : vector<128x384xf32> to vector<128x128xf32>
    %cst_33 = arith.constant dense<0.000000e+00> : vector<128xf32>
    %60 = vector.multi_reduction <add>, %39, %cst_33 [1] : vector<128x128xf32> to vector<128xf32>
    %61 = vector.shape_cast %60 : vector<128xf32> to vector<128x1xf32>
    %cst_34 = arith.constant 1.280000e+02 : f32
    %62 = vector.broadcast %cst_34 : f32 to vector<128x1xf32>
    %63 = arith.divf %61, %62 : vector<128x1xf32>
    %64 = arith.mulf %39, %39 : vector<128x128xf32>
    %cst_35 = arith.constant dense<0.000000e+00> : vector<128xf32>
    %65 = vector.multi_reduction <add>, %64, %cst_35 [1] : vector<128x128xf32> to vector<128xf32>
    %66 = vector.shape_cast %65 : vector<128xf32> to vector<128x1xf32>
    %cst_36 = arith.constant 1.280000e+02 : f32
    %67 = vector.broadcast %cst_36 : f32 to vector<128x1xf32>
    %68 = arith.divf %66, %67 : vector<128x1xf32>
    %69 = arith.mulf %63, %63 : vector<128x1xf32>
    %70 = arith.subf %68, %69 : vector<128x1xf32>
    %71 = vector.broadcast %63 : vector<128x1xf32> to vector<128x128xf32>
    %72 = arith.subf %39, %71 : vector<128x128xf32>
    %cst_37 = arith.constant 9.99999997E-7 : f32
    %73 = vector.broadcast %cst_37 : f32 to vector<128x1xf32>
    %74 = arith.addf %70, %73 : vector<128x1xf32>
    %75 = math.rsqrt %74 : vector<128x1xf32>
    %76 = vector.broadcast %75 : vector<128x1xf32> to vector<128x128xf32>
    %77 = arith.mulf %72, %76 : vector<128x128xf32>
    %c0_38 = arith.constant 0 : index
    %c0_39 = arith.constant 0 : index
    %c0_40 = arith.constant 0 : index
    %78 = vector.load %arg12[%c0_38, %c0_39, %c0_40] : memref<2x1x128xbf16, #tpu.memory_space<vmem>>, vector<1x1x128xbf16>
    %79 = vector.shape_cast %78 : vector<1x1x128xbf16> to vector<1x128xbf16>
    %80 = arith.extf %79 : vector<1x128xbf16> to vector<1x128xf32>
    %81 = vector.broadcast %80 : vector<1x128xf32> to vector<128x128xf32>
    %82 = arith.mulf %77, %81 : vector<128x128xf32>
    %c0_41 = arith.constant 0 : index
    %c0_42 = arith.constant 0 : index
    %c0_43 = arith.constant 0 : index
    %83 = vector.load %arg13[%c0_41, %c0_42, %c0_43] : memref<2x1x128xbf16, #tpu.memory_space<vmem>>, vector<1x1x128xbf16>
    %84 = vector.shape_cast %83 : vector<1x1x128xbf16> to vector<1x128xbf16>
    %85 = arith.extf %84 : vector<1x128xbf16> to vector<1x128xf32>
    %86 = vector.broadcast %85 : vector<1x128xf32> to vector<128x128xf32>
    %87 = arith.addf %82, %86 : vector<128x128xf32>
    %cst_44 = arith.constant 1.000000e+00 : f32
    %88 = vector.broadcast %cst_44 : f32 to vector<128x128xf32>
    %89 = arith.addf %88, %58 : vector<128x128xf32>
    %90 = arith.mulf %87, %89 : vector<128x128xf32>
    %91 = arith.addf %90, %57 : vector<128x128xf32>
    %92 = arith.truncf %91 : vector<128x128xf32> to vector<128x128xbf16>
    %c0_45 = arith.constant 0 : index
    %c0_46 = arith.constant 0 : index
    %c0_47 = arith.constant 0 : index
    %93 = vector.load %arg16[%c0_45, %c0_46, %c0_47] : memref<2x128x128xbf16, #tpu.memory_space<vmem>>, vector<1x128x128xbf16>
    %94 = vector.shape_cast %93 : vector<1x128x128xbf16> to vector<128x128xbf16>
    %cst_48 = arith.constant dense<0.000000e+00> : vector<128x128xf32>
    %95 = tpu.matmul %92, %94, %cst_48 {dimension_numbers = #tpu.dot_dimension_numbers<[1], [0], [0], [1], [0, 0, 1, 1], [], []>} : vector<128x128xbf16>, vector<128x128xbf16>, vector<128x128xf32> -> vector<128x128xf32>
    %c0_49 = arith.constant 0 : index
    %c0_50 = arith.constant 0 : index
    %c0_51 = arith.constant 0 : index
    %96 = vector.load %arg17[%c0_49, %c0_50, %c0_51] : memref<2x1x128xbf16, #tpu.memory_space<vmem>>, vector<1x1x128xbf16>
    %97 = vector.shape_cast %96 : vector<1x1x128xbf16> to vector<1x128xbf16>
    %98 = arith.extf %97 : vector<1x128xbf16> to vector<1x128xf32>
    %99 = vector.broadcast %98 : vector<1x128xf32> to vector<128x128xf32>
    %100 = arith.addf %95, %99 : vector<128x128xf32>
    %101 = arith.negf %100 : vector<128x128xf32>
    %102 = math.exp %101 : vector<128x128xf32>
    %cst_52 = arith.constant 1.000000e+00 : f32
    %103 = vector.broadcast %cst_52 : f32 to vector<128x128xf32>
    %104 = arith.addf %103, %102 : vector<128x128xf32>
    %105 = arith.divf %103, %104 : vector<128x128xf32>
    %106 = arith.mulf %100, %105 : vector<128x128xf32>
    %107 = arith.truncf %106 : vector<128x128xf32> to vector<128x128xbf16>
    %c0_53 = arith.constant 0 : index
    %c0_54 = arith.constant 0 : index
    %c0_55 = arith.constant 0 : index
    %108 = vector.load %arg18[%c0_53, %c0_54, %c0_55] : memref<2x128x128xbf16, #tpu.memory_space<vmem>>, vector<1x128x128xbf16>
    %109 = vector.shape_cast %108 : vector<1x128x128xbf16> to vector<128x128xbf16>
    %cst_56 = arith.constant dense<0.000000e+00> : vector<128x128xf32>
    %110 = tpu.matmul %107, %109, %cst_56 {dimension_numbers = #tpu.dot_dimension_numbers<[1], [0], [0], [1], [0, 0, 1, 1], [], []>} : vector<128x128xbf16>, vector<128x128xbf16>, vector<128x128xf32> -> vector<128x128xf32>
    %c0_57 = arith.constant 0 : index
    %c0_58 = arith.constant 0 : index
    %c0_59 = arith.constant 0 : index
    %111 = vector.load %arg19[%c0_57, %c0_58, %c0_59] : memref<2x1x128xbf16, #tpu.memory_space<vmem>>, vector<1x1x128xbf16>
    %112 = vector.shape_cast %111 : vector<1x1x128xbf16> to vector<1x128xbf16>
    %113 = arith.extf %112 : vector<1x128xbf16> to vector<1x128xf32>
    %114 = vector.broadcast %113 : vector<1x128xf32> to vector<128x128xf32>
    %115 = arith.addf %110, %114 : vector<128x128xf32>
    %116 = arith.mulf %59, %115 : vector<128x128xf32>
    %117 = arith.addf %39, %116 : vector<128x128xf32>
    %c1 = arith.constant 1 : index
    %c0_60 = arith.constant 0 : index
    %c0_61 = arith.constant 0 : index
    %118 = vector.load %arg14[%c1, %c0_60, %c0_61] : memref<2x128x384xbf16, #tpu.memory_space<vmem>>, vector<1x128x384xbf16>
    %119 = vector.shape_cast %118 : vector<1x128x384xbf16> to vector<128x384xbf16>
    %cst_62 = arith.constant dense<0.000000e+00> : vector<128x384xf32>
    %120 = tpu.matmul %48, %119, %cst_62 {dimension_numbers = #tpu.dot_dimension_numbers<[1], [0], [0], [1], [0, 0, 1, 1], [], []>} : vector<128x128xbf16>, vector<128x384xbf16>, vector<128x384xf32> -> vector<128x384xf32>
    %c1_63 = arith.constant 1 : index
    %c0_64 = arith.constant 0 : index
    %c0_65 = arith.constant 0 : index
    %121 = vector.load %arg15[%c1_63, %c0_64, %c0_65] : memref<2x1x384xbf16, #tpu.memory_space<vmem>>, vector<1x1x384xbf16>
    %122 = vector.shape_cast %121 : vector<1x1x384xbf16> to vector<1x384xbf16>
    %123 = arith.extf %122 : vector<1x384xbf16> to vector<1x384xf32>
    %124 = vector.broadcast %123 : vector<1x384xf32> to vector<128x384xf32>
    %125 = arith.addf %120, %124 : vector<128x384xf32>
    %126 = vector.extract_strided_slice %125 {offsets = [0, 0], sizes = [128, 128], strides = [1, 1]} : vector<128x384xf32> to vector<128x128xf32>
    %127 = vector.extract_strided_slice %125 {offsets = [0, 128], sizes = [128, 128], strides = [1, 1]} : vector<128x384xf32> to vector<128x128xf32>
    %128 = vector.extract_strided_slice %125 {offsets = [0, 256], sizes = [128, 128], strides = [1, 1]} : vector<128x384xf32> to vector<128x128xf32>
    %cst_66 = arith.constant dense<0.000000e+00> : vector<128xf32>
    %129 = vector.multi_reduction <add>, %117, %cst_66 [1] : vector<128x128xf32> to vector<128xf32>
    %130 = vector.shape_cast %129 : vector<128xf32> to vector<128x1xf32>
    %cst_67 = arith.constant 1.280000e+02 : f32
    %131 = vector.broadcast %cst_67 : f32 to vector<128x1xf32>
    %132 = arith.divf %130, %131 : vector<128x1xf32>
    %133 = arith.mulf %117, %117 : vector<128x128xf32>
    %cst_68 = arith.constant dense<0.000000e+00> : vector<128xf32>
    %134 = vector.multi_reduction <add>, %133, %cst_68 [1] : vector<128x128xf32> to vector<128xf32>
    %135 = vector.shape_cast %134 : vector<128xf32> to vector<128x1xf32>
    %cst_69 = arith.constant 1.280000e+02 : f32
    %136 = vector.broadcast %cst_69 : f32 to vector<128x1xf32>
    %137 = arith.divf %135, %136 : vector<128x1xf32>
    %138 = arith.mulf %132, %132 : vector<128x1xf32>
    %139 = arith.subf %137, %138 : vector<128x1xf32>
    %140 = vector.broadcast %132 : vector<128x1xf32> to vector<128x128xf32>
    %141 = arith.subf %117, %140 : vector<128x128xf32>
    %cst_70 = arith.constant 9.99999997E-7 : f32
    %142 = vector.broadcast %cst_70 : f32 to vector<128x1xf32>
    %143 = arith.addf %139, %142 : vector<128x1xf32>
    %144 = math.rsqrt %143 : vector<128x1xf32>
    %145 = vector.broadcast %144 : vector<128x1xf32> to vector<128x128xf32>
    %146 = arith.mulf %141, %145 : vector<128x128xf32>
    %c1_71 = arith.constant 1 : index
    %c0_72 = arith.constant 0 : index
    %c0_73 = arith.constant 0 : index
    %147 = vector.load %arg12[%c1_71, %c0_72, %c0_73] : memref<2x1x128xbf16, #tpu.memory_space<vmem>>, vector<1x1x128xbf16>
    %148 = vector.shape_cast %147 : vector<1x1x128xbf16> to vector<1x128xbf16>
    %149 = arith.extf %148 : vector<1x128xbf16> to vector<1x128xf32>
    %150 = vector.broadcast %149 : vector<1x128xf32> to vector<128x128xf32>
    %151 = arith.mulf %146, %150 : vector<128x128xf32>
    %c1_74 = arith.constant 1 : index
    %c0_75 = arith.constant 0 : index
    %c0_76 = arith.constant 0 : index
    %152 = vector.load %arg13[%c1_74, %c0_75, %c0_76] : memref<2x1x128xbf16, #tpu.memory_space<vmem>>, vector<1x1x128xbf16>
    %153 = vector.shape_cast %152 : vector<1x1x128xbf16> to vector<1x128xbf16>
    %154 = arith.extf %153 : vector<1x128xbf16> to vector<1x128xf32>
    %155 = vector.broadcast %154 : vector<1x128xf32> to vector<128x128xf32>
    %156 = arith.addf %151, %155 : vector<128x128xf32>
    %cst_77 = arith.constant 1.000000e+00 : f32
    %157 = vector.broadcast %cst_77 : f32 to vector<128x128xf32>
    %158 = arith.addf %157, %127 : vector<128x128xf32>
    %159 = arith.mulf %156, %158 : vector<128x128xf32>
    %160 = arith.addf %159, %126 : vector<128x128xf32>
    %161 = arith.truncf %160 : vector<128x128xf32> to vector<128x128xbf16>
    %c1_78 = arith.constant 1 : index
    %c0_79 = arith.constant 0 : index
    %c0_80 = arith.constant 0 : index
    %162 = vector.load %arg16[%c1_78, %c0_79, %c0_80] : memref<2x128x128xbf16, #tpu.memory_space<vmem>>, vector<1x128x128xbf16>
    %163 = vector.shape_cast %162 : vector<1x128x128xbf16> to vector<128x128xbf16>
    %cst_81 = arith.constant dense<0.000000e+00> : vector<128x128xf32>
    %164 = tpu.matmul %161, %163, %cst_81 {dimension_numbers = #tpu.dot_dimension_numbers<[1], [0], [0], [1], [0, 0, 1, 1], [], []>} : vector<128x128xbf16>, vector<128x128xbf16>, vector<128x128xf32> -> vector<128x128xf32>
    %c1_82 = arith.constant 1 : index
    %c0_83 = arith.constant 0 : index
    %c0_84 = arith.constant 0 : index
    %165 = vector.load %arg17[%c1_82, %c0_83, %c0_84] : memref<2x1x128xbf16, #tpu.memory_space<vmem>>, vector<1x1x128xbf16>
    %166 = vector.shape_cast %165 : vector<1x1x128xbf16> to vector<1x128xbf16>
    %167 = arith.extf %166 : vector<1x128xbf16> to vector<1x128xf32>
    %168 = vector.broadcast %167 : vector<1x128xf32> to vector<128x128xf32>
    %169 = arith.addf %164, %168 : vector<128x128xf32>
    %170 = arith.negf %169 : vector<128x128xf32>
    %171 = math.exp %170 : vector<128x128xf32>
    %cst_85 = arith.constant 1.000000e+00 : f32
    %172 = vector.broadcast %cst_85 : f32 to vector<128x128xf32>
    %173 = arith.addf %172, %171 : vector<128x128xf32>
    %174 = arith.divf %172, %173 : vector<128x128xf32>
    %175 = arith.mulf %169, %174 : vector<128x128xf32>
    %176 = arith.truncf %175 : vector<128x128xf32> to vector<128x128xbf16>
    %c1_86 = arith.constant 1 : index
    %c0_87 = arith.constant 0 : index
    %c0_88 = arith.constant 0 : index
    %177 = vector.load %arg18[%c1_86, %c0_87, %c0_88] : memref<2x128x128xbf16, #tpu.memory_space<vmem>>, vector<1x128x128xbf16>
    %178 = vector.shape_cast %177 : vector<1x128x128xbf16> to vector<128x128xbf16>
    %cst_89 = arith.constant dense<0.000000e+00> : vector<128x128xf32>
    %179 = tpu.matmul %176, %178, %cst_89 {dimension_numbers = #tpu.dot_dimension_numbers<[1], [0], [0], [1], [0, 0, 1, 1], [], []>} : vector<128x128xbf16>, vector<128x128xbf16>, vector<128x128xf32> -> vector<128x128xf32>
    %c1_90 = arith.constant 1 : index
    %c0_91 = arith.constant 0 : index
    %c0_92 = arith.constant 0 : index
    %180 = vector.load %arg19[%c1_90, %c0_91, %c0_92] : memref<2x1x128xbf16, #tpu.memory_space<vmem>>, vector<1x1x128xbf16>
    %181 = vector.shape_cast %180 : vector<1x1x128xbf16> to vector<1x128xbf16>
    %182 = arith.extf %181 : vector<1x128xbf16> to vector<1x128xf32>
    %183 = vector.broadcast %182 : vector<1x128xf32> to vector<128x128xf32>
    %184 = arith.addf %179, %183 : vector<128x128xf32>
    %185 = arith.mulf %128, %184 : vector<128x128xf32>
    %186 = arith.addf %117, %185 : vector<128x128xf32>
    %c0_93 = arith.constant 0 : index
    %c0_94 = arith.constant 0 : index
    %187 = vector.load %arg20[%c0_93, %c0_94] : memref<128x256xbf16, #tpu.memory_space<vmem>>, vector<128x256xbf16>
    %cst_95 = arith.constant dense<0.000000e+00> : vector<128x256xf32>
    %188 = tpu.matmul %48, %187, %cst_95 {dimension_numbers = #tpu.dot_dimension_numbers<[1], [0], [0], [1], [0, 0, 1, 1], [], []>} : vector<128x128xbf16>, vector<128x256xbf16>, vector<128x256xf32> -> vector<128x256xf32>
    %c0_96 = arith.constant 0 : index
    %c0_97 = arith.constant 0 : index
    %189 = vector.load %arg21[%c0_96, %c0_97] : memref<1x256xbf16, #tpu.memory_space<vmem>>, vector<1x256xbf16>
    %190 = arith.extf %189 : vector<1x256xbf16> to vector<1x256xf32>
    %191 = vector.broadcast %190 : vector<1x256xf32> to vector<128x256xf32>
    %192 = arith.addf %188, %191 : vector<128x256xf32>
    %193 = vector.extract_strided_slice %192 {offsets = [0, 0], sizes = [128, 128], strides = [1, 1]} : vector<128x256xf32> to vector<128x128xf32>
    %194 = vector.extract_strided_slice %192 {offsets = [0, 128], sizes = [128, 128], strides = [1, 1]} : vector<128x256xf32> to vector<128x128xf32>
    %cst_98 = arith.constant dense<0.000000e+00> : vector<128xf32>
    %195 = vector.multi_reduction <add>, %186, %cst_98 [1] : vector<128x128xf32> to vector<128xf32>
    %196 = vector.shape_cast %195 : vector<128xf32> to vector<128x1xf32>
    %cst_99 = arith.constant 1.280000e+02 : f32
    %197 = vector.broadcast %cst_99 : f32 to vector<128x1xf32>
    %198 = arith.divf %196, %197 : vector<128x1xf32>
    %199 = arith.mulf %186, %186 : vector<128x128xf32>
    %cst_100 = arith.constant dense<0.000000e+00> : vector<128xf32>
    %200 = vector.multi_reduction <add>, %199, %cst_100 [1] : vector<128x128xf32> to vector<128xf32>
    %201 = vector.shape_cast %200 : vector<128xf32> to vector<128x1xf32>
    %cst_101 = arith.constant 1.280000e+02 : f32
    %202 = vector.broadcast %cst_101 : f32 to vector<128x1xf32>
    %203 = arith.divf %201, %202 : vector<128x1xf32>
    %204 = arith.mulf %198, %198 : vector<128x1xf32>
    %205 = arith.subf %203, %204 : vector<128x1xf32>
    %206 = vector.broadcast %198 : vector<128x1xf32> to vector<128x128xf32>
    %207 = arith.subf %186, %206 : vector<128x128xf32>
    %cst_102 = arith.constant 9.99999997E-7 : f32
    %208 = vector.broadcast %cst_102 : f32 to vector<128x1xf32>
    %209 = arith.addf %205, %208 : vector<128x1xf32>
    %210 = math.rsqrt %209 : vector<128x1xf32>
    %211 = vector.broadcast %210 : vector<128x1xf32> to vector<128x128xf32>
    %212 = arith.mulf %207, %211 : vector<128x128xf32>
    %cst_103 = arith.constant 1.000000e+00 : f32
    %213 = vector.broadcast %cst_103 : f32 to vector<128x128xf32>
    %214 = arith.addf %213, %194 : vector<128x128xf32>
    %215 = arith.mulf %212, %214 : vector<128x128xf32>
    %216 = arith.addf %215, %193 : vector<128x128xf32>
    %217 = arith.truncf %216 : vector<128x128xf32> to vector<128x128xbf16>
    %c0_104 = arith.constant 0 : index
    %c0_105 = arith.constant 0 : index
    %218 = vector.load %arg22[%c0_104, %c0_105] : memref<128x16xbf16, #tpu.memory_space<vmem>>, vector<128x16xbf16>
    %cst_106 = arith.constant dense<0.000000e+00> : vector<128x16xf32>
    %219 = tpu.matmul %217, %218, %cst_106 {dimension_numbers = #tpu.dot_dimension_numbers<[1], [0], [0], [1], [0, 0, 1, 1], [], []>} : vector<128x128xbf16>, vector<128x16xbf16>, vector<128x16xf32> -> vector<128x16xf32>
    %c0_107 = arith.constant 0 : index
    %c0_108 = arith.constant 0 : index
    %220 = vector.load %arg23[%c0_107, %c0_108] : memref<1x16xbf16, #tpu.memory_space<vmem>>, vector<1x16xbf16>
    %221 = arith.extf %220 : vector<1x16xbf16> to vector<1x16xf32>
    %222 = vector.broadcast %221 : vector<1x16xf32> to vector<128x16xf32>
    %223 = arith.addf %219, %222 : vector<128x16xf32>
    %224 = arith.subf %0, %1 : vector<128x16xf32>
    %225 = arith.subf %223, %224 : vector<128x16xf32>
    %226 = arith.mulf %225, %225 : vector<128x16xf32>
    %cst_109 = arith.constant 6.250000e-02 : f32
    %227 = vector.broadcast %cst_109 : f32 to vector<1x16xf32>
    %cst_110 = arith.constant dense<0.000000e+00> : vector<1x128xf32>
    %228 = tpu.matmul %227, %226, %cst_110 {dimension_numbers = #tpu.dot_dimension_numbers<[1], [1], [0], [0], [0, 0, 1, 0], [], []>} : vector<1x16xf32>, vector<128x16xf32>, vector<1x128xf32> -> vector<1x128xf32>
    %c0_111 = arith.constant 0 : index
    %c0_112 = arith.constant 0 : index
    %229 = vector.load %arg24[%c0_111, %c0_112] : memref<1x128xf32, #tpu.memory_space<vmem>>, vector<1x128xf32>
    tpu.vector_store %arg24[%c0_111, %c0_112], %228 {strides = array<i32>} : memref<1x128xf32, #tpu.memory_space<vmem>>, vector<1x128xf32>,
    return
  }
  func.func @transform_0(%arg0: i32) -> (i32, i32) {
    %c0_i32 = arith.constant 0 : i32
    %c0_i32_0 = arith.constant 0 : i32
    return %arg0, %c0_i32 : i32, i32
  }
  func.func @transform_1(%arg0: i32) -> (i32, i32) {
    %c0_i32 = arith.constant 0 : i32
    %c0_i32_0 = arith.constant 0 : i32
    return %arg0, %c0_i32 : i32, i32
  }
  func.func @transform_2(%arg0: i32) -> (i32, i32) {
    %c0_i32 = arith.constant 0 : i32
    %c0_i32_0 = arith.constant 0 : i32
    return %arg0, %c0_i32 : i32, i32
  }
  func.func @transform_3(%arg0: i32) -> (i32, i32) {
    %c0_i32 = arith.constant 0 : i32
    %c0_i32_0 = arith.constant 0 : i32
    return %arg0, %c0_i32 : i32, i32
  }
  func.func @transform_4(%arg0: i32) -> (i32, i32) {
    %c0_i32 = arith.constant 0 : i32
    %c0_i32_0 = arith.constant 0 : i32
    return %arg0, %c0_i32 : i32, i32
  }
  func.func @transform_5(%arg0: i32) -> (i32, i32) {
    %c0_i32 = arith.constant 0 : i32
    %c0_i32_0 = arith.constant 0 : i32
    %c0_i32_1 = arith.constant 0 : i32
    return %c0_i32, %c0_i32_0 : i32, i32
  }
  func.func @transform_6(%arg0: i32) -> (i32, i32) {
    %c0_i32 = arith.constant 0 : i32
    %c0_i32_0 = arith.constant 0 : i32
    %c0_i32_1 = arith.constant 0 : i32
    return %c0_i32, %c0_i32_0 : i32, i32
  }
  func.func @transform_7(%arg0: i32) -> (i32, i32) {
    %c0_i32 = arith.constant 0 : i32
    %c0_i32_0 = arith.constant 0 : i32
    %c0_i32_1 = arith.constant 0 : i32
    return %c0_i32, %c0_i32_0 : i32, i32
  }
  func.func @transform_8(%arg0: i32) -> (i32, i32) {
    %c0_i32 = arith.constant 0 : i32
    %c0_i32_0 = arith.constant 0 : i32
    %c0_i32_1 = arith.constant 0 : i32
    return %c0_i32, %c0_i32_0 : i32, i32
  }
  func.func @transform_9(%arg0: i32) -> (i32, i32) {
    %c0_i32 = arith.constant 0 : i32
    %c0_i32_0 = arith.constant 0 : i32
    %c0_i32_1 = arith.constant 0 : i32
    return %c0_i32, %c0_i32_0 : i32, i32
  }
  func.func @transform_10(%arg0: i32) -> (i32, i32) {
    %c0_i32 = arith.constant 0 : i32
    %c0_i32_0 = arith.constant 0 : i32
    %c0_i32_1 = arith.constant 0 : i32
    return %c0_i32, %c0_i32_0 : i32, i32
  }
  func.func @transform_11(%arg0: i32) -> (i32, i32, i32) {
    %c0_i32 = arith.constant 0 : i32
    %c0_i32_0 = arith.constant 0 : i32
    %c0_i32_1 = arith.constant 0 : i32
    %c0_i32_2 = arith.constant 0 : i32
    return %c0_i32, %c0_i32_0, %c0_i32_1 : i32, i32, i32
  }
  func.func @transform_12(%arg0: i32) -> (i32, i32, i32) {
    %c0_i32 = arith.constant 0 : i32
    %c0_i32_0 = arith.constant 0 : i32
    %c0_i32_1 = arith.constant 0 : i32
    %c0_i32_2 = arith.constant 0 : i32
    return %c0_i32, %c0_i32_0, %c0_i32_1 : i32, i32, i32
  }
  func.func @transform_13(%arg0: i32) -> (i32, i32, i32) {
    %c0_i32 = arith.constant 0 : i32
    %c0_i32_0 = arith.constant 0 : i32
    %c0_i32_1 = arith.constant 0 : i32
    %c0_i32_2 = arith.constant 0 : i32
    return %c0_i32, %c0_i32_0, %c0_i32_1 : i32, i32, i32
  }
  func.func @transform_14(%arg0: i32) -> (i32, i32, i32) {
    %c0_i32 = arith.constant 0 : i32
    %c0_i32_0 = arith.constant 0 : i32
    %c0_i32_1 = arith.constant 0 : i32
    %c0_i32_2 = arith.constant 0 : i32
    return %c0_i32, %c0_i32_0, %c0_i32_1 : i32, i32, i32
  }
  func.func @transform_15(%arg0: i32) -> (i32, i32, i32) {
    %c0_i32 = arith.constant 0 : i32
    %c0_i32_0 = arith.constant 0 : i32
    %c0_i32_1 = arith.constant 0 : i32
    %c0_i32_2 = arith.constant 0 : i32
    return %c0_i32, %c0_i32_0, %c0_i32_1 : i32, i32, i32
  }
  func.func @transform_16(%arg0: i32) -> (i32, i32, i32) {
    %c0_i32 = arith.constant 0 : i32
    %c0_i32_0 = arith.constant 0 : i32
    %c0_i32_1 = arith.constant 0 : i32
    %c0_i32_2 = arith.constant 0 : i32
    return %c0_i32, %c0_i32_0, %c0_i32_1 : i32, i32, i32
  }
  func.func @transform_17(%arg0: i32) -> (i32, i32, i32) {
    %c0_i32 = arith.constant 0 : i32
    %c0_i32_0 = arith.constant 0 : i32
    %c0_i32_1 = arith.constant 0 : i32
    %c0_i32_2 = arith.constant 0 : i32
    return %c0_i32, %c0_i32_0, %c0_i32_1 : i32, i32, i32
  }
  func.func @transform_18(%arg0: i32) -> (i32, i32, i32) {
    %c0_i32 = arith.constant 0 : i32
    %c0_i32_0 = arith.constant 0 : i32
    %c0_i32_1 = arith.constant 0 : i32
    %c0_i32_2 = arith.constant 0 : i32
    return %c0_i32, %c0_i32_0, %c0_i32_1 : i32, i32, i32
  }
  func.func @transform_19(%arg0: i32) -> (i32, i32) {
    %c0_i32 = arith.constant 0 : i32
    %c0_i32_0 = arith.constant 0 : i32
    %c0_i32_1 = arith.constant 0 : i32
    return %c0_i32, %c0_i32_0 : i32, i32
  }
  func.func @transform_20(%arg0: i32) -> (i32, i32) {
    %c0_i32 = arith.constant 0 : i32
    %c0_i32_0 = arith.constant 0 : i32
    %c0_i32_1 = arith.constant 0 : i32
    return %c0_i32, %c0_i32_0 : i32, i32
  }
  func.func @transform_21(%arg0: i32) -> (i32, i32) {
    %c0_i32 = arith.constant 0 : i32
    %c0_i32_0 = arith.constant 0 : i32
    %c0_i32_1 = arith.constant 0 : i32
    return %c0_i32, %c0_i32_0 : i32, i32
  }
  func.func @transform_22(%arg0: i32) -> (i32, i32) {
    %c0_i32 = arith.constant 0 : i32
    %c0_i32_0 = arith.constant 0 : i32
    %c0_i32_1 = arith.constant 0 : i32
    return %c0_i32, %c0_i32_0 : i32, i32
  }
  func.func @transform_23(%arg0: i32) -> (i32, i32) {
    %c0_i32 = arith.constant 0 : i32
    %c0_i32_0 = arith.constant 0 : i32
    return %c0_i32, %arg0 : i32, i32
  }
}

</mosaic_0001>

<bundles_post_ra>
// kernel: tpu_custom_call.1
= control target key start
LH: loop header
LB: loop body
LE: loop exit
PB: predicated region body
PF: predicated region fallthrough
CT: control target
= control target key end

     0   :  { %s9898_s0 = inlined_call_operand.vmem [shape: f32[256,16], index: 0, kind: input, shape index: {}]   ;;  %s9899_s1 = inlined_call_operand.vmem [shape: f32[256,16], index: 1, kind: input, shape index: {}]   ;;  %s9900_s2 = inlined_call_operand.vmem [shape: f32[256,1], index: 2, kind: input, shape index: {}]   ;;  %s9901_s3 = inlined_call_operand.vmem [shape: bf16[256,256], index: 3, kind: input, shape index: {}]   ;;  %s9902_s4 = inlined_call_operand.vmem [shape: f32[256,32], index: 4, kind: input, shape index: {}]   ;;  %s9903_s5 = inlined_call_operand.vmem [shape: bf16[256,128], index: 5, kind: input, shape index: {}]   ;;  %s9904_s6 = inlined_call_operand.vmem [shape: bf16[1,128], index: 6, kind: input, shape index: {}]   ;;  %s9905_s7 = inlined_call_operand.hbm [shape: bf16[128,128], index: 7, kind: input, shape index: {}]   ;;  %s9906_s8 = inlined_call_operand.hbm [shape: bf16[1,128], index: 8, kind: input, shape index: {}]   ;;  %s9907_s9 = inlined_call_operand.vmem [shape: bf16[48,256], index: 9, kind: input, shape index: {}]   ;;  %s9908_s10 = inlined_call_operand.vmem [shape: bf16[1,256], index: 10, kind: input, shape index: {}]   ;;  %s9909_s11 = inlined_call_operand.vmem [shape: bf16[2,1,128], index: 11, kind: input, shape index: {}]   ;;  %s9910_s12 = inlined_call_operand.vmem [shape: bf16[2,1,128], index: 12, kind: input, shape index: {}]   ;;  %s9911_s13 = inlined_call_operand.vmem [shape: bf16[2,128,384], index: 13, kind: input, shape index: {}]   ;;  %s9912_s14 = inlined_call_operand.vmem [shape: bf16[2,1,384], index: 14, kind: input, shape index: {}]   ;;  %s9913_s15 = inlined_call_operand.vmem [shape: bf16[2,128,128], index: 15, kind: input, shape index: {}]   ;;  %s9914_s16 = inlined_call_operand.vmem [shape: bf16[2,1,128], index: 16, kind: input, shape index: {}]   ;;  %s9915_s17 = inlined_call_operand.vmem [shape: bf16[2,128,128], index: 17, kind: input, shape index: {}]   ;;  %s9916_s18 = inlined_call_operand.vmem [shape: bf16[2,1,128], index: 18, kind: input, shape index: {}]   ;;  %s9917_s19 = inlined_call_operand.vmem [shape: bf16[128,256], index: 19, kind: input, shape index: {}]   ;;  %s9918_s20 = inlined_call_operand.vmem [shape: bf16[1,256], index: 20, kind: input, shape index: {}]   ;;  %s9919_s21 = inlined_call_operand.vmem [shape: bf16[128,16], index: 21, kind: input, shape index: {}]   ;;  %s9920_s22 = inlined_call_operand.vmem [shape: bf16[1,16], index: 22, kind: input, shape index: {}]   ;;  %s9921_s23 = inlined_call_operand.hbm [shape: f32[1,256], index: 23, kind: output, shape index: {}]  }
   0x1   :  { %10013 = sst [smem:[#allocation93_spill]] %s9898_s0 }
   0x2   :  { %10014 = sst [smem:[#allocation94_spill]] %s9899_s1 }
   0x3   :  { %10015 = sst [smem:[#allocation95_spill]] %s9900_s2 }
   0x4   :  { %10016 = sst [smem:[#allocation96_spill]] %s9901_s3 }
   0x5   :  { %10017 = sst [smem:[#allocation97_spill]] %s9902_s4 }
   0x6   :  { %10018 = sst [smem:[#allocation98_spill]] %s9903_s5 }
   0x7   :  { %10019 = sst [smem:[#allocation99_spill]] %s9904_s6 }
   0x8   :  { %10020 = sst [smem:[#allocation100_spill]] %s9905_s7 }
   0x9   :  { %10021 = sst [smem:[#allocation101_spill]] %s9920_s22 }
   0xa   :  { %10022 = sst [smem:[#allocation102_spill]] %s9921_s23 }
   0xb   :  { %28 = vsyncpa [#allocation3], 0 }
   0xc   :  { %29 = vsyncpa [#allocation6], 0 }
   0xd   :  { %30 = vsyncpa [#allocation4], 0 }
   0xe   :  { %32 = vsyncpa [#allocation4 + $0x1], 0  ;;  %s7289_s4 = smov 0   ;;  %s7291_s30 = smov 0  }
   0xf   :  { %s7293_s24 = smov 0   ;;  %s7295_s25 = smov 0  }
  0x10 LB: > { %10023 = sst [smem:[#allocation11_spill]] %s7144_s4  ;;  %s7310_s5 = sadd.s32 4294967295, %s7156_s25   ;;  %s7156_s25 = sphi %s7295_s25, %s10278_s25   ;;  %s7152_s24 = sphi %s7293_s24, %s10281_s24   ;;  %s7148_s30 = sphi %s7291_s30, %s10280_s30   ;;  %s7144_s4 = sphi %s7289_s4, %s10279_s4  }
  0x11   : > { %10024 = sst [smem:[#allocation12_spill]] %s7148_s30  ;;  %s5518_s1 = sadd.s32 4294967294, %s7156_s25  }
  0x12   : > { %10025 = sst [smem:[#allocation13_spill]] %s7152_s24  ;;  %s7314_s26 = sadd.s32 1, %s7156_s25  }
  0x13   : > { %10026 = sst [smem:[#allocation14_spill]] %s7156_s25  ;;  %s553_s2 = sadd.s32 1, %s7152_s24 }
  0x14   : > { %10027 = sst [smem:[#allocation15_spill]] %s7314_s26  ;;  %s550_s6 = ssub.s32 %s7156_s25, %s7314_s26 }
  0x15   : > { %p563_p0 = scmp.ne.s32.totalorder %s7152_s24, %s7148_s30  ;;  %p551_p1 = scmp.eq.s32.totalorder %s550_s6, 0 }
  0x16   : > { %p564_p2 = scmp.eq.s32.totalorder %s7310_s5, 1  ;;  %p569_p3 = scmp.ne.s32.totalorder %s7148_s30, %s7144_s4 }
  0x17   : > { %p570_p4 = scmp.eq.s32.totalorder %s5518_s1, 1  ;;  %p5519_p7 = scmp.ge.s32.totalorder %s7156_s25, 1 }
  0x18   : > { %s7325_s27 = scalar_select %p551_p1, %s7152_s24, %s553_s2  }
  0x19   : > { %p7327_p5 = por %p564_p2, %p563_p0  ;;  %p7331_p6 = por %p570_p4, %p569_p3 }
  0x1a   : > { %10028 = sst [smem:[#allocation16_spill]] %s7325_s27  ;;  %p577_p8 = scmp.lt.s32.totalorder %s7156_s25, 3 }
  0x1b   : > { %s10029_s7 = scalar_select %p7327_p5, 1, 0 }
  0x1c   : > { %s10031_s28 = scalar_select %p7331_p6, 1, 0 }
  0x1d   : > { %10030 = sst [smem:[#allocation17_spill]] %s10029_s7  ;;  %p9931_p9 = scmp.eq.s32.totalorder %s7310_s5, 0 }
  0x1e   : > { %10032 = sst [smem:[#allocation18_spill]] %s10031_s28  ;;  %p7338_p10 = pnand %p5519_p7, %p577_p8 }
  0x1f   : > { %s7158_s3 = smov [#allocation2]   ;;  %s7159_s2 = smov [#allocation5]  }
  0x20   : > { %s10033_s29 = scalar_select %p7338_p10, 1, 0 }
  0x21   : > { %s595_s0 = sshll.u32 %s7158_s3, 4  ;;  %p6391_p11 = pneg %p7338_p10  ;;  %s596_s0 = int_to_ptr.vmem [resolvable:$true] %s595_s0 }
  0x22   : > { %s609_s6 = sshll.u32 %s7159_s2, 4  ;;  %s10035_s26 = sld [smem:[#allocation100_spill]]  ;;  %s7350_s6 = int_to_ptr.vmem [resolvable:$true] %s609_s6 }
  0x23   : > { %p7346_p12 = pnand %p9931_p9, %p6391_p11 }
  0x25   : > { %p7032_p0 = pneg %p7346_p12 }
  0x28   : > { %s7030_s28 = scalar_lea.hbm %s10035_s26, 1024 }
  0x29   : > { %p7031_p13 = scmp.ne.s32.totalorder %s10035_s26, %s7030_s28  ;;  %p7037_p3 = scmp.lt.u32.totalorder %s7030_s28, %s10035_s26 }
  0x2b   : > { %p7033_p1 = pnand %p7032_p0, %p7031_p13 }
  0x2d   : > { %p7034_p2 = pneg %p7033_p1 }
  0x2f   : > { %p7039_p4 = pnand %p7037_p3, %p7034_p2 }
  0x31   : > { %7042 = shalt.err (!%p7039_p4)
}
  0x32   : > { %s7043_s2 = scalar_lea.vmem %s596_s0, 1024  ;;  %p7051_p9 = scmp.lt.s32.totalorder %s596_s0, %s596_s0 }
  0x33   : > { %p7044_p7 = scmp.ne.s32.totalorder %s596_s0, %s7043_s2  ;;  %p7052_p6 = scmp.lt.s32.totalorder %s7043_s2, %s7043_s2 }
  0x35   : > { %p7046_p8 = pnand %p7044_p7, %p7032_p0  ;;  %p7053_p5 = por %p7052_p6, %p7051_p9 }
  0x37   : > { %p7047_p11 = pneg %p7046_p8 }
  0x39   : > { %p7054_p10 = pnand %p7053_p5, %p7047_p11 }
  0x3b   : > { %7057 = shalt.err (!%p7054_p10)
}
  0x3c   : > { %s7160_s4 = smov 64   ;;  %s7161_s24 = smov 4  }
  0x3d   : > { %6394 = dma.hbm_to_vmem [thread:$0]  (!%p7346_p12), %s10035_s26, 1024, %s596_s0, [#allocation3], %s7160_s4, %s7160_s4, %s7161_s24  }
  0x3e   : > { %s7058_s3 = scalar_lea.hbm %s9906_s8, 16 }
  0x3f   : > { %p7059_p13 = scmp.ne.s32.totalorder %s9906_s8, %s7058_s3  ;;  %p7065_p9 = scmp.lt.u32.totalorder %s7058_s3, %s9906_s8 }
  0x41   : > { %p7061_p5 = pnand %p7059_p13, %p7032_p0 }
  0x43   : > { %p7062_p6 = pneg %p7061_p5 }
  0x45   : > { %p7067_p10 = pnand %p7065_p9, %p7062_p6 }
  0x47   : > { %7070 = shalt.err (!%p7067_p10)
}
  0x48   : > { %s7071_s0 = scalar_lea.vmem %s7350_s6, 16  ;;  %s7078_s30 = scalar_lea.vmem %s7350_s6, 32 }
  0x49   : > { %p7072_p1 = scmp.ne.s32.totalorder %s7350_s6, %s7071_s0  ;;  %p7079_p4 = scmp.lt.s32.totalorder %s7350_s6, %s7350_s6 }
  0x4a   : > { %p7080_p7 = scmp.lt.s32.totalorder %s7078_s30, %s7071_s0 }
  0x4b   : > { %p7074_p2 = pnand %p7072_p1, %p7032_p0 }
  0x4c   : > { %p7081_p8 = por %p7080_p7, %p7079_p4 }
  0x4d   : > { %p7075_p3 = pneg %p7074_p2 }
  0x4f   : > { %p7082_p11 = pnand %p7081_p8, %p7075_p3 }
  0x51   : > { %7085 = shalt.err (!%p7082_p11)
}
  0x52   : > { %6397 = dma.hbm_to_vmem [thread:$0]  (!%p7346_p12), %s9906_s8, 16, %s7350_s6, [#allocation6]  }
  0x53   : > { %p10036_p13 = scmp.ne.s32.totalorder %s10033_s29, 0 }
  0x55   : > { %710 = sbr.rel (%p10036_p13) target bundleno = 2746 (0xaba), region = 112 }
  0x5c   : > { %p10037_p0 = scmp.eq.s32.totalorder %s7310_s5, 0 }
  0x5e   : > { %7131 = dma.done.wait (%p10037_p0), [#allocation3], 1024   ;;  %p10038_p5 = pmov %p10037_p0 }
  0x5f   : > { %p10039_p6 = pmov %p10037_p0 }
  0x60   : > { %7133 = vsyncadd (%p10038_p5), [#allocation3], 4294966272 }
  0x61   : > { %7135 = dma.done.wait (%p10039_p6), [#allocation6], 16   ;;  %p10040_p9 = pmov %p10037_p0 }
  0x62   : > { %v9937_v0 = vmov 0   ;;  %s10041_s6 = sld [smem:[#allocation98_spill]]  ;;  %s7416_s4 = sshll.u32 %s7310_s5, 4  ;;  %vm1796_vm0 = vcmask 130048   ;;  %vm1878_vm1 = vcmask 392192   ;;  %vm7165_vm2 = vmmov 0  }
  0x63   : > { %7137 = vsyncadd (%p10040_p9), [#allocation6], 4294967280  ;;  %6450 = vset.pattern.permute.xlu1 %v9937_v0  ;;  %6449 = vset.pattern.permute.xlu0 %v9937_v0  ;;  %p799_p12 = scmp.lt.s32.totalorder %s7416_s4, 31  ;;  %s10042_s5 = sld [smem:[#allocation96_spill]] }
  0x64   : > { %s10043_s0 = sld [smem:[#allocation95_spill]]  ;;  %s10044_s27 = sld [smem:[#allocation97_spill]]  ;;  %vm9775_vm3 = vmpackc.low %vm1796_vm0, %vm1796_vm0 }
  0x65   : > { %s800_s22 = scalar_select %p799_p12, %s7416_s4, 31 }
  0x66   : > { %s7163_s3 = smov 16   ;;  %s10046_s29 = sld [smem:[#allocation94_spill]] }
  0x67   : > { %s7441_s23 = sshll.u32 %s800_s22, 3  ;;  %s10221_s22 = sld [smem:[#allocation101_spill]] }
  0x68   : > { %v6491_v1 = vld [vmem:[%s10041_s6 + $0x40] sm:$0xff]   ;;  %v6493_v3 = vld [vmem:[%s10041_s6 + $0x48] sm:$0xff]   ;;  %v6495_v5 = vld [vmem:[%s10041_s6 + $0x50] sm:$0xff]  }
  0x69   : > { %v6492_v2 = vld [vmem:[%s10041_s6] sm:$0xff]   ;;  %5849 = vmatprep.subr.bf16.mxu0 %v6491_v1  ;;  %v6494_v4 = vld [vmem:[%s10041_s6 + $0x8] sm:$0xff]   ;;  %v6496_v6 = vld [vmem:[%s10041_s6 + $0x10] sm:$0xff]   ;;  %s7450_s2 = scalar_lea.vmem %s10042_s5, %s7441_s23  ;;  %s7168_s5 = smov [#allocation7]  }
  0x6a   : > { %5850 = vmatpush3.bf16.msra.mxu0 %v6492_v2  ;;  %v6497_v7 = vld [vmem:[%s10041_s6 + $0x58] sm:$0xff]   ;;  %v6499_v9 = vld [vmem:[%s10041_s6 + $0x60] sm:$0xff]   ;;  %v6501_v11 = vld [vmem:[%s10041_s6 + $0x68] sm:$0xff]   ;;  %s7472_s30 = scalar_lea.vmem %s10043_s0, %s7441_s23  ;;  %s7490_s28 = scalar_lea.vmem %s10044_s27, %s7441_s23 }
  0x6b   : > { %5851 = vmatprep.subr.bf16.mxu0 %v6493_v3  ;;  %v6498_v8 = vld [vmem:[%s10041_s6 + $0x18] sm:$0xff]   ;;  %v6500_v10 = vld [vmem:[%s10041_s6 + $0x20] sm:$0xff]   ;;  %v6502_v13 = vld [vmem:[%s10041_s6 + $0x28] sm:$0xff]   ;;  %s10045_s0 = sld [smem:[#allocation93_spill]]  ;;  %s10272_s27 = sld [smem:[#allocation102_spill]] }
  0x6c   : > { %v6509_v12 = vld [vmem:[%s7450_s2 + $0x4] ss:$8 sps:$4 sm:$0xff]   ;;  %v6503_v14 = vld [vmem:[%s10041_s6 + $0x70] sm:$0xff]   ;;  %v6505_v16 = vld [vmem:[%s10041_s6 + $0x78] sm:$0xff]   ;;  %s7552_s1 = scalar_lea.vmem %s10046_s29, %s7441_s23 }
  0x6d   : > { %1364 = vmatprep.mubr.bf16.mxu0 %v6509_v12  ;;  %v6504_v15 = vld [vmem:[%s10041_s6 + $0x30] sm:$0xff]   ;;  %v865_v17 = vld [vmem:[%s7472_s30 + $0x18] sm:$0xff]  ;;  %v862_v19 = vld [vmem:[%s7472_s30] sm:$0xff] }
  0x6e   : > { %5852 = vmatpush3.bf16.msra.mxu0 %v6494_v4  ;;  %v6506_v18 = vld [vmem:[%s10041_s6 + $0x38] sm:$0xff]   ;;  %895 = vperm.xlu1 %6450, %v865_v17   ;;  %v974_v20 = vsub.f32 1.0, %v862_v19  ;;  %v863_v21 = vld [vmem:[%s7472_s30 + $0x8] sm:$0xff]  ;;  %v864_v25 = vld [vmem:[%s7472_s30 + $0x10] sm:$0xff]  ;;  %v977_v26 = vsub.f32 1.0, %v865_v17 }
  0x6f   : > { %5853 = vmatprep.subr.bf16.mxu0 %v6495_v5  ;;  %880 = vperm.xlu0 %6449, %v862_v19   ;;  %v6507_v22 = vld [vmem:[%s7450_s2] ss:$8 sps:$4 sm:$0xff]   ;;  %v6510_v23 = vld [vmem:[%s7450_s2 + $0x14] ss:$8 sps:$4 sm:$0xff]   ;;  %v975_v24 = vsub.f32 1.0, %v863_v21  ;;  %v976_v28 = vsub.f32 1.0, %v864_v25 }
  0x70   : > { %v6512_v27 = vld [vmem:[%s7450_s2 + $0x10] ss:$8 sps:$4 sm:$0xff]   ;;  %v1716_v29 = vld [vmem:[%s7490_s28] sm:$0xff]  ;;  %v1717_v30 = vld [vmem:[%s7490_s28 + $0x8] sm:$0xff] }
  0x71   : > { %v866_v31 = vld [vmem:[%s7472_s30 + $0x20] sm:$0xff]  ;;  %v6451_v34 = vpack.i.bf16 %v1717_v30, %v1716_v29  ;;  %v1718_v35 = vld [vmem:[%s7490_s28 + $0x10] sm:$0xff]  ;;  %v1719_v36 = vld [vmem:[%s7490_s28 + $0x18] sm:$0xff] }
  0x72   : > { %5854 = vmatpush3.bf16.msra.mxu0 %v6496_v6  ;;  %992 = vperm.xlu1 %6450, %v974_v20   ;;  %v6513_v32 = vld [vmem:[%s7450_s2 + $0x24] ss:$8 sps:$4 sm:$0xff]   ;;  %v978_v33 = vsub.f32 1.0, %v866_v31  ;;  %v6515_v38 = vld [vmem:[%s7450_s2 + $0x20] ss:$8 sps:$4 sm:$0xff]   ;;  %v6456_v40 = vpack.i.bf16 %v1719_v36, %v1718_v35  ;;  %v868_v42 = vld [vmem:[%s7472_s30 + $0x30] sm:$0xff] }
  0x73   : > { %5855 = vmatprep.subr.bf16.mxu0 %v6497_v7  ;;  %885 = vperm.xlu0 %6449, %v863_v21   ;;  %v867_v37 = vld [vmem:[%s7472_s30 + $0x28] sm:$0xff]  ;;  %v6516_v39 = vld [vmem:[%s7450_s2 + $0x34] ss:$8 sps:$4 sm:$0xff]   ;;  %v6518_v44 = vld [vmem:[%s7450_s2 + $0x30] ss:$8 sps:$4 sm:$0xff]   ;;  %v980_v46 = vsub.f32 1.0, %v868_v42 }
  0x74   : > { %v979_v41 = vsub.f32 1.0, %v867_v37  ;;  %v869_v43 = vld [vmem:[%s7472_s30 + $0x38] sm:$0xff]  ;;  %v6519_v45 = vld [vmem:[%s7450_s2 + $0x44] ss:$8 sps:$4 sm:$0xff]   ;;  %v6521_v51 = vld [vmem:[%s7450_s2 + $0x40] ss:$8 sps:$4 sm:$0xff]  }
  0x75   : > { %v981_v47 = vsub.f32 1.0, %v869_v43  ;;  %v1720_v48 = vld [vmem:[%s7490_s28 + $0x20] sm:$0xff]  ;;  %v1721_v49 = vld [vmem:[%s7490_s28 + $0x28] sm:$0xff]  ;;  %v6522_v53 = vld [vmem:[%s7450_s2 + $0x54] ss:$8 sps:$4 sm:$0xff]  }
  0x76   : > { %5856 = vmatpush3.bf16.msra.mxu0 %v6498_v8  ;;  %997 = vperm.xlu1 %6450, %v975_v24   ;;  %v870_v50 = vld [vmem:[%s7472_s30 + $0x40] sm:$0xff]  ;;  %v6461_v52 = vpack.i.bf16 %v1721_v49, %v1720_v48  ;;  %v1722_v54 = vld [vmem:[%s7490_s28 + $0x30] sm:$0xff]  ;;  %v1723_v55 = vld [vmem:[%s7490_s28 + $0x38] sm:$0xff] }
  0x77   : > { %5857 = vmatprep.subr.bf16.mxu0 %v6499_v9  ;;  %890 = vperm.xlu0 %6449, %v864_v25   ;;  %v982_v56 = vsub.f32 1.0, %v870_v50  ;;  %v871_v57 = vld [vmem:[%s7472_s30 + $0x48] sm:$0xff]  ;;  %v872_v58 = vld [vmem:[%s7472_s30 + $0x50] sm:$0xff]  ;;  %v873_v59 = vld [vmem:[%s7472_s30 + $0x58] sm:$0xff]  ;;  %v6466_v62 = vpack.i.bf16 %v1723_v55, %v1722_v54 }
  0x78   : > { %v983_v60 = vsub.f32 1.0, %v871_v57  ;;  %v984_v61 = vsub.f32 1.0, %v872_v58  ;;  %v985_v63 = vsub.f32 1.0, %v873_v59  ;;  %v6524_v1 = vld [vmem:[%s7450_s2 + $0x50] ss:$8 sps:$4 sm:$0xff]   ;;  %v1724_v3 = vld [vmem:[%s7490_s28 + $0x40] sm:$0xff] }
  0x79   : > { %v6525_v2 = vld [vmem:[%s7450_s2 + $0x64] ss:$8 sps:$4 sm:$0xff]   ;;  %v6527_v5 = vld [vmem:[%s7450_s2 + $0x60] ss:$8 sps:$4 sm:$0xff]   ;;  %v6528_v6 = vld [vmem:[%s7450_s2 + $0x74] ss:$8 sps:$4 sm:$0xff]  }
  0x7a   : > { %5858 = vmatpush3.bf16.msra.mxu0 %v6500_v10  ;;  %1007 = vperm.xlu1 %6450, %v977_v26   ;;  %v1725_v4 = vld [vmem:[%s7490_s28 + $0x48] sm:$0xff]  ;;  %v874_v7 = vld [vmem:[%s7472_s30 + $0x60] sm:$0xff]  ;;  %v1726_v9 = vld [vmem:[%s7490_s28 + $0x50] sm:$0xff] }
  0x7b   : > { %5859 = vmatprep.subr.bf16.mxu0 %v6501_v11  ;;  %1002 = vperm.xlu0 %6449, %v976_v28   ;;  %v6471_v8 = vpack.i.bf16 %v1725_v4, %v1724_v3  ;;  %v1727_v10 = vld [vmem:[%s7490_s28 + $0x58] sm:$0xff]  ;;  %v986_v11 = vsub.f32 1.0, %v874_v7  ;;  %v875_v12 = vld [vmem:[%s7472_s30 + $0x68] sm:$0xff]  ;;  %v1730_v20 = vld [vmem:[%s7490_s28 + $0x70] sm:$0xff] }
  0x7c   : > { %v6476_v17 = vpack.i.bf16 %v1727_v10, %v1726_v9  ;;  %v1731_v21 = vld [vmem:[%s7490_s28 + $0x78] sm:$0xff]  ;;  %v6531_v26 = vld [vmem:[#allocation2] sm:$0xff]   ;;  %v6533_v28 = vld [vmem:[#allocation2 + $0x10] sm:$0xff]  }
  0x7d   : > { %v6486_v24 = vpack.i.bf16 %v1731_v21, %v1730_v20  ;;  %6058 = vmatprep.subr.bf16.mxu1 %v6531_v26  ;;  %v7558_v30 = vld [vmem:[%s7552_s1 + $0x8] sm:$0xff]  ;;  %v7572_v35 = vld [vmem:[%s7552_s1 + $0x18] sm:$0xff] }
  0x7e   : > { %5860 = vmatpush3.bf16.msra.mxu0 %v6502_v13  ;;  %900 = vperm.xlu1 %6450, %v866_v31   ;;  %v6530_v13 = vld [vmem:[%s7450_s2 + $0x70] ss:$8 sps:$4 sm:$0xff]   ;;  %10048 = vst [vmem:[#allocation20_spill] sm:$0xff] %v7558_v30  ;;  %10052 = vst [vmem:[#allocation24_spill] sm:$0xff] %v7572_v35 }
  0x7f   : > { %5861 = vmatprep.subr.bf16.mxu0 %v6503_v14  ;;  %6452 = vrot.lane.b32.xlu0 %v6451_v34, %s7163_s3  ;;  %v876_v14 = vld [vmem:[%s7472_s30 + $0x70] sm:$0xff] }
  0x80   : > { %6059 = vmatpush3.bf16.msra.mxu1 %v6531_v26  ;;  %v7569_v34 = vld [vmem:[%s7552_s1 + $0x10] sm:$0xff] }
  0x81   : > { %10051 = vst [vmem:[#allocation23_spill] sm:$0xff] %v7569_v34 }
  0x82   : > { %5862 = vmatpush3.bf16.msra.mxu0 %v6504_v15  ;;  %1012 = vperm.xlu1 %6450, %v978_v33   ;;  %v877_v15 = vld [vmem:[%s7472_s30 + $0x78] sm:$0xff]  ;;  %s7546_s30 = scalar_lea.vmem %s10045_s0, %s7441_s23  ;;  %s7090_s0 = sshll.u32 %s7168_s5, 4  ;;  %s7091_s0 = int_to_ptr.vmem [resolvable:$false] %s7090_s0 }
  0x83   : > { %5863 = vmatprep.subr.bf16.mxu0 %v6505_v16  ;;  %905 = vperm.xlu0 %6449, %v867_v37   ;;  %v987_v16 = vsub.f32 1.0, %v875_v12  ;;  %v989_v19 = vsub.f32 1.0, %v877_v15  ;;  %v7555_v29 = vld [vmem:[%s7546_s30 + $0x8] sm:$0xff]  ;;  %v7561_v31 = vld [vmem:[%s7546_s30 + $0x18] sm:$0xff]  ;;  %v7566_v33 = vld [vmem:[%s7546_s30 + $0x10] sm:$0xff] }
  0x84   : > { %10047 = vst [vmem:[#allocation19_spill] sm:$0xff] %v7555_v29  ;;  %10049 = vst [vmem:[#allocation21_spill] sm:$0xff] %v7561_v31  ;;  %v7595_v49 = vld [vmem:[%s7546_s30 + $0x30] sm:$0xff]  ;;  %v7611_v55 = vld [vmem:[%s7546_s30 + $0x40] sm:$0xff] }
  0x85   : > { %10050 = vst [vmem:[#allocation22_spill] sm:$0xff] %v7566_v33  ;;  %10057 = vst [vmem:[#allocation29_spill] sm:$0xff] %v7595_v49  ;;  %v7643_v4 = vld [vmem:[%s7546_s30 + $0x60] sm:$0xff]  ;;  %v7659_v10 = vld [vmem:[%s7546_s30 + $0x70] sm:$0xff] }
  0x86   : > { %5864 = vmatpush3.bf16.msra.mxu0 %v6506_v18  ;;  %6457 = vrot.lane.b32.xlu1 %v6456_v40, %s7163_s3  ;;  %v988_v18 = vsub.f32 1.0, %v876_v14  ;;  %v6536_v40 = vld [vmem:[#allocation2 + $0x28] sm:$0xff]   ;;  %10061 = vst [vmem:[#allocation33_spill] sm:$0xff] %v7611_v55  ;;  %10069 = vst [vmem:[#allocation41_spill] sm:$0xff] %v7643_v4 }
  0x87   : > { %1017 = vperm.xlu0 %6449, %v979_v41   ;;  %v6537_v41 = vld [vmem:[#allocation2 + $0x30] sm:$0xff]   ;;  %10073 = vst [vmem:[#allocation45_spill] sm:$0xff] %v7659_v10 }
  0x89   : > { %1365 = vmatmul.mubr.bf16.vlgmr.msra.gmra.mrb[0].mxu0 %v6507_v22  ;;  %v1728_v22 = vld [vmem:[%s7490_s28 + $0x60] sm:$0xff] }
  0x8a   : > { %1372 = vmatprep.mubr.bf16.mxu0 %v6510_v23  ;;  %915 = vperm.xlu1 %6450, %v869_v43   ;;  %v1729_v23 = vld [vmem:[%s7490_s28 + $0x68] sm:$0xff]  ;;  %v7579_v43 = vld [vmem:[%s7546_s30 + $0x20] sm:$0xff]  ;;  %s10078_s28 = sld [smem:[#allocation99_spill]] }
  0x8b   : > { %910 = vperm.xlu0 %6449, %v868_v42   ;;  %v6481_v25 = vpack.i.bf16 %v1729_v23, %v1728_v22  ;;  %v6538_v42 = vld [vmem:[#allocation2 + $0x38] sm:$0xff]   ;;  %10053 = vst [vmem:[#allocation25_spill] sm:$0xff] %v7579_v43 }
  0x8e   : > { %1027 = vperm.xlu1 %6450, %v981_v47   ;;  %v7590_v47 = vld [vmem:[%s7552_s1 + $0x28] sm:$0xff] }
  0x8f   : > { %1022 = vperm.xlu0 %6449, %v980_v46   ;;  %v7587_v46 = vld [vmem:[%s7546_s30 + $0x28] sm:$0xff]  ;;  %10056 = vst [vmem:[#allocation28_spill] sm:$0xff] %v7590_v47 }
  0x90   : > { %10055 = vst [vmem:[#allocation27_spill] sm:$0xff] %v7587_v46 }
  0x91   : > { %1373 = vmatmul.mubr.bf16.gmra.mrb[4].mxu0 %v6512_v27  ;;  %v6532_v27 = vld [vmem:[#allocation2 + $0x8] sm:$0xff]  }
  0x92   : > { %1380 = vmatprep.mubr.bf16.mxu0 %v6513_v32  ;;  %920 = vperm.xlu1 %6450, %v870_v50   ;;  %v7598_v50 = vld [vmem:[%s7546_s30 + $0x38] sm:$0xff] }
  0x93   : > { %6462 = vrot.lane.b32.xlu0 %v6461_v52, %s7163_s3  ;;  %6060 = vmatprep.subr.bf16.mxu1 %v6532_v27  ;;  %10058 = vst [vmem:[#allocation30_spill] sm:$0xff] %v7598_v50  ;;  %v7604_v52 = vld [vmem:[%s7552_s1 + $0x38] sm:$0xff] }
  0x94   : > { %6061 = vmatpush3.bf16.msra.mxu1 %v6532_v27  ;;  %10060 = vst [vmem:[#allocation32_spill] sm:$0xff] %v7604_v52 }
  0x95   : > { %6062 = vmatprep.subr.bf16.mxu1 %v6533_v28 }
  0x96   : > { %1032 = vperm.xlu1 %6450, %v982_v56   ;;  %v7614_v56 = vld [vmem:[%s7552_s1 + $0x40] sm:$0xff] }
  0x97   : > { %925 = vperm.xlu0 %6449, %v871_v57   ;;  %10062 = vst [vmem:[#allocation34_spill] sm:$0xff] %v7614_v56 }
  0x98   : > { %6063 = vmatpush3.bf16.msra.mxu1 %v6533_v28 }
  0x99   : > { %1381 = vmatmul.mubr.bf16.gmra.mrb[8].mxu0 %v6515_v38  ;;  %v6534_v38 = vld [vmem:[#allocation2 + $0x18] sm:$0xff]  }
  0x9a   : > { %1388 = vmatprep.mubr.bf16.mxu0 %v6516_v39  ;;  %6467 = vrot.lane.b32.xlu1 %v6466_v62, %s7163_s3  ;;  %v6535_v39 = vld [vmem:[#allocation2 + $0x20] sm:$0xff]   ;;  %v7630_v62 = vld [vmem:[%s7546_s30 + $0x58] sm:$0xff] }
  0x9b   : > { %1037 = vperm.xlu0 %6449, %v983_v60   ;;  %6064 = vmatprep.subr.bf16.mxu1 %v6534_v38  ;;  %10066 = vst [vmem:[#allocation38_spill] sm:$0xff] %v7630_v62 }
  0x9c   : > { %6065 = vmatpush3.bf16.msra.mxu1 %v6534_v38 }
  0x9d   : > { %6066 = vmatprep.subr.bf16.mxu1 %v6535_v39 }
  0x9e   : > { %935 = vperm.xlu1 %6450, %v873_v59   ;;  %v7622_v59 = vld [vmem:[%s7552_s1 + $0x48] sm:$0xff] }
  0x9f   : > { %930 = vperm.xlu0 %6449, %v872_v58   ;;  %v7619_v58 = vld [vmem:[%s7546_s30 + $0x48] sm:$0xff]  ;;  %10064 = vst [vmem:[#allocation36_spill] sm:$0xff] %v7622_v59 }
  0xa0   : > { %6067 = vmatpush3.bf16.msra.mxu1 %v6535_v39  ;;  %10063 = vst [vmem:[#allocation35_spill] sm:$0xff] %v7619_v58 }
  0xa1   : > { %1389 = vmatmul.mubr.bf16.gmra.mrb[12].mxu0 %v6518_v44  ;;  %6068 = vmatprep.subr.bf16.mxu1 %v6536_v40  ;;  %v7582_v44 = vld [vmem:[%s7552_s1 + $0x20] sm:$0xff] }
  0xa2   : > { %1396 = vmatprep.mubr.bf16.mxu0 %v6519_v45  ;;  %1047 = vperm.xlu1 %6450, %v985_v63   ;;  %10054 = vst [vmem:[#allocation26_spill] sm:$0xff] %v7582_v44  ;;  %v7633_v63 = vld [vmem:[%s7552_s1 + $0x50] sm:$0xff] }
  0xa3   : > { %1042 = vperm.xlu0 %6449, %v984_v61   ;;  %v7627_v61 = vld [vmem:[%s7546_s30 + $0x50] sm:$0xff]  ;;  %10067 = vst [vmem:[#allocation39_spill] sm:$0xff] %v7633_v63 }
  0xa4   : > { %6069 = vmatpush3.bf16.msra.mxu1 %v6536_v40  ;;  %10065 = vst [vmem:[#allocation37_spill] sm:$0xff] %v7627_v61 }
  0xa5   : > { %6070 = vmatprep.subr.bf16.mxu1 %v6537_v41 }
  0xa6   : > { %940 = vperm.xlu1 %6450, %v874_v7   ;;  %v7651_v7 = vld [vmem:[%s7546_s30 + $0x68] sm:$0xff] }
  0xa7   : > { %6472 = vrot.lane.b32.xlu0 %v6471_v8, %s7163_s3  ;;  %10071 = vst [vmem:[#allocation43_spill] sm:$0xff] %v7651_v7  ;;  %v7654_v8 = vld [vmem:[%s7552_s1 + $0x68] sm:$0xff] }
  0xa8   : > { %6071 = vmatpush3.bf16.msra.mxu1 %v6537_v41  ;;  %10072 = vst [vmem:[#allocation44_spill] sm:$0xff] %v7654_v8 }
  0xa9   : > { %1397 = vmatmul.mubr.bf16.gmra.mrb[16].mxu0 %v6521_v51  ;;  %6072 = vmatprep.subr.bf16.mxu1 %v6538_v42  ;;  %v7601_v51 = vld [vmem:[%s7552_s1 + $0x30] sm:$0xff] }
  0xaa   : > { %1404 = vmatprep.mubr.bf16.mxu0 %v6522_v53  ;;  %1052 = vperm.xlu1 %6450, %v986_v11   ;;  %10059 = vst [vmem:[#allocation31_spill] sm:$0xff] %v7601_v51  ;;  %v6541_v11 = vld [vmem:[%s9907_s9 + $0x4] ss:$8 sps:$4 sm:$0xff]  }
  0xab   : > { %945 = vperm.xlu0 %6449, %v875_v12   ;;  %v7665_v12 = vld [vmem:[%s7546_s30 + $0x78] sm:$0xff] }
  0xac   : > { %6073 = vmatpush3.bf16.msra.mxu1 %v6538_v42  ;;  %10074 = vst [vmem:[#allocation46_spill] sm:$0xff] %v7665_v12 }
  0xad   : > { %1903 = vmatprep.subr.bf16.mxu1 %v6541_v11 }
  0xae   : > { %6477 = vrot.lane.b32.xlu1 %v6476_v17, %s7163_s3  ;;  %v1152_v17 = vlaneseq }
  0xaf   : > { %1057 = vperm.xlu0 %6449, %v987_v16  }
  0xb1   : > { %1405 = vmatmul.mubr.bf16.gmra.mrb[20].mxu0 %v6524_v1  ;;  %v7636_v1 = vld [vmem:[%s7552_s1 + $0x58] sm:$0xff] }
  0xb2   : > { %1412 = vmatprep.mubr.bf16.mxu0 %v6525_v2  ;;  %955 = vperm.xlu1 %6450, %v877_v15   ;;  %10068 = vst [vmem:[#allocation40_spill] sm:$0xff] %v7636_v1 }
  0xb3   : > { %950 = vperm.xlu0 %6449, %v876_v14   ;;  %v7671_v14 = vld [vmem:[%s7552_s1 + $0x78] sm:$0xff] }
  0xb4   : > { %10076 = vst [vmem:[#allocation48_spill] sm:$0xff] %v7671_v14 }
  0xb6   : > { %1067 = vperm.xlu1 %6450, %v989_v19   ;;  %v1150_v19 = vld [vmem:[%s10078_s28] sm:$0x1]  ;;  %s9858_s28 = scalar_lea.hbm %s10272_s27, %s7416_s4 }
  0xb7   : > { %1062 = vperm.xlu0 %6449, %v988_v18   ;;  %v7677_v18 = vshrl.u32 %v1152_v17, 7  ;;  %v1151_v20 = vunpack.c.l.bf16 %v1150_v19 }
  0xb9   : > { %1413 = vmatmul.mubr.bf16.gmra.mrb[24].mxu0 %v6527_v5  ;;  %v7646_v5 = vld [vmem:[%s7552_s1 + $0x60] sm:$0xff]  ;;  %10077 = vst [vmem:[#allocation49_spill] sm:$0xff] %v7677_v18  ;;  %v7683_v21 = vsub.s32 0, %v7677_v18 }
  0xba   : > { %1420 = vmatprep.mubr.bf16.mxu0 %v6528_v6  ;;  %6487 = vrot.lane.b32.xlu1 %v6486_v24, %s7163_s3  ;;  %10070 = vst [vmem:[#allocation42_spill] sm:$0xff] %v7646_v5 }
  0xbb   : > { %6482 = vrot.lane.b32.xlu0 %v6481_v25, %s7163_s3  ;;  %10079 = vst [vmem:[#allocation50_spill] sm:$0xff] %v7683_v21  ;;  %v7686_v23 = vrot.slane %v1151_v20, %v7683_v21 }
  0xc1   : > { %1421 = vmatmul.mubr.bf16.gmra.mrb[28].mxu0 %v6530_v13  ;;  %v7668_v13 = vld [vmem:[%s7552_s1 + $0x70] sm:$0xff] }
  0xc2   : > { %2374 = vmatprep.mubr.bf16.mxu0 %v9937_v0  ;;  %10075 = vst [vmem:[#allocation47_spill] sm:$0xff] %v7668_v13 }
  0xee   : > { %v7711_v15 = vpop.permute.xlu0 %880 }
  0xf2   : > { %v7717_v3 = vpop.permute.xlu0 %885 }
 0x15c   : > { %v5865_v22 = vpop.f32.mrb[0].mxu0 }
 0x15d   : > { %v5866_v24 = vpop.f32.mrb[1].mxu0 }
 0x15e   : > { %v5867_v25 = vadd.f32 %v5866_v24, %v5865_v22  ;;  %v5868_v26 = vpop.f32.mrb[2].mxu0 }
 0x15f   : > { %v5869_v27 = vpop.f32.mrb[3].mxu0 }
 0x160   : > { %v7689_v28 = vadd.f32 %v5867_v25, %v7686_v23  ;;  %v5870_v38 = vadd.f32 %v5869_v27, %v5868_v26 }
 0x162   : > { %v5569_v39 = vmul.f32 -1.442695, %v7689_v28  ;;  %v7693_v40 = vadd.f32 %v5870_v38, %v7686_v23 }
 0x164   : > { %6676 = vpow2.f32 %v5569_v39  ;;  %v5570_v41 = vmul.f32 -1.442695, %v7693_v40  ;;  %v5871_v42 = vpop.f32.mrb[4].mxu0 }
 0x165   : > { %v5872_v11 = vpop.f32.mrb[5].mxu0 }
 0x166   : > { %6678 = vpow2.f32 %v5570_v41  ;;  %v5873_v17 = vadd.f32 %v5872_v11, %v5871_v42  ;;  %v5874_v19 = vpop.f32.mrb[6].mxu0 }
 0x167   : > { %v5875_v20 = vpop.f32.mrb[7].mxu0 }
 0x168   : > { %v7697_v22 = vadd.f32 %v5873_v17, %v7686_v23  ;;  %v5876_v24 = vadd.f32 %v5875_v20, %v5874_v19 }
 0x16a   : > { %v5571_v25 = vmul.f32 -1.442695, %v7697_v22  ;;  %v7701_v26 = vadd.f32 %v5876_v24, %v7686_v23 }
 0x16c   : > { %6680 = vpow2.f32 %v5571_v25  ;;  %v5572_v27 = vmul.f32 -1.442695, %v7701_v26  ;;  %v5877_v38 = vpop.f32.mrb[8].mxu0 }
 0x16d   : > { %v5878_v39 = vpop.f32.mrb[9].mxu0 }
 0x16e   : > { %v6677_v9 = vpop.eup %6676  ;;  %6682 = vpow2.f32 %v5572_v27  ;;  %v5879_v41 = vadd.f32 %v5878_v39, %v5877_v38  ;;  %v5880_v42 = vpop.f32.mrb[10].mxu0 }
 0x16f   : > { %v1477_v11 = vadd.f32 1.0, %v6677_v9  ;;  %v5881_v16 = vpop.f32.mrb[11].mxu0 }
 0x170   : > { %v6679_v6 = vpop.eup %6678  ;;  %v7705_v17 = vadd.f32 %v5879_v41, %v7686_v23  ;;  %v5882_v19 = vadd.f32 %v5881_v16, %v5880_v42 }
 0x171   : > { %6684 = vrcp.f32 %v1477_v11  ;;  %v1478_v20 = vadd.f32 1.0, %v6679_v6 }
 0x172   : > { %v5573_v24 = vmul.f32 -1.442695, %v7705_v17  ;;  %v7709_v25 = vadd.f32 %v5882_v19, %v7686_v23 }
 0x173   : > { %6686 = vrcp.f32 %v1478_v20 }
 0x174   : > { %6688 = vpow2.f32 %v5573_v24  ;;  %v5574_v27 = vmul.f32 -1.442695, %v7709_v25  ;;  %v5883_v9 = vpop.f32.mrb[12].mxu0 }
 0x175   : > { %v5884_v38 = vpop.f32.mrb[13].mxu0 }
 0x176   : > { %v6681_v39 = vpop.eup %6680  ;;  %6690 = vpow2.f32 %v5574_v27  ;;  %v5885_v41 = vadd.f32 %v5884_v38, %v5883_v9  ;;  %v5886_v60 = vpop.f32.mrb[14].mxu0 }
 0x177   : > { %v1479_v16 = vadd.f32 1.0, %v6681_v39  ;;  %v5887_v42 = vpop.f32.mrb[15].mxu0  ;;  %v7723_v27 = vpop.permute.xlu1 %895 }
 0x178   : > { %v6683_v6 = vpop.eup %6682  ;;  %v7715_v11 = vadd.f32 %v5885_v41, %v7686_v23  ;;  %v5888_v19 = vadd.f32 %v5887_v42, %v5886_v60 }
 0x179   : > { %6692 = vrcp.f32 %v1479_v16  ;;  %v1480_v20 = vadd.f32 1.0, %v6683_v6 }
 0x17a   : > { %v5575_v24 = vmul.f32 -1.442695, %v7715_v11  ;;  %v7721_v57 = vadd.f32 %v5888_v19, %v7686_v23 }
 0x17b   : > { %v6685_v2 = vpop.eup %6684  ;;  %6694 = vrcp.f32 %v1480_v20  ;;  %v7728_v20 = vpop.permute.xlu0 %890 }
 0x17c   : > { %6696 = vpow2.f32 %v5575_v24  ;;  %v5576_v9 = vmul.f32 -1.442695, %v7721_v57  ;;  %v5889_v38 = vpop.f32.mrb[16].mxu0  ;;  %v1525_v6 = vmul.f32 %v6685_v2, %v7689_v28  ;;  %v7733_v36 = vpop.permute.xlu1 %992 }
 0x17d   : > { %v6687_v39 = vpop.eup %6686  ;;  %v5890_v41 = vpop.f32.mrb[17].mxu0 }
 0x17e   : > { %v6689_v60 = vpop.eup %6688  ;;  %6698 = vpow2.f32 %v5576_v9  ;;  %v5891_v16 = vadd.f32 %v5890_v41, %v5889_v38  ;;  %v5892_v42 = vpop.f32.mrb[18].mxu0  ;;  %v1526_v48 = vmul.f32 %v6687_v39, %v7693_v40 }
 0x17f   : > { %v1481_v19 = vadd.f32 1.0, %v6689_v60  ;;  %v5893_v54 = vpop.f32.mrb[19].mxu0 }
 0x180   : > { %v6691_v45 = vpop.eup %6690  ;;  %v7731_v24 = vadd.f32 %v5891_v16, %v7686_v23  ;;  %v5894_v53 = vadd.f32 %v5893_v54, %v5892_v42  ;;  %v1541_v32 = vpack.c.bf16 %v1526_v48, %v1525_v6  ;;  %v7740_v48 = vpop.permute.xlu0 %1002 }
 0x181   : > { %6700 = vrcp.f32 %v1481_v19  ;;  %v1482_v37 = vadd.f32 1.0, %v6691_v45  ;;  %v7747_v19 = vpop.permute.xlu1 %997 }
 0x182   : > { %v5577_v9 = vmul.f32 -1.442695, %v7731_v24  ;;  %v7737_v2 = vadd.f32 %v5894_v53, %v7686_v23  ;;  %6074 = vmatprep.mubr.bf16.mxu1 %v1541_v32 }
 0x183   : > { %v6693_v28 = vpop.eup %6692  ;;  %6702 = vrcp.f32 %v1482_v37  ;;  %v6539_v37 = vld [vmem:[%s9907_s9] ss:$8 sps:$4 sm:$0xff]  }
 0x184   : > { %6704 = vpow2.f32 %v5577_v9  ;;  %v5578_v40 = vmul.f32 -1.442695, %v7737_v2  ;;  %v5895_v38 = vpop.f32.mrb[20].mxu0  ;;  %v1527_v45 = vmul.f32 %v6693_v28, %v7697_v22  ;;  %v6544_v22 = vld [vmem:[%s9907_s9 + $0x14] ss:$8 sps:$4 sm:$0xff]  }
 0x185   : > { %v6695_v39 = vpop.eup %6694  ;;  %v5896_v41 = vpop.f32.mrb[21].mxu0 }
 0x186   : > { %v6697_v54 = vpop.eup %6696  ;;  %v1528_v60 = vmul.f32 %v6695_v39, %v7701_v26  ;;  %6706 = vpow2.f32 %v5578_v40  ;;  %v5897_v16 = vadd.f32 %v5896_v41, %v5895_v38  ;;  %v5898_v53 = vpop.f32.mrb[22].mxu0  ;;  %v6542_v39 = vld [vmem:[%s9907_s9 + $0x10] ss:$8 sps:$4 sm:$0xff]  }
 0x187   : > { %v1483_v42 = vadd.f32 1.0, %v6697_v54  ;;  %v5899_v32 = vpop.f32.mrb[23].mxu0  ;;  %v7762_v41 = vpop.permute.xlu0 %6452 }
 0x188   : > { %v6699_v6 = vpop.eup %6698  ;;  %v7750_v9 = vadd.f32 %v5897_v16, %v7686_v23  ;;  %v5900_v0 = vadd.f32 %v5899_v32, %v5898_v53  ;;  %v1542_v21 = vpack.c.bf16 %v1528_v60, %v1527_v45  ;;  %v7768_v53 = vpop.permute.xlu1 %1007 }
 0x189   : > { %6708 = vrcp.f32 %v1483_v42  ;;  %v1484_v26 = vadd.f32 1.0, %v6699_v6 }
 0x18a   : > { %v5579_v28 = vmul.f32 -1.442695, %v7750_v9  ;;  %v7757_v40 = vadd.f32 %v5900_v0, %v7686_v23  ;;  %6075 = vmatmul.mubr.bf16.vlgmr.msra.gmra.mrb[0].mxu1 %v1542_v21  ;;  %v6547_v0 = vld [vmem:[%s9907_s9 + $0x24] ss:$8 sps:$4 sm:$0xff]  }
 0x18b   : > { %v6701_v38 = vpop.eup %6700  ;;  %6710 = vrcp.f32 %v1484_v26  ;;  %1904 = vmatpush1.bf16.msra.mxu1 %v6539_v37 }
 0x18c   : > { %6712 = vpow2.f32 %v5579_v28  ;;  %v5580_v54 = vmul.f32 -1.442695, %v7757_v40  ;;  %v5901_v45 = vpop.f32.mrb[24].mxu0  ;;  %1905 = vmatprep.subr.bf16.mxu1 %v6544_v22  ;;  %v1529_v42 = vmul.f32 %v6701_v38, %v7705_v17  ;;  %v6545_v22 = vld [vmem:[%s9907_s9 + $0x20] ss:$8 sps:$4 sm:$0xff]  }
 0x18d   : > { %v6703_v60 = vpop.eup %6702  ;;  %v5902_v21 = vpop.f32.mrb[25].mxu0 }
 0x18e   : > { %v6705_v16 = vpop.eup %6704  ;;  %v1530_v32 = vmul.f32 %v6703_v60, %v7709_v25  ;;  %6714 = vpow2.f32 %v5580_v54  ;;  %v5903_v37 = vadd.f32 %v5902_v21, %v5901_v45  ;;  %v5904_v6 = vpop.f32.mrb[26].mxu0 }
 0x18f   : > { %v1485_v26 = vadd.f32 1.0, %v6705_v16  ;;  %v5905_v28 = vpop.f32.mrb[27].mxu0  ;;  %1906 = vmatpush1.bf16.msra.mxu1 %v6542_v39  ;;  %v7778_v25 = vpop.permute.xlu0 %905 }
 0x190   : > { %v6707_v18 = vpop.eup %6706  ;;  %v7776_v14 = vadd.f32 %v5903_v37, %v7686_v23  ;;  %v5906_v13 = vadd.f32 %v5905_v28, %v5904_v6  ;;  %v1543_v12 = vpack.c.bf16 %v1530_v32, %v1529_v42  ;;  %1907 = vmatprep.subr.bf16.mxu1 %v6547_v0  ;;  %v7784_v45 = vpop.permute.xlu1 %900 }
 0x191   : > { %6716 = vrcp.f32 %v1485_v26  ;;  %v1486_v17 = vadd.f32 1.0, %v6707_v18 }
 0x192   : > { %v5581_v38 = vmul.f32 -1.442695, %v7776_v14  ;;  %v7782_v54 = vadd.f32 %v5906_v13, %v7686_v23  ;;  %6078 = vmatprep.mubr.bf16.mxu1 %v1543_v12 }
 0x193   : > { %v6709_v39 = vpop.eup %6708  ;;  %6718 = vrcp.f32 %v1486_v17  ;;  %1908 = vmatpush1.bf16.msra.mxu1 %v6545_v22  ;;  %v7789_v28 = vpop.permute.xlu0 %1017 }
 0x194   : > { %6720 = vpow2.f32 %v5581_v38  ;;  %v5582_v60 = vmul.f32 -1.442695, %v7782_v54  ;;  %v5907_v21 = vpop.f32.mrb[28].mxu0  ;;  %v1531_v42 = vmul.f32 %v6709_v39, %v7715_v11  ;;  %v7792_v8 = vpop.permute.xlu1 %1012 }
 0x195   : > { %v6711_v0 = vpop.eup %6710  ;;  %v5908_v16 = vpop.f32.mrb[29].mxu0 }
 0x196   : > { %v6713_v18 = vpop.eup %6712  ;;  %v1532_v32 = vmul.f32 %v6711_v0, %v7721_v57  ;;  %6722 = vpow2.f32 %v5582_v60  ;;  %v5909_v13 = vadd.f32 %v5908_v16, %v5907_v21  ;;  %v5910_v37 = vpop.f32.mrb[30].mxu0 }
 0x197   : > { %v1487_v12 = vadd.f32 1.0, %v6713_v18  ;;  %v5911_v6 = vpop.f32.mrb[31].mxu0  ;;  %v7795_v0 = vpop.permute.xlu0 %910 }
 0x198   : > { %v6715_v26 = vpop.eup %6714  ;;  %v1423_v22 = vadd.f32 %v5909_v13, %v7686_v23  ;;  %v5912_v17 = vadd.f32 %v5911_v6, %v5910_v37  ;;  %v1544_v38 = vpack.c.bf16 %v1532_v32, %v1531_v42  ;;  %v7799_v13 = vpop.permute.xlu1 %6457 }
 0x199   : > { %6724 = vrcp.f32 %v1487_v12  ;;  %v1488_v10 = vadd.f32 1.0, %v6715_v26 }
 0x19a   : > { %v5583_v7 = vmul.f32 -1.442695, %v1423_v22  ;;  %v1426_v11 = vadd.f32 %v5912_v17, %v7686_v23  ;;  %6079 = vmatmul.mubr.bf16.gmra.mrb[4].mxu1 %v1544_v38 }
 0x19b   : > { %v6717_v57 = vpop.eup %6716  ;;  %6726 = vrcp.f32 %v1488_v10 }
 0x19c   : > { %6728 = vpow2.f32 %v5583_v7  ;;  %v5584_v39 = vmul.f32 -1.442695, %v1426_v11  ;;  %v1533_v16 = vmul.f32 %v6717_v57, %v7731_v24  ;;  %v7801_v7 = vpop.permute.xlu0 %1022  ;;  %v7803_v26 = vpop.permute.xlu1 %915 }
 0x19d   : > { %v6719_v60 = vpop.eup %6718 }
 0x19e   : > { %v6721_v21 = vpop.eup %6720  ;;  %v1534_v18 = vmul.f32 %v6719_v60, %v7737_v2  ;;  %6730 = vpow2.f32 %v5584_v39 }
 0x19f   : > { %v1489_v42 = vadd.f32 1.0, %v6721_v21 }
 0x1a0   : > { %v6723_v32 = vpop.eup %6722  ;;  %v1545_v37 = vpack.c.bf16 %v1534_v18, %v1533_v16  ;;  %v7807_v60 = vpop.permute.xlu0 %6462 }
 0x1a1   : > { %6732 = vrcp.f32 %v1489_v42  ;;  %v1490_v23 = vadd.f32 1.0, %v6723_v32  ;;  %v7809_v16 = vpop.permute.xlu1 %1027 }
 0x1a2   : > { %6082 = vmatprep.mubr.bf16.mxu1 %v1545_v37  ;;  %v830_v37 = vld [vmem:[%s7546_s30] sm:$0xff] }
 0x1a3   : > { %v6725_v10 = vpop.eup %6724  ;;  %6734 = vrcp.f32 %v1490_v23  ;;  %v846_v23 = vld [vmem:[%s7552_s1] sm:$0xff] }
 0x1a4   : > { %v1535_v24 = vmul.f32 %v6725_v10, %v7750_v9 }
 0x1a5   : > { %v6727_v12 = vpop.eup %6726  ;;  %v7817_v10 = vpop.permute.xlu1 %920 }
 0x1a6   : > { %v6729_v6 = vpop.eup %6728  ;;  %v1536_v2 = vmul.f32 %v6727_v12, %v7757_v40  ;;  %v7813_v40 = vpop.permute.xlu0 %925 }
 0x1a7   : > { %v1491_v17 = vadd.f32 1.0, %v6729_v6 }
 0x1a8   : > { %v6731_v38 = vpop.eup %6730  ;;  %v1546_v57 = vpack.c.bf16 %v1536_v2, %v1535_v24  ;;  %v958_v24 = vmul.f32 %v7711_v15, %v830_v37  ;;  %v959_v2 = vmul.f32 %v7717_v3, %v7555_v29  ;;  %v6454_v15 = vunpack.i.l.bf16 %v7762_v41 }
 0x1a9   : > { %6736 = vrcp.f32 %v1491_v17  ;;  %v1492_v39 = vadd.f32 1.0, %v6731_v38  ;;  %v1070_v17 = vmul.f32 %v7733_v36, %v846_v23  ;;  %v10080_v3 = vmov 0  }
 0x1aa   : > { %6083 = vmatmul.mubr.bf16.gmra.mrb[8].mxu1 %v1546_v57  ;;  %v961_v36 = vmul.f32 %v7723_v27, %v7561_v31  ;;  %v6460_v27 = vunpack.i.h.bf16 %v7799_v13 }
 0x1ab   : > { %v6733_v21 = vpop.eup %6732  ;;  %6738 = vrcp.f32 %v1492_v39  ;;  %v1033_v39 = vpop.permute.xlu1 %1032 }
 0x1ac   : > { %v1537_v42 = vmul.f32 %v6733_v21, %v7776_v14  ;;  %v1071_v14 = vmul.f32 %v7747_v19, %v7558_v30  ;;  %v960_v19 = vmul.f32 %v7728_v20, %v7566_v33  ;;  %v6459_v20 = vunpack.i.l.bf16 %v7799_v13 }
 0x1ad   : > { %v6735_v18 = vpop.eup %6734 }
 0x1ae   : > { %v1538_v9 = vmul.f32 %v6735_v18, %v7782_v54  ;;  %v7825_v54 = vpop.permute.xlu0 %1037  ;;  %v1086_v18 = vadd.f32 %v1070_v17, %v958_v24 }
 0x1af   : > { %v6468_v23 = vpop.permute.xlu1 %6467 }
 0x1b0   : > { %v1547_v32 = vpack.c.bf16 %v1538_v9, %v1537_v42  ;;  %v1087_v42 = vadd.f32 %v1071_v14, %v959_v2  ;;  %v6455_v9 = vunpack.i.h.bf16 %v7762_v41  ;;  %v1797_v37 = vsel %vm1796_vm0, %v1086_v18, %v6454_v15 }
 0x1b1   : > { %v963_v14 = vmul.f32 %v7778_v25, %v7587_v46  ;;  %v6464_v15 = vunpack.i.l.bf16 %v7807_v60  ;;  %v964_v25 = vmul.f32 %v7795_v0, %v7595_v49  ;;  %v6469_v0 = vunpack.i.l.bf16 %v6468_v23 }
 0x1b2   : > { %6086 = vmatprep.mubr.bf16.mxu1 %v1547_v32  ;;  %v1073_v32 = vmul.f32 %v7768_v53, %v7572_v35  ;;  %v1798_v41 = vsel %vm1796_vm0, %v1087_v42, %v6455_v9  ;;  %v1074_v53 = vmul.f32 %v7792_v8, %v7582_v44 }
 0x1b3   : > { %v6737_v12 = vpop.eup %6736  ;;  %v936_v17 = vpop.permute.xlu1 %935 }
 0x1b4   : > { %v1539_v38 = vmul.f32 %v6737_v12, %v1423_v22  ;;  %v931_v22 = vpop.permute.xlu0 %930  ;;  %v1813_v12 = vpack.c.bf16 %v1798_v41, %v1797_v37  ;;  %v1089_v24 = vadd.f32 %v1073_v32, %v961_v36  ;;  %v1076_v36 = vmul.f32 %v7801_v7, %v7601_v51 }
 0x1b5   : > { %v6739_v6 = vpop.eup %6738  ;;  %v966_v7 = vmul.f32 %v7817_v10, %v7611_v55 }
 0x1b6   : > { %v1540_v57 = vmul.f32 %v6739_v6, %v1426_v11  ;;  %v1072_v11 = vmul.f32 %v7740_v48, %v7569_v34  ;;  %v962_v48 = vmul.f32 %v7784_v45, %v7579_v43  ;;  %v6465_v45 = vunpack.i.h.bf16 %v7807_v60 }
 0x1b7   : > { %v1048_v8 = vpop.permute.xlu1 %1047 }
 0x1b8   : > { %v1548_v21 = vpack.c.bf16 %v1540_v57, %v1539_v38  ;;  %v1088_v6 = vadd.f32 %v1072_v11, %v960_v19  ;;  %v1043_v2 = vpop.permute.xlu0 %1042  ;;  %v1075_v38 = vmul.f32 %v7789_v28, %v7590_v47  ;;  %v1800_v57 = vsel %vm1796_vm0, %v1089_v24, %v6460_v27 }
 0x1b9   : > { %v1090_v42 = vadd.f32 %v1074_v53, %v962_v48  ;;  %v965_v28 = vmul.f32 %v7803_v26, %v7598_v50  ;;  %v1077_v19 = vmul.f32 %v7809_v16, %v7604_v52  ;;  %v6470_v24 = vunpack.i.h.bf16 %v6468_v23 }
 0x1ba   : > { %6087 = vmatmul.mubr.bf16.gmra.mrb[12].mxu1 %v1548_v21  ;;  %v1799_v13 = vsel %vm1796_vm0, %v1088_v6, %v6459_v20  ;;  %v1091_v9 = vadd.f32 %v1075_v38, %v963_v14  ;;  %v1078_v26 = vmul.f32 %v1033_v39, %v7614_v56  ;;  %v967_v27 = vmul.f32 %v7813_v40, %v7619_v58 }
 0x1bb   : > { %1935 = vmatprep.mubr.bf16.mxu1 %v10080_v3  ;;  %v1814_v18 = vpack.c.bf16 %v1800_v57, %v1799_v13  ;;  %v1801_v11 = vsel %vm1796_vm0, %v1090_v42, %v6464_v15  ;;  %v941_v37 = vpop.permute.xlu1 %940  ;;  %v1093_v6 = vadd.f32 %v1077_v19, %v965_v28  ;;  %v1079_v20 = vmul.f32 %v7825_v54, %v7622_v59 }
 0x1bc   : > { %v6473_v21 = vpop.permute.xlu0 %6472  ;;  %v1802_v60 = vsel %vm1796_vm0, %v1091_v9, %v6465_v45  ;;  %v1094_v38 = vadd.f32 %v1078_v26, %v966_v7  ;;  %v968_v40 = vmul.f32 %v931_v22, %v7627_v61  ;;  %v969_v39 = vmul.f32 %v936_v17, %v7630_v62  ;;  %v10081_v17 = vld [vmem:[#allocation43_spill] sm:$0xff] }
 0x1bd   : > { %v1815_v41 = vpack.c.bf16 %v1802_v60, %v1801_v11  ;;  %v1804_v23 = vsel %vm1796_vm0, %v1093_v6, %v6470_v24  ;;  %v1095_v13 = vadd.f32 %v1079_v20, %v967_v27  ;;  %v6475_v57 = vunpack.i.h.bf16 %v6473_v21 }
 0x1be   : > { %v1080_v42 = vmul.f32 %v1043_v2, %v7633_v63  ;;  %v1081_v9 = vmul.f32 %v1048_v8, %v7636_v1  ;;  %v970_v22 = vmul.f32 %v941_v37, %v7643_v4  ;;  %v10083_v37 = vld [vmem:[#allocation45_spill] sm:$0xff] }
 0x1bf   : > { %v1053_v53 = vpop.permute.xlu1 %1052  ;;  %v1806_v15 = vsel %vm1796_vm0, %v1095_v13, %v6475_v57  ;;  %v10086_v13 = vld [vmem:[#allocation48_spill] sm:$0xff] }
 0x1c0   : > { %v946_v32 = vpop.permute.xlu0 %945  ;;  %v1096_v28 = vadd.f32 %v1080_v42, %v968_v40  ;;  %v1082_v2 = vmul.f32 %v1053_v53, %v7646_v5 }
 0x1c1   : > { %v971_v8 = vmul.f32 %v946_v32, %v10081_v17  ;;  %v10084_v32 = vld [vmem:[#allocation46_spill] sm:$0xff] }
 0x1c2   : > { %5599 = vmatmul.mubr.msk.bf16.vlgmr.msra.gmra.mrb[16].mxu1 %vm1878_vm1, %v1813_v12  ;;  %v1092_v12 = vadd.f32 %v1076_v36, %v964_v25  ;;  %v1097_v36 = vadd.f32 %v1081_v9, %v969_v39  ;;  %v1098_v27 = vadd.f32 %v1082_v2, %v970_v22  ;;  %v6554_v22 = vld [vmem:[%s9911_s13 + $0x30] ss:$12 sps:$4 sm:$0xff]   ;;  %v6557_v2 = vld [vmem:[%s9911_s13 + $0x48] ss:$12 sps:$4 sm:$0xff]  }
 0x1c3   : > { %1945 = vmatprep.mubr.bf16.mxu1 %v10080_v3  ;;  %v6478_v54 = vpop.permute.xlu1 %6477 }
 0x1c4   : > { %v1058_v16 = vpop.permute.xlu0 %1057  ;;  %v1803_v48 = vsel %vm1796_vm0, %v1092_v12, %v6469_v0  ;;  %v6480_v19 = vunpack.i.h.bf16 %v6478_v54  ;;  %v6479_v11 = vunpack.i.l.bf16 %v6478_v54 }
 0x1c5   : > { %v1816_v14 = vpack.c.bf16 %v1804_v23, %v1803_v48 }
 0x1c6   : > { %v1807_v6 = vsel %vm1796_vm0, %v1096_v28, %v6479_v11  ;;  %v1808_v24 = vsel %vm1796_vm0, %v1097_v36, %v6480_v19  ;;  %v6551_v19 = vld [vmem:[%s9911_s13 + $0x18] ss:$12 sps:$4 sm:$0xff]   ;;  %v6553_v11 = vld [vmem:[%s9911_s13 + $0x1c] ss:$12 sps:$4 sm:$0xff]  }
 0x1c7   : > { %v956_v60 = vpop.permute.xlu1 %955  ;;  %v1818_v26 = vpack.c.bf16 %v1808_v24, %v1807_v6  ;;  %v6567_v6 = vld [vmem:[%s9911_s13 + $0x20] ss:$12 sps:$4 sm:$0xff]   ;;  %v6562_v24 = vld [vmem:[%s9911_s13 + $0x64] ss:$12 sps:$4 sm:$0xff]  }
 0x1c8   : > { %v951_v10 = vpop.permute.xlu0 %950 }
 0x1c9   : > { %v972_v53 = vmul.f32 %v951_v10, %v10083_v37  ;;  %v6548_v10 = vld [vmem:[%s9911_s13] ss:$12 sps:$4 sm:$0xff]  }
 0x1ca   : > { %5600 = vmatmul.mubr.msk.bf16.gmra.mrb[20].mxu1 %vm1878_vm1, %v1814_v18  ;;  %v6474_v18 = vunpack.i.l.bf16 %v6473_v21 }
 0x1cb   : > { %1955 = vmatprep.mubr.bf16.mxu1 %v10080_v3  ;;  %v1068_v7 = vpop.permute.xlu1 %1067 }
 0x1cc   : > { %v1805_v45 = vsel %vm1796_vm0, %v1094_v38, %v6474_v18  ;;  %v1063_v25 = vpop.permute.xlu0 %1062  ;;  %v1085_v57 = vmul.f32 %v1068_v7, %v10086_v13  ;;  %v6560_v7 = vld [vmem:[%s9911_s13 + $0x60] ss:$12 sps:$4 sm:$0xff]  }
 0x1cd   : > { %v1817_v21 = vpack.c.bf16 %v1806_v15, %v1805_v45 }
 0x1cf   : > { %v6488_v39 = vpop.permute.xlu1 %6487 }
 0x1d0   : > { %v6483_v0 = vpop.permute.xlu0 %6482  ;;  %v6490_v45 = vunpack.i.h.bf16 %v6488_v39  ;;  %v6489_v15 = vunpack.i.l.bf16 %v6488_v39 }
 0x1d1   : > { %v6485_v48 = vunpack.i.h.bf16 %v6483_v0  ;;  %v6484_v23 = vunpack.i.l.bf16 %v6483_v0  ;;  %v6571_v0 = vld [vmem:[%s9911_s13 + $0x38] ss:$12 sps:$4 sm:$0xff]  }
 0x1d2   : > { %5601 = vmatmul.mubr.msk.bf16.gmra.mrb[24].mxu1 %vm1878_vm1, %v1815_v41  ;;  %v10082_v41 = vld [vmem:[#allocation44_spill] sm:$0xff] }
 0x1d3   : > { %1965 = vmatprep.mubr.bf16.mxu1 %v10080_v3  ;;  %v1083_v12 = vmul.f32 %v1058_v16, %v10082_v41  ;;  %v10085_v16 = vld [vmem:[#allocation47_spill] sm:$0xff]  ;;  %v1809_v18 = vsel %vm1796_vm0, %v1098_v27, %v6484_v23  ;;  %v6572_v27 = vld [vmem:[%s9911_s13 + $0x50] ss:$12 sps:$4 sm:$0xff]  }
 0x1d4   : > { %v1084_v38 = vmul.f32 %v1063_v25, %v10085_v16  ;;  %v6550_v25 = vld [vmem:[%s9911_s13 + $0x4] ss:$12 sps:$4 sm:$0xff]   ;;  %v6576_v23 = vld [vmem:[%s9911_s13 + $0x68] ss:$12 sps:$4 sm:$0xff]  }
 0x1d5   : > { %v1099_v20 = vadd.f32 %v1083_v12, %v971_v8  ;;  %2342 = vmatprep.subr.bf16.mxu0 %v6550_v25  ;;  %v6559_v8 = vld [vmem:[%s9911_s13 + $0x4c] ss:$12 sps:$4 sm:$0xff]   ;;  %v6566_v12 = vld [vmem:[%s9911_s13 + $0x8] ss:$12 sps:$4 sm:$0xff]  }
 0x1d6   : > { %v1100_v42 = vadd.f32 %v1084_v38, %v972_v53  ;;  %2343 = vmatpush1.bf16.msra.mxu0 %v6548_v10  ;;  %6090 = vmatprep.subr.bf16.mxu1 %v6566_v12  ;;  %v6568_v53 = vld [vmem:[%s9911_s13 + $0x90] ss:$12 sps:$4 sm:$0xff]   ;;  %v6577_v38 = vld [vmem:[%s9911_s13 + $0x80] ss:$12 sps:$4 sm:$0xff]  }
 0x1d7   : > { %v1810_v40 = vsel %vm1796_vm0, %v1099_v20, %v6485_v48  ;;  %2344 = vmatprep.subr.bf16.mxu0 %v6553_v11  ;;  %6091 = vmatpush3.bf16.msra.mxu1 %v6566_v12  ;;  %v6563_v20 = vld [vmem:[%s9911_s13 + $0x78] ss:$12 sps:$4 sm:$0xff]   ;;  %v6570_v48 = vld [vmem:[%s9911_s13 + $0x94] ss:$12 sps:$4 sm:$0xff]  }
 0x1d8   : > { %v1819_v54 = vpack.c.bf16 %v1810_v40, %v1809_v18  ;;  %6092 = vmatprep.subr.bf16.mxu1 %v6567_v6  ;;  %v6578_v18 = vld [vmem:[%s9911_s13 + $0x98] ss:$12 sps:$4 sm:$0xff]   ;;  %v6579_v40 = vld [vmem:[%s9911_s13 + $0xb0] ss:$12 sps:$4 sm:$0xff]   ;;  %v1827_v11 = vld [vmem:[%s9908_s10] sm:$0x3] }
 0x1da   : > { %5602 = vmatmul.mubr.msk.bf16.gmra.mrb[28].mxu1 %vm1878_vm1, %v1816_v14  ;;  %v973_v14 = vmul.f32 %v956_v60, %v10084_v32  ;;  %v6556_v60 = vld [vmem:[%s9911_s13 + $0x34] ss:$12 sps:$4 sm:$0xff]   ;;  %2345 = vmatpush1.bf16.msra.mxu0 %v6551_v19 }
 0x1db   : > { %1975 = vmatprep.mubr.bf16.mxu1 %v10080_v3  ;;  %2346 = vmatprep.subr.bf16.mxu0 %v6556_v60  ;;  %v1828_v60 = vunpack.c.l.bf16 %v1827_v11 }
 0x1dc   : > { %v1101_v9 = vadd.f32 %v1085_v57, %v973_v14  ;;  %6093 = vmatpush3.bf16.msra.mxu1 %v6567_v6  ;;  %v6575_v14 = vld [vmem:[%s9911_s13 + $0xac] ss:$12 sps:$4 sm:$0xff]   ;;  %v6573_v57 = vld [vmem:[%s9911_s13 + $0xa8] ss:$12 sps:$4 sm:$0xff]  }
 0x1dd   : > { %6094 = vmatprep.subr.bf16.mxu1 %v6571_v0 }
 0x1de   : > { %v1812_v28 = vsel %vm1796_vm0, %v1101_v9, %v6490_v45  ;;  %2347 = vmatpush1.bf16.msra.mxu0 %v6554_v22  ;;  %v10087_v22 = vld [vmem:[#allocation49_spill] sm:$0xff] }
 0x1df   : > { %2348 = vmatprep.subr.bf16.mxu0 %v6559_v8  ;;  %v1565_v8 = vld [vmem:[#allocation5] sm:$0x1] }
 0x1e0   : > { %6095 = vmatpush3.bf16.msra.mxu1 %v6571_v0 }
 0x1e1   : > { %6096 = vmatprep.subr.bf16.mxu1 %v6572_v27 }
 0x1e2   : > { %5603 = vmatmul.mubr.msk.bf16.gmra.mrb[32].mxu1 %vm1878_vm1, %v1817_v21  ;;  %v1811_v21 = vsel %vm1796_vm0, %v1100_v42, %v6489_v15  ;;  %2349 = vmatpush1.bf16.msra.mxu0 %v6557_v2  ;;  %v8000_v2 = vsub.s32 2, %v10087_v22 }
 0x1e3   : > { %1985 = vmatprep.mubr.bf16.mxu1 %v10080_v3  ;;  %v1820_v36 = vpack.c.bf16 %v1812_v28, %v1811_v21  ;;  %2350 = vmatprep.subr.bf16.mxu0 %v6562_v24  ;;  %v10089_v24 = vld [vmem:[#allocation50_spill] sm:$0xff] }
 0x1e4   : > { %6097 = vmatpush3.bf16.msra.mxu1 %v6572_v27  ;;  %10088 = vst [vmem:[#allocation51_spill] sm:$0xff] %v8000_v2  ;;  %v1833_v0 = vrot.slane %v1828_v60, %v10089_v24  ;;  %v1837_v27 = vrot.slane %v1828_v60, %v8000_v2 }
 0x1e5   : > { %6098 = vmatprep.subr.bf16.mxu1 %v6576_v23 }
 0x1e6   : > { %2351 = vmatpush1.bf16.msra.mxu0 %v6560_v7  ;;  %v1566_v7 = vunpack.c.l.bf16 %v1565_v8 }
 0x1e8   : > { %6099 = vmatpush3.bf16.msra.mxu1 %v6576_v23  ;;  %v8016_v23 = vrot.slane %v1566_v7, %v10089_v24 }
 0x1e9   : > { %6100 = vmatprep.subr.bf16.mxu1 %v6577_v38 }
 0x1ea   : > { %5604 = vmatmul.mubr.msk.bf16.gmra.mrb[36].mxu1 %vm1878_vm1, %v1818_v26  ;;  %v6565_v26 = vld [vmem:[%s9911_s13 + $0x7c] ss:$12 sps:$4 sm:$0xff]  }
 0x1eb   : > { %1995 = vmatprep.mubr.bf16.mxu1 %v10080_v3  ;;  %2352 = vmatprep.subr.bf16.mxu0 %v6565_v26 }
 0x1ec   : > { %2353 = vmatpush1.bf16.msra.mxu0 %v6563_v20  ;;  %6101 = vmatpush3.bf16.msra.mxu1 %v6577_v38 }
 0x1ed   : > { %2354 = vmatprep.subr.bf16.mxu0 %v6570_v48  ;;  %6102 = vmatprep.subr.bf16.mxu1 %v6578_v18  ;;  %v8013_v48 = vrot.slane %v1833_v0, %v10089_v24 }
 0x1f0   : > { %2355 = vmatpush1.bf16.msra.mxu0 %v6568_v53  ;;  %6103 = vmatpush3.bf16.msra.mxu1 %v6578_v18  ;;  %v8019_v53 = vrot.slane %v1837_v27, %v10089_v24 }
 0x1f1   : > { %2356 = vmatprep.subr.bf16.mxu0 %v6575_v14  ;;  %6104 = vmatprep.subr.bf16.mxu1 %v6579_v40 }
 0x1f2   : > { %5605 = vmatmul.mubr.msk.bf16.gmra.mrb[40].mxu1 %vm1878_vm1, %v1819_v54 }
 0x1f3   : > { %2005 = vmatprep.mubr.bf16.mxu1 %v10080_v3 }
 0x1f4   : > { %2357 = vmatpush1.bf16.msra.mxu0 %v6573_v57  ;;  %6105 = vmatpush3.bf16.msra.mxu1 %v6579_v40 }
 0x1fa   : > { %5606 = vmatmul.mubr.msk.bf16.gmra.mrb[44].mxu1 %vm1878_vm1, %v1820_v36 }
 0x25d   : > { %v6076_v39 = vpop.f32.mrb[0].mxu1 }
 0x25e   : > { %v1653_v54 = vpop.f32.mrb[1].mxu1  ;;  %v1662_v41 = vadd.f32 %v6076_v39, %v8016_v23 }
 0x25f   : > { %v6077_v42 = vpop.f32.mrb[2].mxu1  ;;  %v1654_v18 = vadd.f32 %v1653_v54, %v8016_v23 }
 0x260   : > { %v1656_v9 = vpop.f32.mrb[3].mxu1 }
 0x261   : > { %v1657_v0 = vadd.f32 %v1656_v9, %v8016_v23 }
 0x26d   : > { %v7980_v45 = vpop.f32.mrb[4].mxu1 }
 0x26e   : > { %v7982_v15 = vpop.f32.mrb[5].mxu1 }
 0x26f   : > { %v7984_v10 = vpop.f32.mrb[6].mxu1 }
 0x270   : > { %v7986_v25 = vpop.f32.mrb[7].mxu1 }
 0x27d   : > { %v7988_v21 = vpop.f32.mrb[8].mxu1 }
 0x27e   : > { %v7990_v28 = vpop.f32.mrb[9].mxu1 }
 0x27f   : > { %v7992_v36 = vpop.f32.mrb[10].mxu1 }
 0x280   : > { %v7994_v19 = vpop.f32.mrb[11].mxu1 }
 0x28d   : > { %v8002_v12 = vpop.f32.mrb[12].mxu1 }
 0x28e   : > { %v8004_v6 = vpop.f32.mrb[13].mxu1 }
 0x28f   : > { %v8007_v26 = vpop.f32.mrb[14].mxu1 }
 0x290   : > { %v8010_v20 = vpop.f32.mrb[15].mxu1 }
 0x295   : > { %v1937_v14 = vpop.f32.mrb[16].mxu1 }
 0x296   : > { %v8022_v38 = vadd.f32 %v1937_v14, %v8013_v48  ;;  %v1939_v57 = vpop.f32.mrb[17].mxu1 }
 0x297   : > { %v1940_v40 = vadd.f32 %v1939_v57, %v8019_v53  ;;  %v1941_v11 = vpop.f32.mrb[18].mxu1 }
 0x298   : > { %10090 = vst [vmem:[#allocation52_spill] sm:$0xff] %v8022_v38  ;;  %v8027_v60 = vadd.f32 %v1941_v11, %v8013_v48  ;;  %v1943_v8 = vpop.f32.mrb[19].mxu1  ;;  %2552 = vadd.xlane.f32.xlu0 %v8022_v38  ;;  %v2601_v11 = vmul.f32 %v8022_v38, %v8022_v38 }
 0x299   : > { %v8031_v7 = vadd.f32 %v1940_v40, %v1654_v18  ;;  %v1944_v27 = vadd.f32 %v1943_v8, %v8019_v53 }
 0x29a   : > { %10091 = vst [vmem:[#allocation53_spill] sm:$0xff] %v8027_v60  ;;  %2554 = vadd.xlane.f32.xlu1 %v8027_v60  ;;  %v2602_v54 = vmul.f32 %v8027_v60, %v8027_v60 }
 0x29b   : > { %v5607_v14 = vmul.f32 -1.442695, %v8031_v7  ;;  %v8038_v57 = vadd.f32 %v1944_v27, %v1657_v0 }
 0x29c   : > { %2619 = vadd.xlane.f32.xlu0 %v2602_v54 }
 0x29d   : > { %6740 = vpow2.f32 %v5607_v14  ;;  %v5608_v9 = vmul.f32 -1.442695, %v8038_v57  ;;  %v1947_v18 = vpop.f32.mrb[20].mxu1  ;;  %v1665_v14 = vadd.f32 %v6077_v42, %v8016_v23 }
 0x29e   : > { %v8044_v40 = vadd.f32 %v1947_v18, %v8013_v48  ;;  %v1949_v8 = vpop.f32.mrb[21].mxu1  ;;  %2617 = vadd.xlane.f32.xlu1 %v2601_v11 }
 0x29f   : > { %6742 = vpow2.f32 %v5608_v9  ;;  %v1950_v17 = vadd.f32 %v1949_v8, %v8019_v53  ;;  %v1951_v0 = vpop.f32.mrb[22].mxu1 }
 0x2a0   : > { %10092 = vst [vmem:[#allocation54_spill] sm:$0xff] %v8044_v40  ;;  %v1953_v27 = vpop.f32.mrb[23].mxu1  ;;  %2556 = vadd.xlane.f32.xlu0 %v8044_v40  ;;  %v2603_v54 = vmul.f32 %v8044_v40, %v8044_v40  ;;  %v8056_v11 = vadd.f32 %v1951_v0, %v8013_v48 }
 0x2a1   : > { %v8052_v13 = vadd.f32 %v1950_v17, %v1662_v41  ;;  %v1954_v18 = vadd.f32 %v1953_v27, %v8019_v53  ;;  %v1670_v27 = vadd.f32 %v7982_v15, %v8016_v23 }
 0x2a2   : > { %10093 = vst [vmem:[#allocation55_spill] sm:$0xff] %v8056_v11  ;;  %2621 = vadd.xlane.f32.xlu1 %v2603_v54  ;;  %v2604_v41 = vmul.f32 %v8056_v11, %v8056_v11 }
 0x2a3   : > { %v5609_v39 = vmul.f32 -1.442695, %v8052_v13  ;;  %v8059_v9 = vadd.f32 %v1954_v18, %v1665_v14 }
 0x2a4   : > { %2558 = vadd.xlane.f32.xlu0 %v8056_v11 }
 0x2a5   : > { %6744 = vpow2.f32 %v5609_v39  ;;  %v5610_v8 = vmul.f32 -1.442695, %v8059_v9  ;;  %v1957_v32 = vpop.f32.mrb[24].mxu1 }
 0x2a6   : > { %v8064_v42 = vadd.f32 %v1957_v32, %v8013_v48  ;;  %v1959_v17 = vpop.f32.mrb[25].mxu1  ;;  %v1673_v32 = vadd.f32 %v7986_v25, %v8016_v23 }
 0x2a7   : > { %v6741_v0 = vpop.eup %6740  ;;  %6746 = vpow2.f32 %v5610_v8  ;;  %v1960_v54 = vadd.f32 %v1959_v17, %v8019_v53  ;;  %v1961_v14 = vpop.f32.mrb[26].mxu1 }
 0x2a8   : > { %10094 = vst [vmem:[#allocation56_spill] sm:$0xff] %v8064_v42  ;;  %v2080_v18 = vadd.f32 1.0, %v6741_v0  ;;  %v1963_v39 = vpop.f32.mrb[27].mxu1  ;;  %2623 = vadd.xlane.f32.xlu0 %v2604_v41  ;;  %2560 = vadd.xlane.f32.xlu1 %v8064_v42  ;;  %v8078_v15 = vadd.f32 %v1961_v14, %v8013_v48  ;;  %v2605_v8 = vmul.f32 %v8064_v42, %v8064_v42 }
 0x2a9   : > { %v6743_v5 = vpop.eup %6742  ;;  %v8074_v4 = vadd.f32 %v1960_v54, %v1670_v27  ;;  %v1964_v16 = vadd.f32 %v1963_v39, %v8019_v53 }
 0x2aa   : > { %6748 = vrcp.f32 %v2080_v18  ;;  %v2081_v37 = vadd.f32 1.0, %v6743_v5  ;;  %10095 = vst [vmem:[#allocation57_spill] sm:$0xff] %v8078_v15  ;;  %v2606_v54 = vmul.f32 %v8078_v15, %v8078_v15 }
 0x2ab   : > { %v5611_v17 = vmul.f32 -1.442695, %v8074_v4  ;;  %v8083_v41 = vadd.f32 %v1964_v16, %v1673_v32  ;;  %v1678_v16 = vadd.f32 %v7980_v45, %v8016_v23 }
 0x2ac   : > { %6750 = vrcp.f32 %v2081_v37  ;;  %2562 = vadd.xlane.f32.xlu0 %v8078_v15  ;;  %2625 = vadd.xlane.f32.xlu1 %v2605_v8 }
 0x2ad   : > { %6752 = vpow2.f32 %v5611_v17  ;;  %v5612_v25 = vmul.f32 -1.442695, %v8083_v41  ;;  %v1967_v0 = vpop.f32.mrb[28].mxu1  ;;  %v1681_v17 = vadd.f32 %v7984_v10, %v8016_v23 }
 0x2ae   : > { %v8088_v5 = vadd.f32 %v1967_v0, %v8013_v48  ;;  %v1969_v27 = vpop.f32.mrb[29].mxu1 }
 0x2af   : > { %v6745_v14 = vpop.eup %6744  ;;  %6754 = vpow2.f32 %v5612_v25  ;;  %v1970_v37 = vadd.f32 %v1969_v27, %v8019_v53  ;;  %v1971_v18 = vpop.f32.mrb[30].mxu1 }
 0x2b0   : > { %10096 = vst [vmem:[#allocation58_spill] sm:$0xff] %v8088_v5  ;;  %v2082_v39 = vadd.f32 1.0, %v6745_v14  ;;  %v1973_v32 = vpop.f32.mrb[31].mxu1  ;;  %2627 = vadd.xlane.f32.xlu0 %v2606_v54  ;;  %2564 = vadd.xlane.f32.xlu1 %v8088_v5  ;;  %v8102_v45 = vadd.f32 %v1971_v18, %v8013_v48  ;;  %v2607_v25 = vmul.f32 %v8088_v5, %v8088_v5 }
 0x2b1   : > { %v6747_v8 = vpop.eup %6746  ;;  %v8098_v0 = vadd.f32 %v1970_v37, %v1678_v16  ;;  %v1974_v59 = vadd.f32 %v1973_v32, %v8019_v53  ;;  %v1686_v18 = vadd.f32 %v7990_v28, %v8016_v23 }
 0x2b2   : > { %6756 = vrcp.f32 %v2082_v39  ;;  %v2083_v58 = vadd.f32 1.0, %v6747_v8 }
 0x2b3   : > { %v5613_v27 = vmul.f32 -1.442695, %v8098_v0  ;;  %v8107_v54 = vadd.f32 %v1974_v59, %v1681_v17  ;;  %v2608_v59 = vmul.f32 %v8102_v45, %v8102_v45 }
 0x2b4   : > { %v6749_v14 = vpop.eup %6748  ;;  %6758 = vrcp.f32 %v2083_v58  ;;  %2566 = vadd.xlane.f32.xlu0 %v8102_v45  ;;  %2629 = vadd.xlane.f32.xlu1 %v2607_v25 }
 0x2b5   : > { %6760 = vpow2.f32 %v5613_v27  ;;  %v5614_v10 = vmul.f32 -1.442695, %v8107_v54  ;;  %v1977_v16 = vpop.f32.mrb[32].mxu1  ;;  %v2128_v58 = vmul.f32 %v6749_v14, %v8031_v7 }
 0x2b6   : > { %v6751_v37 = vpop.eup %6750  ;;  %v8114_v39 = vadd.f32 %v1977_v16, %v8013_v48  ;;  %v1979_v32 = vpop.f32.mrb[33].mxu1  ;;  %v1689_v16 = vadd.f32 %v7994_v19, %v8016_v23 }
 0x2b7   : > { %v6753_v8 = vpop.eup %6752  ;;  %v2129_v17 = vmul.f32 %v6751_v37, %v8038_v57  ;;  %6762 = vpow2.f32 %v5614_v10  ;;  %v1980_v25 = vadd.f32 %v1979_v32, %v8019_v53  ;;  %v1981_v27 = vpop.f32.mrb[34].mxu1 }
 0x2b8   : > { %v2084_v1 = vadd.f32 1.0, %v6753_v8  ;;  %v1983_v62 = vpop.f32.mrb[35].mxu1  ;;  %2631 = vadd.xlane.f32.xlu0 %v2608_v59  ;;  %2568 = vadd.xlane.f32.xlu1 %v8114_v39  ;;  %v8130_v14 = vadd.f32 %v1981_v27, %v8013_v48  ;;  %v2609_v10 = vmul.f32 %v8114_v39, %v8114_v39  ;;  %v1694_v59 = vadd.f32 %v7988_v21, %v8016_v23 }
 0x2b9   : > { %v6755_v28 = vpop.eup %6754  ;;  %v8124_v56 = vpack.c.bf16 %v2129_v17, %v2128_v58  ;;  %v8126_v55 = vadd.f32 %v1980_v25, %v1686_v18  ;;  %v1984_v7 = vadd.f32 %v1983_v62, %v8019_v53 }
 0x2ba   : > { %6764 = vrcp.f32 %v2084_v1  ;;  %v2085_v57 = vadd.f32 1.0, %v6755_v28  ;;  %v2610_v17 = vmul.f32 %v8130_v14, %v8130_v14 }
 0x2bb   : > { %10097 = vst [vmem:[#allocation59_spill] sm:$0xff] %v8124_v56  ;;  %v5615_v37 = vmul.f32 -1.442695, %v8126_v55  ;;  %v8135_v32 = vadd.f32 %v1984_v7, %v1689_v16  ;;  %2375 = vmatmul.mubr.bf16.vlgmr.msra.gmra.mrb[32].mxu0 %v8124_v56  ;;  %6106 = vmatprep.mubr.bf16.mxu1 %v8124_v56 }
 0x2bc   : > { %v6757_v19 = vpop.eup %6756  ;;  %6766 = vrcp.f32 %v2085_v57  ;;  %2570 = vadd.xlane.f32.xlu0 %v8130_v14  ;;  %2633 = vadd.xlane.f32.xlu1 %v2609_v10 }
 0x2bd   : > { %6768 = vpow2.f32 %v5615_v37  ;;  %v5616_v62 = vmul.f32 -1.442695, %v8135_v32  ;;  %v1987_v1 = vpop.f32.mrb[36].mxu1  ;;  %2384 = vmatprep.mubr.bf16.mxu0 %v10080_v3  ;;  %v2130_v27 = vmul.f32 %v6757_v19, %v8052_v13  ;;  %v1697_v37 = vadd.f32 %v7992_v36, %v8016_v23 }
 0x2be   : > { %v6759_v18 = vpop.eup %6758  ;;  %v8145_v8 = vadd.f32 %v1987_v1, %v8013_v48  ;;  %v1989_v58 = vpop.f32.mrb[37].mxu1 }
 0x2bf   : > { %v6761_v25 = vpop.eup %6760  ;;  %v2131_v28 = vmul.f32 %v6759_v18, %v8059_v9  ;;  %6770 = vpow2.f32 %v5616_v62  ;;  %v1990_v16 = vadd.f32 %v1989_v58, %v8019_v53  ;;  %v1991_v7 = vpop.f32.mrb[38].mxu1 }
 0x2c0   : > { %v2086_v57 = vadd.f32 1.0, %v6761_v25  ;;  %v1993_v10 = vpop.f32.mrb[39].mxu1  ;;  %2635 = vadd.xlane.f32.xlu0 %v2610_v17  ;;  %2572 = vadd.xlane.f32.xlu1 %v8145_v8  ;;  %v8161_v19 = vadd.f32 %v1991_v7, %v8013_v48  ;;  %v2611_v62 = vmul.f32 %v8145_v8, %v8145_v8 }
 0x2c1   : > { %v6763_v21 = vpop.eup %6762  ;;  %v8155_v1 = vpack.c.bf16 %v2131_v28, %v2130_v27  ;;  %v8157_v63 = vadd.f32 %v1990_v16, %v1694_v59  ;;  %v1994_v13 = vadd.f32 %v1993_v10, %v8019_v53  ;;  %v1702_v27 = vadd.f32 %v8004_v6, %v8016_v23 }
 0x2c2   : > { %6772 = vrcp.f32 %v2086_v57  ;;  %v2087_v9 = vadd.f32 1.0, %v6763_v21  ;;  %v2612_v7 = vmul.f32 %v8161_v19, %v8161_v19 }
 0x2c3   : > { %10098 = vst [vmem:[#allocation60_spill] sm:$0xff] %v8155_v1  ;;  %v5617_v18 = vmul.f32 -1.442695, %v8157_v63  ;;  %v8166_v58 = vadd.f32 %v1994_v13, %v1697_v37  ;;  %2385 = vmatmul.mubr.bf16.gmra.mrb[36].mxu0 %v8155_v1  ;;  %6107 = vmatmul.mubr.bf16.vlgmr.msra.gmra.mrb[48].mxu1 %v8155_v1 }
 0x2c4   : > { %v6765_v36 = vpop.eup %6764  ;;  %6774 = vrcp.f32 %v2087_v9  ;;  %2574 = vadd.xlane.f32.xlu0 %v8161_v19  ;;  %2637 = vadd.xlane.f32.xlu1 %v2611_v62 }
 0x2c5   : > { %6776 = vpow2.f32 %v5617_v18  ;;  %v5618_v59 = vmul.f32 -1.442695, %v8166_v58  ;;  %v1997_v17 = vpop.f32.mrb[40].mxu1  ;;  %2394 = vmatprep.mubr.bf16.mxu0 %v10080_v3  ;;  %v2132_v10 = vmul.f32 %v6765_v36, %v8074_v4  ;;  %v1705_v18 = vadd.f32 %v8010_v20, %v8016_v23 }
 0x2c6   : > { %v6767_v25 = vpop.eup %6766  ;;  %v8176_v28 = vadd.f32 %v1997_v17, %v8013_v48  ;;  %v1999_v16 = vpop.f32.mrb[41].mxu1 }
 0x2c7   : > { %v6769_v57 = vpop.eup %6768  ;;  %v2133_v21 = vmul.f32 %v6767_v25, %v8083_v41  ;;  %6778 = vpow2.f32 %v5618_v59  ;;  %v2000_v37 = vadd.f32 %v1999_v16, %v8019_v53  ;;  %v2001_v13 = vpop.f32.mrb[42].mxu1 }
 0x2c8   : > { %v2088_v9 = vadd.f32 1.0, %v6769_v57  ;;  %v2003_v62 = vpop.f32.mrb[43].mxu1  ;;  %2639 = vadd.xlane.f32.xlu0 %v2612_v7  ;;  %2576 = vadd.xlane.f32.xlu1 %v8176_v28  ;;  %v8192_v36 = vadd.f32 %v2001_v13, %v8013_v48  ;;  %v2613_v59 = vmul.f32 %v8176_v28, %v8176_v28 }
 0x2c9   : > { %v6771_v6 = vpop.eup %6770  ;;  %v8186_v17 = vpack.c.bf16 %v2133_v21, %v2132_v10  ;;  %v8188_v61 = vadd.f32 %v2000_v37, %v1702_v27  ;;  %v2004_v4 = vadd.f32 %v2003_v62, %v8019_v53  ;;  %v1710_v10 = vadd.f32 %v8002_v12, %v8016_v23 }
 0x2ca   : > { %6780 = vrcp.f32 %v2088_v9  ;;  %v2089_v41 = vadd.f32 1.0, %v6771_v6  ;;  %v2614_v13 = vmul.f32 %v8192_v36, %v8192_v36 }
 0x2cb   : > { %10099 = vst [vmem:[#allocation61_spill] sm:$0xff] %v8186_v17  ;;  %v5619_v25 = vmul.f32 -1.442695, %v8188_v61  ;;  %v8197_v16 = vadd.f32 %v2004_v4, %v1705_v18  ;;  %2395 = vmatmul.mubr.bf16.gmra.mrb[40].mxu0 %v8186_v17  ;;  %6110 = vmatprep.mubr.bf16.mxu1 %v8186_v17 }
 0x2cc   : > { %v6773_v20 = vpop.eup %6772  ;;  %6782 = vrcp.f32 %v2089_v41  ;;  %2578 = vadd.xlane.f32.xlu0 %v8192_v36  ;;  %2641 = vadd.xlane.f32.xlu1 %v2613_v59 }
 0x2cd   : > { %6784 = vpow2.f32 %v5619_v25  ;;  %v5620_v27 = vmul.f32 -1.442695, %v8197_v16  ;;  %v2007_v7 = vpop.f32.mrb[44].mxu1  ;;  %2404 = vmatprep.mubr.bf16.mxu0 %v10080_v3  ;;  %v2134_v62 = vmul.f32 %v6773_v20, %v8098_v0  ;;  %v1713_v25 = vadd.f32 %v8007_v26, %v8016_v23 }
 0x2ce   : > { %v6775_v57 = vpop.eup %6774  ;;  %v8207_v21 = vadd.f32 %v2007_v7, %v8013_v48  ;;  %v2009_v37 = vpop.f32.mrb[45].mxu1 }
 0x2cf   : > { %v6777_v9 = vpop.eup %6776  ;;  %v2135_v6 = vmul.f32 %v6775_v57, %v8107_v54  ;;  %6786 = vpow2.f32 %v5620_v27  ;;  %v2010_v18 = vadd.f32 %v2009_v37, %v8019_v53  ;;  %v2011_v4 = vpop.f32.mrb[46].mxu1 }
 0x2d0   : > { %v2090_v41 = vadd.f32 1.0, %v6777_v9  ;;  %v2013_v59 = vpop.f32.mrb[47].mxu1  ;;  %2643 = vadd.xlane.f32.xlu0 %v2614_v13  ;;  %2580 = vadd.xlane.f32.xlu1 %v8207_v21  ;;  %v8223_v20 = vadd.f32 %v2011_v4, %v8013_v48  ;;  %v2615_v27 = vmul.f32 %v8207_v21, %v8207_v21 }
 0x2d1   : > { %v6779_v12 = vpop.eup %6778  ;;  %v8217_v7 = vpack.c.bf16 %v2135_v6, %v2134_v62  ;;  %v8219_v47 = vadd.f32 %v2010_v18, %v1710_v10  ;;  %v2014_v0 = vadd.f32 %v2013_v59, %v8019_v53 }
 0x2d2   : > { %6788 = vrcp.f32 %v2090_v41  ;;  %v2091_v54 = vadd.f32 1.0, %v6779_v12  ;;  %v2616_v53 = vmul.f32 %v8223_v20, %v8223_v20 }
 0x2d3   : > { %10100 = vst [vmem:[#allocation62_spill] sm:$0xff] %v8217_v7  ;;  %v5621_v57 = vmul.f32 -1.442695, %v8219_v47  ;;  %v2031_v37 = vadd.f32 %v2014_v0, %v1713_v25  ;;  %2405 = vmatmul.mubr.bf16.gmra.mrb[44].mxu0 %v8217_v7  ;;  %6111 = vmatmul.mubr.bf16.gmra.mrb[52].mxu1 %v8217_v7 }
 0x2d4   : > { %v6781_v26 = vpop.eup %6780  ;;  %6790 = vrcp.f32 %v2091_v54  ;;  %2582 = vadd.xlane.f32.xlu0 %v8223_v20  ;;  %2645 = vadd.xlane.f32.xlu1 %v2615_v27 }
 0x2d5   : > { %6792 = vpow2.f32 %v5621_v57  ;;  %v5622_v23 = vmul.f32 -1.442695, %v2031_v37  ;;  %2414 = vmatprep.mubr.bf16.mxu0 %v10080_v3  ;;  %v2136_v13 = vmul.f32 %v6781_v26, %v8126_v55 }
 0x2d6   : > { %v6783_v48 = vpop.eup %6782 }
 0x2d7   : > { %v6785_v10 = vpop.eup %6784  ;;  %v2137_v9 = vmul.f32 %v6783_v48, %v8135_v32  ;;  %6794 = vpow2.f32 %v5622_v23 }
 0x2d8   : > { %v2092_v62 = vadd.f32 1.0, %v6785_v10  ;;  %2647 = vadd.xlane.f32.xlu0 %v2616_v53 }
 0x2d9   : > { %v6787_v6 = vpop.eup %6786  ;;  %v8236_v18 = vpack.c.bf16 %v2137_v9, %v2136_v13 }
 0x2da   : > { %6796 = vrcp.f32 %v2092_v62  ;;  %v2093_v4 = vadd.f32 1.0, %v6787_v6  ;;  %v6583_v6 = vld [vmem:[%s9913_s15 + $0x18] sm:$0xff]  }
 0x2db   : > { %10101 = vst [vmem:[#allocation63_spill] sm:$0xff] %v8236_v18  ;;  %2415 = vmatmul.mubr.bf16.gmra.mrb[48].mxu0 %v8236_v18  ;;  %6114 = vmatprep.mubr.bf16.mxu1 %v8236_v18 }
 0x2dc   : > { %v6789_v41 = vpop.eup %6788  ;;  %6798 = vrcp.f32 %v2093_v4  ;;  %2424 = vmatprep.mubr.bf16.mxu0 %v10080_v3  ;;  %v6584_v4 = vld [vmem:[%s9913_s15 + $0x20] sm:$0xff]  }
 0x2dd   : > { %v2138_v32 = vmul.f32 %v6789_v41, %v8157_v63  ;;  %v6587_v41 = vld [vmem:[%s9913_s15 + $0x38] sm:$0xff]  }
 0x2de   : > { %v6791_v59 = vpop.eup %6790 }
 0x2df   : > { %v6793_v55 = vpop.eup %6792  ;;  %v2139_v12 = vmul.f32 %v6791_v59, %v8166_v58  ;;  %v6580_v58 = vld [vmem:[%s9913_s15] sm:$0xff]  }
 0x2e0   : > { %v2094_v25 = vadd.f32 1.0, %v6793_v55  ;;  %6122 = vmatprep.subr.bf16.mxu0 %v6580_v58  ;;  %v6590_v59 = vld [vmem:[%s9911_s13 + $0xc4] ss:$12 sps:$4 sm:$0xff]  }
 0x2e1   : > { %v6795_v0 = vpop.eup %6794  ;;  %v8243_v54 = vpack.c.bf16 %v2139_v12, %v2138_v32  ;;  %6123 = vmatpush3.bf16.msra.mxu0 %v6580_v58 }
 0x2e2   : > { %6800 = vrcp.f32 %v2094_v25  ;;  %v2095_v27 = vadd.f32 1.0, %v6795_v0 }
 0x2e3   : > { %10102 = vst [vmem:[#allocation64_spill] sm:$0xff] %v8243_v54  ;;  %2425 = vmatmul.mubr.bf16.gmra.mrb[52].mxu0 %v8243_v54  ;;  %6115 = vmatmul.mubr.bf16.gmra.mrb[56].mxu1 %v8243_v54 }
 0x2e4   : > { %v6797_v57 = vpop.eup %6796  ;;  %6802 = vrcp.f32 %v2095_v27  ;;  %2434 = vmatprep.mubr.bf16.mxu0 %v10080_v3 }
 0x2e5   : > { %v2140_v23 = vmul.f32 %v6797_v57, %v8188_v61  ;;  %v6581_v61 = vld [vmem:[%s9913_s15 + $0x8] sm:$0xff]  }
 0x2e6   : > { %v6799_v26 = vpop.eup %6798  ;;  %6124 = vmatprep.subr.bf16.mxu0 %v6581_v61 }
 0x2e7   : > { %v2141_v63 = vmul.f32 %v6799_v26, %v8197_v16  ;;  %v6582_v16 = vld [vmem:[%s9913_s15 + $0x10] sm:$0xff]   ;;  %6125 = vmatpush3.bf16.msra.mxu0 %v6581_v61 }
 0x2e8   : > { %6126 = vmatprep.subr.bf16.mxu0 %v6582_v16 }
 0x2e9   : > { %v8253_v48 = vpack.c.bf16 %v2141_v63, %v2140_v23 }
 0x2eb   : > { %10103 = vst [vmem:[#allocation65_spill] sm:$0xff] %v8253_v48  ;;  %2435 = vmatmul.mubr.bf16.gmra.mrb[56].mxu0 %v8253_v48  ;;  %6118 = vmatprep.mubr.bf16.mxu1 %v8253_v48 }
 0x2ec   : > { %v6801_v53 = vpop.eup %6800  ;;  %2444 = vmatprep.mubr.bf16.mxu0 %v10080_v3  ;;  %6127 = vmatpush3.bf16.msra.mxu0 %v6582_v16 }
 0x2ed   : > { %v2142_v13 = vmul.f32 %v6801_v53, %v8219_v47  ;;  %6128 = vmatprep.subr.bf16.mxu0 %v6583_v6  ;;  %v6585_v47 = vld [vmem:[%s9913_s15 + $0x28] sm:$0xff]  }
 0x2ee   : > { %v6803_v10 = vpop.eup %6802 }
 0x2ef   : > { %v2143_v9 = vmul.f32 %v6803_v10, %v2031_v37  ;;  %v6586_v37 = vld [vmem:[%s9913_s15 + $0x30] sm:$0xff]  }
 0x2f0   : > { %6129 = vmatpush3.bf16.msra.mxu0 %v6583_v6 }
 0x2f1   : > { %v8265_v62 = vpack.c.bf16 %v2143_v9, %v2142_v13  ;;  %6130 = vmatprep.subr.bf16.mxu0 %v6584_v4 }
 0x2f3   : > { %10104 = vst [vmem:[#allocation66_spill] sm:$0xff] %v8265_v62  ;;  %2445 = vmatmul.mubr.bf16.gmra.mrb[60].mxu0 %v8265_v62  ;;  %6119 = vmatmul.mubr.bf16.gmra.mrb[60].mxu1 %v8265_v62 }
 0x2f4   : > { %6131 = vmatpush3.bf16.msra.mxu0 %v6584_v4 }
 0x2f5   : > { %6132 = vmatprep.subr.bf16.mxu0 %v6585_v47 }
 0x2f8   : > { %6133 = vmatpush3.bf16.msra.mxu0 %v6585_v47 }
 0x2f9   : > { %6134 = vmatprep.subr.bf16.mxu0 %v6586_v37 }
 0x2fc   : > { %6135 = vmatpush3.bf16.msra.mxu0 %v6586_v37 }
 0x2fd   : > { %6136 = vmatprep.subr.bf16.mxu0 %v6587_v41 }
 0x300   : > { %6137 = vmatpush3.bf16.msra.mxu0 %v6587_v41 }
 0x301   : > { %3539 = vmatprep.subr.bf16.mxu0 %v6590_v59 }
 0x325   : > { %v2553_v55 = vpop.xlane.xlu0 %2552 }
 0x326   : > { %v8287_v10 = vmul.f32 0.0078125, %v2553_v55 }
 0x327   : > { %v2555_v25 = vpop.xlane.xlu1 %2554 }
 0x328   : > { %v8289_v13 = vmul.f32 0.0078125, %v2555_v25  ;;  %v2665_v37 = vmul.f32 %v8287_v10, %v8287_v10 }
 0x329   : > { %v2620_v32 = vpop.xlane.xlu0 %2619 }
 0x32a   : > { %v2666_v41 = vmul.f32 %v8289_v13, %v8289_v13  ;;  %v2650_v59 = vmul.f32 0.0078125, %v2620_v32 }
 0x32b   : > { %v2618_v27 = vpop.xlane.xlu1 %2617 }
 0x32c   : > { %v2649_v4 = vmul.f32 0.0078125, %v2618_v27 }
 0x32d   : > { %v2557_v12 = vpop.xlane.xlu0 %2556 }
 0x32e   : > { %v8291_v9 = vmul.f32 0.0078125, %v2557_v12  ;;  %v2681_v55 = vsub.f32 %v2649_v4, %v2665_v37  ;;  %v2682_v12 = vsub.f32 %v2650_v59, %v2666_v41 }
 0x32f   : > { %v2622_v26 = vpop.xlane.xlu1 %2621 }
 0x330   : > { %v2667_v46 = vmul.f32 %v8291_v9, %v8291_v9  ;;  %v2651_v52 = vmul.f32 0.0078125, %v2622_v26  ;;  %v2713_v51 = vadd.f32 1e-06, %v2681_v55  ;;  %v2714_v30 = vadd.f32 1e-06, %v2682_v12 }
 0x331   : > { %v2559_v0 = vpop.xlane.xlu0 %2558  ;;  %v2697_v12 = vsub.f32 %v8022_v38, %v8287_v10  ;;  %v2699_v34 = vsub.f32 %v8044_v40, %v8291_v9 }
 0x332   : > { %v8299_v50 = vmul.f32 0.0078125, %v2559_v0  ;;  %v2683_v27 = vsub.f32 %v2651_v52, %v2667_v46  ;;  %6804 = vrsqrt.f32 %v2713_v51 }
 0x333   : > { %6806 = vrsqrt.f32 %v2714_v30 }
 0x334   : > { %v2668_v49 = vmul.f32 %v8299_v50, %v8299_v50  ;;  %v2715_v29 = vadd.f32 1e-06, %v2683_v27 }
 0x335   : > { %v2624_v57 = vpop.xlane.xlu0 %2623  ;;  %v2561_v23 = vpop.xlane.xlu1 %2560 }
 0x336   : > { %v2652_v43 = vmul.f32 0.0078125, %v2624_v57  ;;  %v8305_v35 = vmul.f32 0.0078125, %v2561_v23  ;;  %6808 = vrsqrt.f32 %v2715_v29  ;;  %v2184_v57 = vld [vmem:[%s9912_s14] sm:$0x7] }
 0x337   : > { %v2761_v29 = vld [vmem:[%s9909_s11] sm:$0x1]  ;;  %v2185_v37 = vunpack.c.l.bf16 %v2184_v57  ;;  %v2698_v57 = vsub.f32 %v8027_v60, %v8289_v13 }
 0x338   : > { %v2684_v32 = vsub.f32 %v2652_v43, %v2668_v49  ;;  %v2669_v46 = vmul.f32 %v8305_v35, %v8305_v35  ;;  %v2762_v41 = vunpack.c.l.bf16 %v2761_v29 }
 0x339   : > { %v2563_v63 = vpop.xlane.xlu0 %2562  ;;  %v2626_v58 = vpop.xlane.xlu1 %2625  ;;  %v2190_v13 = vrot.slane %v2185_v37, %v10089_v24 }
 0x33a   : > { %v2653_v0 = vmul.f32 0.0078125, %v2626_v58  ;;  %v2716_v4 = vadd.f32 1e-06, %v2684_v32  ;;  %v8311_v52 = vmul.f32 0.0078125, %v2563_v63 }
 0x33c   : > { %v2685_v43 = vsub.f32 %v2653_v0, %v2669_v46  ;;  %6810 = vrsqrt.f32 %v2716_v4  ;;  %v2670_v63 = vmul.f32 %v8311_v52, %v8311_v52  ;;  %v2194_v4 = vrot.slane %v2185_v37, %v8000_v2 }
 0x33d   : > { %v2628_v53 = vpop.xlane.xlu0 %2627  ;;  %v2565_v61 = vpop.xlane.xlu1 %2564 }
 0x33e   : > { %v2654_v49 = vmul.f32 0.0078125, %v2628_v53  ;;  %v8316_v23 = vmul.f32 0.0078125, %v2565_v61  ;;  %v2717_v59 = vadd.f32 1e-06, %v2685_v43  ;;  %v6805_v61 = vpop.eup %6804 }
 0x33f   : > { %v6807_v46 = vpop.eup %6806 }
 0x340   : > { %v2686_v55 = vsub.f32 %v2654_v49, %v2670_v63  ;;  %v2671_v53 = vmul.f32 %v8316_v23, %v8316_v23  ;;  %v6809_v29 = vpop.eup %6808  ;;  %6812 = vrsqrt.f32 %v2717_v59  ;;  %v2746_v10 = vmul.f32 %v6807_v46, %v2698_v57 }
 0x341   : > { %v2567_v16 = vpop.xlane.xlu0 %2566  ;;  %v2630_v6 = vpop.xlane.xlu1 %2629 }
 0x342   : > { %v2655_v58 = vmul.f32 0.0078125, %v2630_v6  ;;  %v8331_v27 = vmul.f32 0.0078125, %v2567_v16  ;;  %v2783_v6 = vld [vmem:[%s9910_s12] sm:$0x1]  ;;  %v8346_v16 = vrot.slane %v2762_v41, %v10089_v24  ;;  %v2718_v63 = vadd.f32 1e-06, %v2686_v55 }
 0x343   : > { %v8355_v41 = vrot.slane %v2194_v4, %v10089_v24 }
 0x344   : > { %v2687_v32 = vsub.f32 %v2655_v58, %v2671_v53  ;;  %v2745_v53 = vmul.f32 %v6805_v61, %v2697_v12  ;;  %v2672_v2 = vmul.f32 %v8331_v27, %v8331_v27  ;;  %v2747_v61 = vmul.f32 %v6809_v29, %v2699_v34 }
 0x345   : > { %v2632_v47 = vpop.xlane.xlu0 %2631  ;;  %v2569_v25 = vpop.xlane.xlu1 %2568  ;;  %6814 = vrsqrt.f32 %v2718_v63  ;;  %v2768_v63 = vmul.f32 %v8346_v16, %v2746_v10  ;;  %v2702_v10 = vsub.f32 %v8078_v15, %v8311_v52 }
 0x346   : > { %v8341_v43 = vmul.f32 0.0078125, %v2569_v25  ;;  %v2656_v58 = vmul.f32 0.0078125, %v2632_v47  ;;  %v2784_v25 = vunpack.c.l.bf16 %v2783_v6  ;;  %v2719_v60 = vadd.f32 1e-06, %v2687_v32  ;;  %v6811_v9 = vpop.eup %6810 }
 0x347   : > { %v10105_v47 = vsub.s32 4, %v10087_v22  ;;  %v2767_v38 = vmul.f32 %v8346_v16, %v2745_v53  ;;  %v2700_v32 = vsub.f32 %v8056_v11, %v8299_v50 }
 0x348   : > { %v2673_v59 = vmul.f32 %v8341_v43, %v8341_v43  ;;  %v8372_v34 = vrot.slane %v2784_v25, %v10089_v24  ;;  %6816 = vrsqrt.f32 %v2719_v60 }
 0x349   : > { %v8301_v44 = vpop.xlane.xlu0 %2570  ;;  %v2634_v31 = vpop.xlane.xlu1 %2633  ;;  %v2198_v55 = vrot.slane %v2185_v37, %v10105_v47  ;;  %v2748_v53 = vmul.f32 %v6811_v9, %v2700_v32 }
 0x34a   : > { %v2657_v33 = vmul.f32 0.0078125, %v2634_v31  ;;  %v2688_v31 = vsub.f32 %v2656_v58, %v2672_v2  ;;  %v8367_v4 = vmul.f32 0.0078125, %v8301_v44  ;;  %v8375_v2 = vrot.slane %v2190_v13, %v10089_v24 }
 0x34b   : > { %v2769_v58 = vmul.f32 %v8346_v16, %v2747_v61  ;;  %v2789_v60 = vadd.f32 %v8372_v34, %v2767_v38  ;;  %v2770_v15 = vmul.f32 %v8346_v16, %v2748_v53 }
 0x34c   : > { %v2689_v46 = vsub.f32 %v2657_v33, %v2673_v59  ;;  %v8381_v33 = vrot.slane %v2198_v55, %v10089_v24  ;;  %v2720_v25 = vadd.f32 1e-06, %v2688_v31  ;;  %v6813_v55 = vpop.eup %6812  ;;  %v2790_v31 = vadd.f32 %v8372_v34, %v2768_v63 }
 0x34d   : > { %v8307_v26 = vpop.xlane.xlu0 %2635  ;;  %v8318_v51 = vpop.xlane.xlu1 %2572  ;;  %v2791_v52 = vadd.f32 %v8372_v34, %v2769_v58 }
 0x34e   : > { %v2658_v50 = vmul.f32 0.0078125, %v8307_v26  ;;  %v2674_v26 = vmul.f32 %v8367_v4, %v8367_v4  ;;  %v2721_v47 = vadd.f32 1e-06, %v2689_v46  ;;  %6818 = vrsqrt.f32 %v2720_v25 }
 0x34f   : > { %v6815_v58 = vpop.eup %6814 }
 0x350   : > { %v2690_v32 = vsub.f32 %v2658_v50, %v2674_v26  ;;  %6820 = vrsqrt.f32 %v2721_v47 }
 0x351   : > { %v8323_v30 = vpop.xlane.xlu0 %2574  ;;  %v8333_v0 = vpop.xlane.xlu1 %2637 }
 0x352   : > { %v8403_v63 = vmul.f32 0.0078125, %v8323_v30  ;;  %v2659_v53 = vmul.f32 0.0078125, %v8333_v0  ;;  %v6817_v0 = vpop.eup %6816 }
 0x354   : > { %v2676_v11 = vmul.f32 %v8403_v63, %v8403_v63 }
 0x355   : > { %v8343_v49 = vpop.xlane.xlu0 %2639  ;;  %v8361_v12 = vpop.xlane.xlu1 %2576 }
 0x359   : > { %v8369_v57 = vpop.xlane.xlu0 %2578 }
 0x38e   : > { %v2376_v6 = vpop.f32.mrb[32].mxu0 }
 0x38f   : > { %v2378_v22 = vpop.f32.mrb[33].mxu0  ;;  %v2377_v61 = vadd.f32 %v2376_v6, %v8375_v2 }
 0x390   : > { %v2379_v37 = vadd.f32 %v2378_v22, %v8355_v41  ;;  %v2380_v29 = vpop.f32.mrb[34].mxu0  ;;  %v2701_v22 = vsub.f32 %v8064_v42, %v8305_v35  ;;  %v8397_v35 = vpop.xlane.xlu0 %2643 }
 0x391   : > { %v2382_v44 = vpop.f32.mrb[35].mxu0  ;;  %v2381_v42 = vadd.f32 %v2380_v29, %v8375_v2 }
 0x392   : > { %v2805_v59 = vadd.f32 1.0, %v2379_v37  ;;  %v2383_v13 = vadd.f32 %v2382_v44, %v8355_v41  ;;  %v8395_v37 = vmul.f32 0.0078125, %v8318_v51  ;;  %v2642_v44 = vpop.xlane.xlu1 %2641  ;;  %v2749_v26 = vmul.f32 %v6813_v55, %v2701_v22 }
 0x394   : > { %v2821_v9 = vmul.f32 %v2805_v59, %v2789_v60  ;;  %v2806_v38 = vadd.f32 1.0, %v2383_v13  ;;  %v2675_v30 = vmul.f32 %v8395_v37, %v8395_v37 }
 0x396   : > { %v2837_v46 = vadd.f32 %v2821_v9, %v2377_v61  ;;  %v2822_v6 = vmul.f32 %v2806_v38, %v2790_v31  ;;  %v2386_v60 = vpop.f32.mrb[36].mxu0  ;;  %v6108_v59 = vpop.f32.mrb[48].mxu1  ;;  %v2722_v31 = vadd.f32 1e-06, %v2690_v32  ;;  %v2660_v38 = vmul.f32 0.0078125, %v8343_v49 }
 0x397   : > { %v8406_v51 = vadd.f32 %v6108_v59, %v8381_v33  ;;  %v2388_v50 = vpop.f32.mrb[37].mxu0  ;;  %v2489_v13 = vpop.f32.mrb[49].mxu1  ;;  %v2703_v32 = vsub.f32 %v8088_v5, %v8316_v23  ;;  %v2792_v49 = vadd.f32 %v8372_v34, %v2770_v15  ;;  %v2387_v40 = vadd.f32 %v2386_v60, %v8375_v2 }
 0x398   : > { %v2838_v25 = vadd.f32 %v2822_v6, %v2381_v42  ;;  %v2389_v61 = vadd.f32 %v2388_v50, %v8355_v41  ;;  %v8411_v29 = vadd.f32 %v2489_v13, %v8381_v33  ;;  %v2390_v9 = vpop.f32.mrb[38].mxu0  ;;  %v6109_v47 = vpop.f32.mrb[50].mxu1  ;;  %6822 = vrsqrt.f32 %v2722_v31 }
 0x399   : > { %v8417_v59 = vadd.f32 %v6109_v47, %v8381_v33  ;;  %v2392_v22 = vpop.f32.mrb[39].mxu0  ;;  %v2492_v55 = vpop.f32.mrb[51].mxu1  ;;  %v2750_v47 = vmul.f32 %v6815_v58, %v2702_v10  ;;  %v2692_v23 = vsub.f32 %v2660_v38, %v2676_v11  ;;  %v2704_v60 = vsub.f32 %v8102_v45, %v8331_v27 }
 0x39a   : > { %10106 = vst [vmem:[#allocation67_spill] sm:$0xff] %v8411_v29  ;;  %v2807_v42 = vadd.f32 1.0, %v2389_v61  ;;  %v2393_v6 = vadd.f32 %v2392_v22, %v8355_v41  ;;  %v8421_v50 = vadd.f32 %v2492_v55, %v8381_v33  ;;  %v2853_v13 = vpack.c.bf16 %v2838_v25, %v2837_v46  ;;  %v2581_v55 = vpop.xlane.xlu1 %2580 }
 0x39b   : > { %10107 = vst [vmem:[#allocation68_spill] sm:$0xff] %v8417_v59  ;;  %v2691_v59 = vsub.f32 %v2659_v53, %v2675_v30  ;;  %v8430_v22 = vmul.f32 0.0078125, %v8361_v12  ;;  %v2771_v46 = vmul.f32 %v8346_v16, %v2749_v26  ;;  %v2751_v25 = vmul.f32 %v6817_v0, %v2703_v32  ;;  %v2583_v53 = vpop.xlane.xlu0 %2582  ;;  %v6819_v26 = vpop.eup %6818  ;;  %v6593_v32 = vld [vmem:[%s9911_s13 + $0xdc] ss:$12 sps:$4 sm:$0xff]  }
 0x39c   : > { %10108 = vst [vmem:[#allocation69_spill] sm:$0xff] %v8421_v50  ;;  %v2823_v29 = vmul.f32 %v2807_v42, %v2791_v52  ;;  %v2808_v61 = vadd.f32 1.0, %v2393_v6  ;;  %6138 = vmatprep.mubr.bf16.mxu0 %v2853_v13  ;;  %v2391_v50 = vadd.f32 %v2390_v9, %v8375_v2  ;;  %v8437_v52 = vmul.f32 0.0078125, %v8369_v57  ;;  %v6821_v38 = vpop.eup %6820 }
 0x39d   : > { %v2661_v58 = vmul.f32 0.0078125, %v2642_v44  ;;  %v2772_v31 = vmul.f32 %v8346_v16, %v2750_v47  ;;  %v2705_v11 = vsub.f32 %v8114_v39, %v8341_v43  ;;  %v2677_v27 = vmul.f32 %v8430_v22, %v8430_v22  ;;  %v6588_v43 = vld [vmem:[%s9911_s13 + $0xc0] ss:$12 sps:$4 sm:$0xff]  }
 0x39e   : > { %v2839_v5 = vadd.f32 %v2823_v29, %v2387_v40  ;;  %v2824_v15 = vmul.f32 %v2808_v61, %v2792_v49  ;;  %v2396_v10 = vpop.f32.mrb[40].mxu0  ;;  %v2723_v40 = vadd.f32 1e-06, %v2691_v59  ;;  %v2662_v57 = vmul.f32 0.0078125, %v8397_v35 }
 0x39f   : > { %v2398_v12 = vpop.f32.mrb[41].mxu0  ;;  %v2793_v44 = vadd.f32 %v8372_v34, %v2771_v46  ;;  %v2773_v42 = vmul.f32 %v8346_v16, %v2751_v25  ;;  %v2724_v59 = vadd.f32 1e-06, %v2692_v23  ;;  %v2678_v35 = vmul.f32 %v8437_v52, %v8437_v52 }
 0x3a0   : > { %v2840_v29 = vadd.f32 %v2824_v15, %v2391_v50  ;;  %v2399_v9 = vadd.f32 %v2398_v12, %v8355_v41  ;;  %v2400_v30 = vpop.f32.mrb[42].mxu0  ;;  %v2693_v49 = vsub.f32 %v2661_v58, %v2677_v27  ;;  %v2794_v47 = vadd.f32 %v8372_v34, %v2772_v31 }
 0x3a1   : > { %v2402_v0 = vpop.f32.mrb[43].mxu0  ;;  %v2752_v61 = vmul.f32 %v6819_v26, %v2704_v60  ;;  %6824 = vrsqrt.f32 %v2723_v40  ;;  %v2397_v46 = vadd.f32 %v2396_v10, %v8375_v2  ;;  %v2694_v15 = vsub.f32 %v2662_v57, %v2678_v35  ;;  %v6591_v60 = vld [vmem:[%s9911_s13 + $0xd8] ss:$12 sps:$4 sm:$0xff]  }
 0x3a2   : > { %v2854_v6 = vpack.c.bf16 %v2840_v29, %v2839_v5  ;;  %v2809_v50 = vadd.f32 1.0, %v2399_v9  ;;  %v2403_v13 = vadd.f32 %v2402_v0, %v8355_v41  ;;  %v2706_v5 = vsub.f32 %v8130_v14, %v8367_v4  ;;  %v2646_v29 = vpop.xlane.xlu1 %2645  ;;  %v2648_v9 = vpop.xlane.xlu0 %2647  ;;  %v6596_v4 = vld [vmem:[%s9911_s13 + $0xf4] ss:$12 sps:$4 sm:$0xff]  }
 0x3a3   : > { %v8461_v12 = vmul.f32 0.0078125, %v2581_v55  ;;  %v2795_v0 = vadd.f32 %v8372_v34, %v2773_v42  ;;  %6826 = vrsqrt.f32 %v2724_v59  ;;  %v2401_v58 = vadd.f32 %v2400_v30, %v8375_v2  ;;  %v6823_v55 = vpop.eup %6822 }
 0x3a4   : > { %v2825_v25 = vmul.f32 %v2809_v50, %v2793_v44  ;;  %v2810_v23 = vadd.f32 1.0, %v2403_v13  ;;  %6139 = vmatmul.mubr.bf16.vlgmr.msra.gmra.mrb[64].mxu0 %v2854_v6  ;;  %v2725_v27 = vadd.f32 1e-06, %v2693_v49  ;;  %v2753_v59 = vmul.f32 %v6821_v38, %v2705_v11  ;;  %v6594_v49 = vld [vmem:[%s9911_s13 + $0xf0] ss:$12 sps:$4 sm:$0xff]  }
 0x3a5   : > { %3540 = vmatpush1.bf16.msra.mxu0 %v6588_v43  ;;  %v2774_v43 = vmul.f32 %v8346_v16, %v2752_v61  ;;  %v2663_v6 = vmul.f32 0.0078125, %v2646_v29 }
 0x3a6   : > { %v2841_v10 = vadd.f32 %v2825_v25, %v2397_v46  ;;  %v2826_v31 = vmul.f32 %v2810_v23, %v2794_v47  ;;  %v2406_v26 = vpop.f32.mrb[44].mxu0  ;;  %v6112_v40 = vpop.f32.mrb[52].mxu1  ;;  %3541 = vmatprep.subr.bf16.mxu0 %v6593_v32  ;;  %v2726_v47 = vadd.f32 1e-06, %v2694_v15  ;;  %v2679_v46 = vmul.f32 %v8461_v12, %v8461_v12  ;;  %v6599_v15 = vld [vmem:[%s9911_s13 + $0x10c] ss:$12 sps:$4 sm:$0xff]  }
 0x3a7   : > { %v8472_v57 = vadd.f32 %v6112_v40, %v8381_v33  ;;  %v2408_v44 = vpop.f32.mrb[45].mxu0  ;;  %v2505_v42 = vpop.f32.mrb[53].mxu1  ;;  %v8484_v25 = vmul.f32 0.0078125, %v2583_v53  ;;  %6828 = vrsqrt.f32 %v2725_v27  ;;  %v2664_v53 = vmul.f32 0.0078125, %v2648_v9 }
 0x3a8   : > { %v2842_v30 = vadd.f32 %v2826_v31, %v2401_v58  ;;  %v2409_v50 = vadd.f32 %v2408_v44, %v8355_v41  ;;  %v8477_v13 = vadd.f32 %v2505_v42, %v8381_v33  ;;  %v2410_v32 = vpop.f32.mrb[46].mxu0  ;;  %v6113_v35 = vpop.f32.mrb[54].mxu1  ;;  %v2796_v40 = vadd.f32 %v8372_v34, %v2774_v43 }
 0x3a9   : > { %v8487_v11 = vadd.f32 %v6113_v35, %v8381_v33  ;;  %v2412_v38 = vpop.f32.mrb[47].mxu0  ;;  %v2508_v61 = vpop.f32.mrb[55].mxu1  ;;  %3542 = vmatpush1.bf16.msra.mxu0 %v6591_v60  ;;  %v2754_v44 = vmul.f32 %v6823_v55, %v2706_v5  ;;  %v2695_v42 = vsub.f32 %v2663_v6, %v2679_v46  ;;  %v2407_v60 = vadd.f32 %v2406_v26, %v8375_v2 }
 0x3aa   : > { %v2811_v23 = vadd.f32 1.0, %v2409_v50  ;;  %v2413_v29 = vadd.f32 %v2412_v38, %v8355_v41  ;;  %v8491_v58 = vadd.f32 %v2508_v61, %v8381_v33  ;;  %v2855_v31 = vpack.c.bf16 %v2842_v30, %v2841_v10  ;;  %3543 = vmatprep.subr.bf16.mxu0 %v6596_v4  ;;  %v6597_v4 = vld [vmem:[%s9911_s13 + $0x108] ss:$12 sps:$4 sm:$0xff]  }
 0x3ab   : > { %v2680_v38 = vmul.f32 %v8484_v25, %v8484_v25  ;;  %v2775_v10 = vmul.f32 %v8346_v16, %v2753_v59  ;;  %v6825_v9 = vpop.eup %6824  ;;  %6830 = vrsqrt.f32 %v2726_v47  ;;  %v2411_v5 = vadd.f32 %v2410_v32, %v8375_v2 }
 0x3ac   : > { %v2827_v50 = vmul.f32 %v2811_v23, %v2795_v0  ;;  %v2812_v35 = vadd.f32 1.0, %v2413_v29  ;;  %6142 = vmatprep.mubr.bf16.mxu0 %v2855_v31  ;;  %v6602_v0 = vld [vmem:[%s9911_s13 + $0x124] ss:$12 sps:$4 sm:$0xff]   ;;  %v2707_v43 = vsub.f32 %v8145_v8, %v8395_v37  ;;  %v2776_v30 = vmul.f32 %v8346_v16, %v2754_v44  ;;  %v6600_v37 = vld [vmem:[%s9911_s13 + $0x120] ss:$12 sps:$4 sm:$0xff]  }
 0x3ad   : > { %3544 = vmatpush1.bf16.msra.mxu0 %v6594_v49  ;;  %v2696_v59 = vsub.f32 %v2664_v53, %v2680_v38  ;;  %v6827_v49 = vpop.eup %6826  ;;  %v2727_v46 = vadd.f32 1e-06, %v2695_v42  ;;  %v2708_v23 = vsub.f32 %v8161_v19, %v8403_v63  ;;  %v6605_v42 = vld [vmem:[%s9911_s13 + $0x13c] ss:$12 sps:$4 sm:$0xff]  }
 0x3ae   : > { %v2843_v27 = vadd.f32 %v2827_v50, %v2407_v60  ;;  %v2828_v55 = vmul.f32 %v2812_v35, %v2796_v40  ;;  %v2416_v26 = vpop.f32.mrb[48].mxu0  ;;  %3545 = vmatprep.subr.bf16.mxu0 %v6599_v15  ;;  %v2755_v31 = vmul.f32 %v6825_v9, %v2707_v43  ;;  %v2797_v15 = vadd.f32 %v8372_v34, %v2775_v10 }
 0x3af   : > { %v2418_v6 = vpop.f32.mrb[49].mxu0  ;;  %v2728_v60 = vadd.f32 1e-06, %v2696_v59  ;;  %v2798_v63 = vadd.f32 %v8372_v34, %v2776_v30  ;;  %v2756_v50 = vmul.f32 %v6827_v49, %v2708_v23  ;;  %6832 = vrsqrt.f32 %v2727_v46 }
 0x3b0   : > { %v2844_v47 = vadd.f32 %v2828_v55, %v2411_v5  ;;  %v2419_v61 = vadd.f32 %v2418_v6, %v8355_v41  ;;  %v2420_v32 = vpop.f32.mrb[50].mxu0  ;;  %v2417_v35 = vadd.f32 %v2416_v26, %v8375_v2  ;;  %v2777_v9 = vmul.f32 %v8346_v16, %v2755_v31  ;;  %v6608_v26 = vld [vmem:[%s9911_s13 + $0x154] ss:$12 sps:$4 sm:$0xff]  }
 0x3b1   : > { %v2422_v29 = vpop.f32.mrb[51].mxu0  ;;  %3546 = vmatpush1.bf16.msra.mxu0 %v6597_v4  ;;  %v6829_v10 = vpop.eup %6828  ;;  %v2421_v55 = vadd.f32 %v2420_v32, %v8375_v2  ;;  %v2709_v6 = vsub.f32 %v8176_v28, %v8430_v22  ;;  %6834 = vrsqrt.f32 %v2728_v60  ;;  %v2710_v22 = vsub.f32 %v8192_v36, %v8437_v52  ;;  %v6606_v60 = vld [vmem:[%s9911_s13 + $0x150] ss:$12 sps:$4 sm:$0xff]  }
 0x3b2   : > { %v2813_v53 = vadd.f32 1.0, %v2419_v61  ;;  %v2423_v40 = vadd.f32 %v2422_v29, %v8355_v41  ;;  %v2856_v44 = vpack.c.bf16 %v2844_v47, %v2843_v27  ;;  %3547 = vmatprep.subr.bf16.mxu0 %v6602_v0  ;;  %v6603_v27 = vld [vmem:[%s9911_s13 + $0x138] ss:$12 sps:$4 sm:$0xff]  }
 0x3b4   : > { %v2829_v38 = vmul.f32 %v2813_v53, %v2797_v15  ;;  %v2814_v4 = vadd.f32 1.0, %v2423_v40  ;;  %6143 = vmatmul.mubr.bf16.gmra.mrb[68].mxu0 %v2856_v44  ;;  %v2799_v15 = vadd.f32 %v8372_v34, %v2777_v9 }
 0x3b5   : > { %3548 = vmatpush1.bf16.msra.mxu0 %v6600_v37  ;;  %v6831_v47 = vpop.eup %6830  ;;  %v2778_v37 = vmul.f32 %v8346_v16, %v2756_v50 }
 0x3b6   : > { %v2845_v5 = vadd.f32 %v2829_v38, %v2417_v35  ;;  %v2830_v0 = vmul.f32 %v2814_v4, %v2798_v63  ;;  %v2426_v43 = vpop.f32.mrb[52].mxu0  ;;  %v6116_v59 = vpop.f32.mrb[56].mxu1  ;;  %3549 = vmatprep.subr.bf16.mxu0 %v6605_v42  ;;  %v2757_v42 = vmul.f32 %v6829_v10, %v2709_v6  ;;  %v6611_v38 = vld [vmem:[%s9911_s13 + $0x16c] ss:$12 sps:$4 sm:$0xff]   ;;  %v2758_v4 = vmul.f32 %v6831_v47, %v2710_v22 }
 0x3b7   : > { %v8535_v30 = vadd.f32 %v6116_v59, %v8381_v33  ;;  %v2428_v49 = vpop.f32.mrb[53].mxu0  ;;  %v2521_v46 = vpop.f32.mrb[57].mxu1  ;;  %v2427_v10 = vadd.f32 %v2426_v43, %v8375_v2  ;;  %v2711_v43 = vsub.f32 %v8207_v21, %v8461_v12 }
 0x3b8   : > { %v2846_v61 = vadd.f32 %v2830_v0, %v2421_v55  ;;  %v2429_v32 = vadd.f32 %v2428_v49, %v8355_v41  ;;  %v8539_v23 = vadd.f32 %v2521_v46, %v8381_v33  ;;  %v2430_v29 = vpop.f32.mrb[54].mxu0  ;;  %v6117_v31 = vpop.f32.mrb[58].mxu1  ;;  %v6609_v0 = vld [vmem:[%s9911_s13 + $0x168] ss:$12 sps:$4 sm:$0xff]   ;;  %v2779_v46 = vmul.f32 %v8346_v16, %v2757_v42 }
 0x3b9   : > { %v8546_v53 = vadd.f32 %v6117_v31, %v8381_v33  ;;  %v2432_v40 = vpop.f32.mrb[55].mxu0  ;;  %v2524_v44 = vpop.f32.mrb[59].mxu1  ;;  %3550 = vmatpush1.bf16.msra.mxu0 %v6603_v27  ;;  %v2800_v27 = vadd.f32 %v8372_v34, %v2778_v37 }
 0x3ba   : > { %v2815_v63 = vadd.f32 1.0, %v2429_v32  ;;  %v2433_v35 = vadd.f32 %v2432_v40, %v8355_v41  ;;  %v8553_v50 = vadd.f32 %v2524_v44, %v8381_v33  ;;  %v2857_v52 = vpack.c.bf16 %v2846_v61, %v2845_v5  ;;  %3551 = vmatprep.subr.bf16.mxu0 %v6608_v26  ;;  %v6833_v59 = vpop.eup %6832 }
 0x3bb   : > { %v2431_v26 = vadd.f32 %v2430_v29, %v8375_v2  ;;  %v2780_v61 = vmul.f32 %v8346_v16, %v2758_v4  ;;  %v6835_v22 = vpop.eup %6834  ;;  %v2759_v40 = vmul.f32 %v6833_v59, %v2711_v43  ;;  %v2801_v44 = vadd.f32 %v8372_v34, %v2779_v46 }
 0x3bc   : > { %v2831_v9 = vmul.f32 %v2815_v63, %v2799_v15  ;;  %v2816_v55 = vadd.f32 1.0, %v2433_v35  ;;  %6146 = vmatprep.mubr.bf16.mxu0 %v2857_v52  ;;  %v2712_v15 = vsub.f32 %v8223_v20, %v8484_v25 }
 0x3bd   : > { %3552 = vmatpush1.bf16.msra.mxu0 %v6606_v60  ;;  %v2802_v63 = vadd.f32 %v8372_v34, %v2780_v61 }
 0x3be   : > { %v2847_v5 = vadd.f32 %v2831_v9, %v2427_v10  ;;  %v2832_v6 = vmul.f32 %v2816_v55, %v2800_v27  ;;  %v2436_v49 = vpop.f32.mrb[56].mxu0  ;;  %3553 = vmatprep.subr.bf16.mxu0 %v6611_v38  ;;  %v2760_v4 = vmul.f32 %v6835_v22, %v2712_v15  ;;  %v2781_v10 = vmul.f32 %v8346_v16, %v2759_v40 }
 0x3bf   : > { %v2438_v47 = vpop.f32.mrb[57].mxu0  ;;  %v2437_v35 = vadd.f32 %v2436_v49, %v8375_v2 }
 0x3c0   : > { %v2848_v32 = vadd.f32 %v2832_v6, %v2431_v26  ;;  %v2439_v31 = vadd.f32 %v2438_v47, %v8355_v41  ;;  %v2440_v37 = vpop.f32.mrb[58].mxu0  ;;  %v2782_v61 = vmul.f32 %v8346_v16, %v2760_v4 }
 0x3c1   : > { %v2442_v29 = vpop.f32.mrb[59].mxu0  ;;  %3554 = vmatpush1.bf16.msra.mxu0 %v6609_v0  ;;  %v2441_v9 = vadd.f32 %v2440_v37, %v8375_v2 }
 0x3c2   : > { %v2817_v42 = vadd.f32 1.0, %v2439_v31  ;;  %v2443_v60 = vadd.f32 %v2442_v29, %v8355_v41  ;;  %v2858_v12 = vpack.c.bf16 %v2848_v32, %v2847_v5  ;;  %v2803_v32 = vadd.f32 %v8372_v34, %v2781_v10  ;;  %v6616_v10 = vld [vmem:[%s9915_s17 + $0x20] sm:$0xff]  }
 0x3c4   : > { %v2833_v52 = vmul.f32 %v2817_v42, %v2801_v44  ;;  %v2818_v38 = vadd.f32 1.0, %v2443_v60  ;;  %6147 = vmatmul.mubr.bf16.gmra.mrb[72].mxu0 %v2858_v12  ;;  %v2804_v12 = vadd.f32 %v8372_v34, %v2782_v61  ;;  %v6613_v34 = vld [vmem:[%s9915_s17 + $0x8] sm:$0xff]  }
 0x3c6   : > { %v2849_v25 = vadd.f32 %v2833_v52, %v2437_v35  ;;  %v2834_v27 = vmul.f32 %v2818_v38, %v2802_v63  ;;  %v2446_v55 = vpop.f32.mrb[60].mxu0  ;;  %v6120_v0 = vpop.f32.mrb[60].mxu1 }
 0x3c7   : > { %v8578_v59 = vadd.f32 %v6120_v0, %v8381_v33  ;;  %v2448_v5 = vpop.f32.mrb[61].mxu0  ;;  %v2537_v26 = vpop.f32.mrb[61].mxu1  ;;  %v2447_v42 = vadd.f32 %v2446_v55, %v8375_v2  ;;  %v8639_v55 = vld [vmem:[%s9911_s13 + $0xc8] ss:$12 sps:$4 sm:$0xff]   ;;  %v2877_v0 = vld [vmem:[%s9914_s16] sm:$0x1] }
 0x3c8   : > { %v2850_v6 = vadd.f32 %v2834_v27, %v2441_v9  ;;  %v2449_v49 = vadd.f32 %v2448_v5, %v8355_v41  ;;  %v8582_v46 = vadd.f32 %v2537_v26, %v8381_v33  ;;  %v2450_v43 = vpop.f32.mrb[62].mxu0  ;;  %v6121_v47 = vpop.f32.mrb[62].mxu1  ;;  %v6618_v9 = vld [vmem:[%s9915_s17 + $0x30] sm:$0xff]   ;;  %v6619_v27 = vld [vmem:[%s9915_s17 + $0x38] sm:$0xff]   ;;  %v2878_v5 = vunpack.c.l.bf16 %v2877_v0 }
 0x3c9   : > { %v8587_v31 = vadd.f32 %v6121_v47, %v8381_v33  ;;  %v2452_v37 = vpop.f32.mrb[63].mxu0  ;;  %v2540_v22 = vpop.f32.mrb[63].mxu1  ;;  %v2451_v35 = vadd.f32 %v2450_v43, %v8375_v2  ;;  %v6614_v2 = vld [vmem:[%s9915_s17 + $0x10] sm:$0xff]  }
 0x3ca   : > { %v2819_v15 = vadd.f32 1.0, %v2449_v49  ;;  %v2453_v29 = vadd.f32 %v2452_v37, %v8355_v41  ;;  %v8591_v40 = vadd.f32 %v2540_v22, %v8381_v33  ;;  %v2859_v44 = vpack.c.bf16 %v2850_v6, %v2849_v25  ;;  %v6612_v41 = vld [vmem:[%s9915_s17] sm:$0xff]   ;;  %v6615_v33 = vld [vmem:[%s9915_s17 + $0x18] sm:$0xff]   ;;  %v6617_v25 = vld [vmem:[%s9915_s17 + $0x28] sm:$0xff]  }
 0x3cb   : > { %6154 = vmatprep.subr.bf16.mxu1 %v6612_v41  ;;  %v8646_v26 = vrot.slane %v2878_v5, %v10089_v24 }
 0x3cc   : > { %v2835_v60 = vmul.f32 %v2819_v15, %v2803_v32  ;;  %v2820_v16 = vadd.f32 1.0, %v2453_v29  ;;  %6150 = vmatprep.mubr.bf16.mxu0 %v2859_v44  ;;  %6155 = vmatpush3.bf16.msra.mxu1 %v6612_v41 }
 0x3cd   : > { %6156 = vmatprep.subr.bf16.mxu1 %v6613_v34 }
 0x3ce   : > { %v2851_v63 = vadd.f32 %v2835_v60, %v2447_v42  ;;  %v2836_v52 = vmul.f32 %v2820_v16, %v2804_v12 }
 0x3d0   : > { %v2852_v38 = vadd.f32 %v2836_v52, %v2451_v35  ;;  %6157 = vmatpush3.bf16.msra.mxu1 %v6613_v34 }
 0x3d1   : > { %6158 = vmatprep.subr.bf16.mxu1 %v6614_v2 }
 0x3d2   : > { %v2860_v4 = vpack.c.bf16 %v2852_v38, %v2851_v63 }
 0x3d4   : > { %6151 = vmatmul.mubr.bf16.gmra.mrb[76].mxu0 %v2860_v4  ;;  %6159 = vmatpush3.bf16.msra.mxu1 %v6614_v2 }
 0x3d5   : > { %3571 = vmatprep.mubr.bf16.mxu0 %v10080_v3  ;;  %6160 = vmatprep.subr.bf16.mxu1 %v6615_v33 }
 0x3d8   : > { %6161 = vmatpush3.bf16.msra.mxu1 %v6615_v33 }
 0x3d9   : > { %6162 = vmatprep.subr.bf16.mxu1 %v6616_v10 }
 0x3dc   : > { %3572 = vmatmul.mubr.bf16.vlgmr.msra.gmra.mrb[80].mxu0 %v8124_v56  ;;  %6163 = vmatpush3.bf16.msra.mxu1 %v6616_v10 }
 0x3dd   : > { %3581 = vmatprep.mubr.bf16.mxu0 %v10080_v3  ;;  %6164 = vmatprep.subr.bf16.mxu1 %v6617_v25 }
 0x3e0   : > { %6165 = vmatpush3.bf16.msra.mxu1 %v6617_v25 }
 0x3e1   : > { %6166 = vmatprep.subr.bf16.mxu1 %v6618_v9 }
 0x3e4   : > { %3582 = vmatmul.mubr.bf16.gmra.mrb[84].mxu0 %v8155_v1  ;;  %6167 = vmatpush3.bf16.msra.mxu1 %v6618_v9 }
 0x3e5   : > { %3591 = vmatprep.mubr.bf16.mxu0 %v10080_v3  ;;  %6168 = vmatprep.subr.bf16.mxu1 %v6619_v27 }
 0x3e8   : > { %6169 = vmatpush3.bf16.msra.mxu1 %v6619_v27 }
 0x3e9   : > { %6186 = vmatprep.subr.bf16.mxu1 %v8639_v55 }
 0x3ec   : > { %3592 = vmatmul.mubr.bf16.gmra.mrb[88].mxu0 %v8186_v17 }
 0x3ed   : > { %3601 = vmatprep.mubr.bf16.mxu0 %v10080_v3 }
 0x3f4   : > { %3602 = vmatmul.mubr.bf16.gmra.mrb[92].mxu0 %v8217_v7 }
 0x3f5   : > { %3611 = vmatprep.mubr.bf16.mxu0 %v10080_v3 }
 0x3fc   : > { %3612 = vmatmul.mubr.bf16.gmra.mrb[96].mxu0 %v8236_v18 }
 0x3fd   : > { %3621 = vmatprep.mubr.bf16.mxu0 %v10080_v3 }
 0x404   : > { %3622 = vmatmul.mubr.bf16.gmra.mrb[100].mxu0 %v8243_v54 }
 0x405   : > { %3631 = vmatprep.mubr.bf16.mxu0 %v10080_v3 }
 0x40c   : > { %3632 = vmatmul.mubr.bf16.gmra.mrb[104].mxu0 %v8253_v48 }
 0x40d   : > { %3641 = vmatprep.mubr.bf16.mxu0 %v10080_v3 }
 0x414   : > { %3642 = vmatmul.mubr.bf16.gmra.mrb[108].mxu0 %v8265_v62 }
 0x477   : > { %v6140_v6 = vpop.f32.mrb[64].mxu0 }
 0x478   : > { %v2974_v49 = vadd.f32 %v6140_v6, %v8646_v26  ;;  %v2965_v43 = vpop.f32.mrb[65].mxu0 }
 0x479   : > { %v2966_v47 = vadd.f32 %v2965_v43, %v8646_v26  ;;  %v6141_v61 = vpop.f32.mrb[66].mxu0 }
 0x47a   : > { %v5657_v32 = vmul.f32 -1.442695, %v2974_v49  ;;  %v2977_v37 = vadd.f32 %v6141_v61, %v8646_v26  ;;  %v2968_v22 = vpop.f32.mrb[67].mxu0 }
 0x47b   : > { %v5655_v15 = vmul.f32 -1.442695, %v2966_v47  ;;  %v2969_v29 = vadd.f32 %v2968_v22, %v8646_v26 }
 0x47c   : > { %6836 = vpow2.f32 %v5657_v32  ;;  %v5658_v44 = vmul.f32 -1.442695, %v2977_v37 }
 0x47d   : > { %6838 = vpow2.f32 %v5655_v15  ;;  %v5656_v42 = vmul.f32 -1.442695, %v2969_v29 }
 0x47e   : > { %6840 = vpow2.f32 %v5658_v44 }
 0x47f   : > { %6842 = vpow2.f32 %v5656_v42 }
 0x486   : > { %v6837_v60 = vpop.eup %6836 }
 0x487   : > { %v6839_v12 = vpop.eup %6838  ;;  %v3078_v16 = vadd.f32 1.0, %v6837_v60  ;;  %v6144_v63 = vpop.f32.mrb[68].mxu0 }
 0x488   : > { %v6841_v35 = vpop.eup %6840  ;;  %v3076_v52 = vadd.f32 1.0, %v6839_v12  ;;  %v8653_v38 = vadd.f32 %v6144_v63, %v8646_v26  ;;  %v2981_v4 = vpop.f32.mrb[69].mxu0 }
 0x489   : > { %v6843_v41 = vpop.eup %6842  ;;  %6844 = vrcp.f32 %v3078_v16  ;;  %v3079_v34 = vadd.f32 1.0, %v6841_v35  ;;  %v8656_v2 = vadd.f32 %v2981_v4, %v8646_v26  ;;  %v6145_v33 = vpop.f32.mrb[70].mxu0 }
 0x48a   : > { %6846 = vrcp.f32 %v3076_v52  ;;  %v3077_v10 = vadd.f32 1.0, %v6843_v41  ;;  %v5661_v25 = vmul.f32 -1.442695, %v8653_v38  ;;  %v8660_v9 = vadd.f32 %v6145_v33, %v8646_v26  ;;  %v2984_v27 = vpop.f32.mrb[71].mxu0 }
 0x48b   : > { %6848 = vrcp.f32 %v3079_v34  ;;  %v5659_v0 = vmul.f32 -1.442695, %v8656_v2  ;;  %v8664_v5 = vadd.f32 %v2984_v27, %v8646_v26 }
 0x48c   : > { %6850 = vrcp.f32 %v3077_v10  ;;  %v5662_v6 = vmul.f32 -1.442695, %v8660_v9 }
 0x48d   : > { %6852 = vpow2.f32 %v5661_v25  ;;  %v5660_v43 = vmul.f32 -1.442695, %v8664_v5 }
 0x48e   : > { %6854 = vpow2.f32 %v5659_v0 }
 0x48f   : > { %6856 = vpow2.f32 %v5662_v6 }
 0x490   : > { %6858 = vpow2.f32 %v5660_v43  ;;  %v6621_v43 = vld [vmem:[%s9911_s13 + $0xe0] ss:$12 sps:$4 sm:$0xff]  }
 0x493   : > { %v6845_v61 = vpop.eup %6844 }
 0x494   : > { %v6847_v32 = vpop.eup %6846  ;;  %v3126_v44 = vmul.f32 %v6845_v61, %v2974_v49 }
 0x495   : > { %v6849_v22 = vpop.eup %6848  ;;  %v3124_v12 = vmul.f32 %v6847_v32, %v2966_v47 }
 0x496   : > { %v6851_v15 = vpop.eup %6850  ;;  %v3127_v42 = vmul.f32 %v6849_v22, %v2977_v37 }
 0x497   : > { %v6853_v60 = vpop.eup %6852  ;;  %v3125_v16 = vmul.f32 %v6851_v15, %v2969_v29  ;;  %v6148_v63 = vpop.f32.mrb[72].mxu0 }
 0x498   : > { %v6855_v35 = vpop.eup %6854  ;;  %v3141_v52 = vpack.c.bf16 %v3127_v42, %v3126_v44  ;;  %v3082_v4 = vadd.f32 1.0, %v6853_v60  ;;  %v8669_v41 = vadd.f32 %v6148_v63, %v8646_v26  ;;  %v2997_v34 = vpop.f32.mrb[73].mxu0  ;;  %v6622_v42 = vld [vmem:[%s9911_s13 + $0xf8] ss:$12 sps:$4 sm:$0xff]   ;;  %v6623_v60 = vld [vmem:[%s9911_s13 + $0x110] ss:$12 sps:$4 sm:$0xff]  }
 0x499   : > { %v6857_v33 = vpop.eup %6856  ;;  %v3080_v10 = vadd.f32 1.0, %v6855_v35  ;;  %v8672_v25 = vadd.f32 %v2997_v34, %v8646_v26  ;;  %v6149_v27 = vpop.f32.mrb[74].mxu0  ;;  %v3140_v0 = vpack.c.bf16 %v3125_v16, %v3124_v12 }
 0x49a   : > { %v6859_v49 = vpop.eup %6858  ;;  %6860 = vrcp.f32 %v3082_v4  ;;  %v3083_v37 = vadd.f32 1.0, %v6857_v33  ;;  %v5665_v47 = vmul.f32 -1.442695, %v8669_v41  ;;  %v8676_v29 = vadd.f32 %v6149_v27, %v8646_v26  ;;  %v3000_v6 = vpop.f32.mrb[75].mxu0 }
 0x49b   : > { %6862 = vrcp.f32 %v3080_v10  ;;  %v3081_v61 = vadd.f32 1.0, %v6859_v49  ;;  %v5663_v32 = vmul.f32 -1.442695, %v8672_v25  ;;  %v8683_v22 = vadd.f32 %v3000_v6, %v8646_v26  ;;  %6170 = vmatprep.mubr.bf16.mxu1 %v3140_v0 }
 0x49c   : > { %6864 = vrcp.f32 %v3083_v37  ;;  %v5666_v15 = vmul.f32 -1.442695, %v8676_v29  ;;  %6171 = vmatmul.mubr.bf16.vlgmr.msra.gmra.mrb[64].mxu1 %v3141_v52 }
 0x49d   : > { %6866 = vrcp.f32 %v3081_v61  ;;  %v5664_v44 = vmul.f32 -1.442695, %v8683_v22  ;;  %6187 = vmatpush3.bf16.msra.mxu1 %v8639_v55  ;;  %v6624_v55 = vld [vmem:[%s9911_s13 + $0x128] ss:$12 sps:$4 sm:$0xff]  }
 0x49e   : > { %6868 = vpow2.f32 %v5665_v47  ;;  %6188 = vmatprep.subr.bf16.mxu1 %v6621_v43 }
 0x49f   : > { %6870 = vpow2.f32 %v5663_v32 }
 0x4a0   : > { %6872 = vpow2.f32 %v5666_v15 }
 0x4a1   : > { %6874 = vpow2.f32 %v5664_v44  ;;  %6189 = vmatpush3.bf16.msra.mxu1 %v6621_v43 }
 0x4a2   : > { %6190 = vmatprep.subr.bf16.mxu1 %v6622_v42 }
 0x4a4   : > { %v6861_v12 = vpop.eup %6860 }
 0x4a5   : > { %v6863_v16 = vpop.eup %6862  ;;  %6191 = vmatpush3.bf16.msra.mxu1 %v6622_v42  ;;  %v3130_v52 = vmul.f32 %v6861_v12, %v8653_v38 }
 0x4a6   : > { %v6865_v63 = vpop.eup %6864  ;;  %6192 = vmatprep.subr.bf16.mxu1 %v6623_v60  ;;  %v3128_v10 = vmul.f32 %v6863_v16, %v8656_v2 }
 0x4a7   : > { %v6867_v35 = vpop.eup %6866  ;;  %v3131_v4 = vmul.f32 %v6865_v63, %v8660_v9  ;;  %v6152_v34 = vpop.f32.mrb[76].mxu0 }
 0x4a8   : > { %v6869_v33 = vpop.eup %6868  ;;  %v3129_v27 = vmul.f32 %v6867_v35, %v8664_v5  ;;  %v8702_v0 = vadd.f32 %v6152_v34, %v8646_v26  ;;  %v3013_v49 = vpop.f32.mrb[77].mxu0 }
 0x4a9   : > { %v6871_v37 = vpop.eup %6870  ;;  %v3086_v47 = vadd.f32 1.0, %v6869_v33  ;;  %v8705_v6 = vadd.f32 %v3013_v49, %v8646_v26  ;;  %v6153_v43 = vpop.f32.mrb[78].mxu0  ;;  %v3143_v61 = vpack.c.bf16 %v3131_v4, %v3130_v52  ;;  %6193 = vmatpush3.bf16.msra.mxu1 %v6623_v60  ;;  %v6625_v60 = vld [vmem:[%s9911_s13 + $0x140] ss:$12 sps:$4 sm:$0xff]   ;;  %v6626_v4 = vld [vmem:[%s9911_s13 + $0x158] ss:$12 sps:$4 sm:$0xff]  }
 0x4aa   : > { %v6873_v38 = vpop.eup %6872  ;;  %v3084_v9 = vadd.f32 1.0, %v6871_v37  ;;  %v8708_v32 = vadd.f32 %v6153_v43, %v8646_v26  ;;  %v3016_v2 = vpop.f32.mrb[79].mxu0  ;;  %v3142_v15 = vpack.c.bf16 %v3129_v27, %v3128_v10  ;;  %6194 = vmatprep.subr.bf16.mxu1 %v6624_v55  ;;  %v5669_v42 = vmul.f32 -1.442695, %v8702_v0 }
 0x4ab   : > { %v6875_v5 = vpop.eup %6874  ;;  %6876 = vrcp.f32 %v3086_v47  ;;  %v3087_v44 = vadd.f32 1.0, %v6873_v38  ;;  %v8712_v12 = vadd.f32 %v3016_v2, %v8646_v26  ;;  %v5667_v63 = vmul.f32 -1.442695, %v8705_v6 }
 0x4ac   : > { %6878 = vrcp.f32 %v3084_v9  ;;  %v3085_v16 = vadd.f32 1.0, %v6875_v5  ;;  %6174 = vmatprep.mubr.bf16.mxu1 %v3142_v15  ;;  %v5670_v35 = vmul.f32 -1.442695, %v8708_v32 }
 0x4ad   : > { %6880 = vrcp.f32 %v3087_v44  ;;  %6175 = vmatmul.mubr.bf16.gmra.mrb[68].mxu1 %v3143_v61  ;;  %v5668_v52 = vmul.f32 -1.442695, %v8712_v12 }
 0x4ae   : > { %6882 = vrcp.f32 %v3085_v16  ;;  %6195 = vmatpush3.bf16.msra.mxu1 %v6624_v55  ;;  %v6627_v55 = vld [vmem:[%s9911_s13 + $0x170] ss:$12 sps:$4 sm:$0xff]  }
 0x4af   : > { %6884 = vpow2.f32 %v5669_v42  ;;  %v8720_v26 = vpop.f32.mrb[80].mxu0  ;;  %6196 = vmatprep.subr.bf16.mxu1 %v6625_v60 }
 0x4b0   : > { %6886 = vpow2.f32 %v5667_v63  ;;  %v8725_v34 = vpop.f32.mrb[81].mxu0 }
 0x4b1   : > { %6888 = vpow2.f32 %v5670_v35  ;;  %v8727_v33 = vpop.f32.mrb[82].mxu0 }
 0x4b2   : > { %6890 = vpow2.f32 %v5668_v52  ;;  %v8729_v10 = vpop.f32.mrb[83].mxu0  ;;  %6197 = vmatpush3.bf16.msra.mxu1 %v6625_v60 }
 0x4b3   : > { %6198 = vmatprep.subr.bf16.mxu1 %v6626_v4 }
 0x4b5   : > { %v6877_v27 = vpop.eup %6876 }
 0x4b6   : > { %v6879_v49 = vpop.eup %6878  ;;  %6199 = vmatpush3.bf16.msra.mxu1 %v6626_v4  ;;  %v3134_v61 = vmul.f32 %v6877_v27, %v8669_v41 }
 0x4b7   : > { %v6881_v37 = vpop.eup %6880  ;;  %v8734_v47 = vpop.f32.mrb[84].mxu0  ;;  %6200 = vmatprep.subr.bf16.mxu1 %v6627_v55  ;;  %v3132_v15 = vmul.f32 %v6879_v49, %v8672_v25 }
 0x4b8   : > { %v6883_v43 = vpop.eup %6882  ;;  %v3135_v38 = vmul.f32 %v6881_v37, %v8676_v29  ;;  %v8738_v9 = vpop.f32.mrb[85].mxu0 }
 0x4b9   : > { %v6885_v2 = vpop.eup %6884  ;;  %v3133_v5 = vmul.f32 %v6883_v43, %v8683_v22  ;;  %v8742_v44 = vpop.f32.mrb[86].mxu0 }
 0x4ba   : > { %v6887_v42 = vpop.eup %6886  ;;  %v3090_v60 = vadd.f32 1.0, %v6885_v2  ;;  %v8744_v16 = vpop.f32.mrb[87].mxu0  ;;  %v3145_v63 = vpack.c.bf16 %v3135_v38, %v3134_v61  ;;  %6201 = vmatpush3.bf16.msra.mxu1 %v6627_v55 }
 0x4bb   : > { %v6889_v35 = vpop.eup %6888  ;;  %v3088_v52 = vadd.f32 1.0, %v6887_v42  ;;  %v3144_v41 = vpack.c.bf16 %v3133_v5, %v3132_v15 }
 0x4bc   : > { %v6891_v4 = vpop.eup %6890  ;;  %6892 = vrcp.f32 %v3090_v60  ;;  %v3091_v29 = vadd.f32 1.0, %v6889_v35 }
 0x4bd   : > { %6894 = vrcp.f32 %v3088_v52  ;;  %v3089_v27 = vadd.f32 1.0, %v6891_v4  ;;  %6178 = vmatprep.mubr.bf16.mxu1 %v3144_v41 }
 0x4be   : > { %6896 = vrcp.f32 %v3091_v29  ;;  %6179 = vmatmul.mubr.bf16.gmra.mrb[72].mxu1 %v3145_v63 }
 0x4bf   : > { %6898 = vrcp.f32 %v3089_v27  ;;  %v8746_v25 = vpop.f32.mrb[88].mxu0 }
 0x4c0   : > { %v8748_v22 = vpop.f32.mrb[89].mxu0 }
 0x4c1   : > { %v8750_v49 = vpop.f32.mrb[90].mxu0 }
 0x4c2   : > { %v8752_v37 = vpop.f32.mrb[91].mxu0 }
 0x4c6   : > { %v6893_v55 = vpop.eup %6892 }
 0x4c7   : > { %v6895_v43 = vpop.eup %6894  ;;  %v8754_v61 = vpop.f32.mrb[92].mxu0  ;;  %v3138_v5 = vmul.f32 %v6893_v55, %v8702_v0 }
 0x4c8   : > { %v6897_v38 = vpop.eup %6896  ;;  %v8756_v2 = vpop.f32.mrb[93].mxu0  ;;  %v3136_v63 = vmul.f32 %v6895_v43, %v8705_v6 }
 0x4c9   : > { %v6899_v15 = vpop.eup %6898  ;;  %v3139_v42 = vmul.f32 %v6897_v38, %v8708_v32  ;;  %v8760_v60 = vpop.f32.mrb[94].mxu0 }
 0x4ca   : > { %v3137_v35 = vmul.f32 %v6899_v15, %v8712_v12  ;;  %v8764_v52 = vpop.f32.mrb[95].mxu0 }
 0x4cb   : > { %v3147_v41 = vpack.c.bf16 %v3139_v42, %v3138_v5 }
 0x4cc   : > { %v3146_v4 = vpack.c.bf16 %v3137_v35, %v3136_v63 }
 0x4ce   : > { %6182 = vmatprep.mubr.bf16.mxu1 %v3146_v4 }
 0x4cf   : > { %6183 = vmatmul.mubr.bf16.gmra.mrb[76].mxu1 %v3147_v41  ;;  %v8766_v29 = vpop.f32.mrb[96].mxu0 }
 0x4d0   : > { %6202 = vmatprep.mubr.bf16.mxu1 %v8124_v56  ;;  %v8769_v27 = vpop.f32.mrb[97].mxu0 }
 0x4d1   : > { %v8771_v0 = vpop.f32.mrb[98].mxu0 }
 0x4d2   : > { %v8773_v32 = vpop.f32.mrb[99].mxu0 }
 0x4d7   : > { %6203 = vmatmul.mubr.bf16.vlgmr.msra.gmra.mrb[80].mxu1 %v8155_v1  ;;  %v8776_v6 = vpop.f32.mrb[100].mxu0 }
 0x4d8   : > { %10109 = vst [vmem:[#allocation70_spill] sm:$0xff] %v8776_v6  ;;  %6206 = vmatprep.mubr.bf16.mxu1 %v8186_v17  ;;  %v8779_v12 = vpop.f32.mrb[101].mxu0 }
 0x4d9   : > { %v8781_v55 = vpop.f32.mrb[102].mxu0 }
 0x4da   : > { %10110 = vst [vmem:[#allocation71_spill] sm:$0xff] %v8781_v55  ;;  %v8783_v43 = vpop.f32.mrb[103].mxu0  ;;  %v10124_v55 = vld [vmem:[#allocation55_spill] sm:$0xff] }
 0x4df   : > { %6207 = vmatmul.mubr.bf16.gmra.mrb[84].mxu1 %v8217_v7  ;;  %v8786_v38 = vpop.f32.mrb[104].mxu0 }
 0x4e0   : > { %10111 = vst [vmem:[#allocation72_spill] sm:$0xff] %v8786_v38  ;;  %6210 = vmatprep.mubr.bf16.mxu1 %v8236_v18  ;;  %v8789_v15 = vpop.f32.mrb[105].mxu0  ;;  %v3164_v18 = vld [vmem:[%s9916_s18] sm:$0x1] }
 0x4e1   : > { %10112 = vst [vmem:[#allocation73_spill] sm:$0xff] %v8789_v15  ;;  %v8791_v5 = vpop.f32.mrb[106].mxu0  ;;  %v3165_v7 = vunpack.c.l.bf16 %v3164_v18  ;;  %v10120_v18 = vld [vmem:[#allocation54_spill] sm:$0xff]  ;;  %v10123_v15 = vld [vmem:[#allocation69_spill] sm:$0xff] }
 0x4e2   : > { %10113 = vst [vmem:[#allocation74_spill] sm:$0xff] %v8791_v5  ;;  %v8793_v42 = vpop.f32.mrb[107].mxu0  ;;  %v10119_v5 = vld [vmem:[#allocation67_spill] sm:$0xff] }
 0x4e3   : > { %10114 = vst [vmem:[#allocation75_spill] sm:$0xff] %v8793_v42  ;;  %v8810_v17 = vrot.slane %v3165_v7, %v10089_v24  ;;  %v10122_v7 = vld [vmem:[#allocation68_spill] sm:$0xff] }
 0x4e7   : > { %6211 = vmatmul.mubr.bf16.gmra.mrb[88].mxu1 %v8243_v54  ;;  %v8796_v63 = vpop.f32.mrb[108].mxu0 }
 0x4e8   : > { %10115 = vst [vmem:[#allocation76_spill] sm:$0xff] %v8796_v63  ;;  %6214 = vmatprep.mubr.bf16.mxu1 %v8253_v48  ;;  %v8799_v35 = vpop.f32.mrb[109].mxu0 }
 0x4e9   : > { %10116 = vst [vmem:[#allocation77_spill] sm:$0xff] %v8799_v35  ;;  %v8801_v41 = vpop.f32.mrb[110].mxu0 }
 0x4ea   : > { %10117 = vst [vmem:[#allocation78_spill] sm:$0xff] %v8801_v41  ;;  %v8803_v4 = vpop.f32.mrb[111].mxu0 }
 0x4eb   : > { %10118 = vst [vmem:[#allocation79_spill] sm:$0xff] %v8803_v4 }
 0x4ef   : > { %6215 = vmatmul.mubr.bf16.gmra.mrb[92].mxu1 %v8265_v62 }
 0x56f   : > { %v6172_v54 = vpop.f32.mrb[64].mxu1 }
 0x570   : > { %v3261_v1 = vadd.f32 %v6172_v54, %v8810_v17  ;;  %v3252_v48 = vpop.f32.mrb[65].mxu1 }
 0x571   : > { %v3253_v56 = vadd.f32 %v3252_v48, %v8810_v17  ;;  %v6173_v3 = vpop.f32.mrb[66].mxu1 }
 0x572   : > { %v3317_v41 = vmul.f32 %v3261_v1, %v8406_v51  ;;  %v3264_v63 = vadd.f32 %v6173_v3, %v8810_v17  ;;  %v3255_v62 = vpop.f32.mrb[67].mxu1  ;;  %v10126_v1 = vld [vmem:[#allocation52_spill] sm:$0xff] }
 0x573   : > { %v3315_v4 = vmul.f32 %v3253_v56, %v10119_v5  ;;  %v3256_v38 = vadd.f32 %v3255_v62, %v8810_v17  ;;  %v10128_v56 = vld [vmem:[#allocation53_spill] sm:$0xff] }
 0x574   : > { %v8819_v35 = vadd.f32 %v3317_v41, %v10120_v18  ;;  %v3318_v42 = vmul.f32 %v3264_v63, %v10122_v7 }
 0x575   : > { %v3316_v54 = vmul.f32 %v3256_v38, %v10123_v15  ;;  %v8828_v48 = vadd.f32 %v3315_v4, %v10126_v1 }
 0x576   : > { %10121 = vst [vmem:[#allocation67_spill] sm:$0xff] %v8819_v35  ;;  %v8824_v6 = vadd.f32 %v3318_v42, %v10124_v55  ;;  %3753 = vadd.xlane.f32.xlu1 %v8819_v35  ;;  %v3799_v38 = vmul.f32 %v8819_v35, %v8819_v35 }
 0x577   : > { %10127 = vst [vmem:[#allocation68_spill] sm:$0xff] %v8828_v48  ;;  %v8832_v3 = vadd.f32 %v3316_v54, %v10128_v56  ;;  %v3797_v62 = vmul.f32 %v8828_v48, %v8828_v48  ;;  %v10130_v56 = vld [vmem:[#allocation58_spill] sm:$0xff] }
 0x578   : > { %10125 = vst [vmem:[#allocation54_spill] sm:$0xff] %v8824_v6  ;;  %3755 = vadd.xlane.f32.xlu0 %v8824_v6  ;;  %v3800_v41 = vmul.f32 %v8824_v6, %v8824_v6 }
 0x579   : > { %10129 = vst [vmem:[#allocation69_spill] sm:$0xff] %v8832_v3  ;;  %v3798_v51 = vmul.f32 %v8832_v3, %v8832_v3 }
 0x57a   : > { %3749 = vadd.xlane.f32.xlu1 %v8828_v48 }
 0x57c   : > { %3751 = vadd.xlane.f32.xlu0 %v8832_v3 }
 0x57e   : > { %3813 = vadd.xlane.f32.xlu1 %v3797_v62 }
 0x580   : > { %v6176_v55 = vpop.f32.mrb[68].mxu1  ;;  %3815 = vadd.xlane.f32.xlu0 %v3798_v51 }
 0x581   : > { %v3277_v15 = vadd.f32 %v6176_v55, %v8810_v17  ;;  %v3268_v5 = vpop.f32.mrb[69].mxu1 }
 0x582   : > { %v3269_v42 = vadd.f32 %v3268_v5, %v8810_v17  ;;  %v6177_v63 = vpop.f32.mrb[70].mxu1  ;;  %3817 = vadd.xlane.f32.xlu1 %v3799_v38 }
 0x583   : > { %v3321_v4 = vmul.f32 %v3277_v15, %v8472_v57  ;;  %v3280_v18 = vadd.f32 %v6177_v63, %v8810_v17  ;;  %v3271_v7 = vpop.f32.mrb[71].mxu1  ;;  %v10131_v57 = vld [vmem:[#allocation56_spill] sm:$0xff] }
 0x584   : > { %v3319_v54 = vmul.f32 %v3269_v42, %v8477_v13  ;;  %v3272_v1 = vadd.f32 %v3271_v7, %v8810_v17  ;;  %3819 = vadd.xlane.f32.xlu0 %v3800_v41  ;;  %v10132_v13 = vld [vmem:[#allocation57_spill] sm:$0xff] }
 0x585   : > { %v8851_v62 = vadd.f32 %v3321_v4, %v10130_v56  ;;  %v3322_v51 = vmul.f32 %v3280_v18, %v8487_v11 }
 0x586   : > { %v3320_v55 = vmul.f32 %v3272_v1, %v8491_v58  ;;  %v8860_v15 = vadd.f32 %v3319_v54, %v10131_v57  ;;  %v6628_v58 = vld [vmem:[%s9913_s15 + $0x40] sm:$0xff]  }
 0x587   : > { %v8856_v38 = vadd.f32 %v3322_v51, %v8102_v45  ;;  %3761 = vadd.xlane.f32.xlu1 %v8851_v62  ;;  %v3803_v63 = vmul.f32 %v8851_v62, %v8851_v62  ;;  %6218 = vmatprep.subr.bf16.mxu1 %v6628_v58 }
 0x588   : > { %v8864_v5 = vadd.f32 %v3320_v55, %v10132_v13  ;;  %v3801_v11 = vmul.f32 %v8860_v15, %v8860_v15  ;;  %6219 = vmatpush3.bf16.msra.mxu1 %v6628_v58  ;;  %v6629_v55 = vld [vmem:[%s9913_s15 + $0x48] sm:$0xff]  }
 0x589   : > { %3763 = vadd.xlane.f32.xlu0 %v8856_v38  ;;  %v3804_v54 = vmul.f32 %v8856_v38, %v8856_v38  ;;  %6220 = vmatprep.subr.bf16.mxu1 %v6629_v55 }
 0x58a   : > { %v3802_v45 = vmul.f32 %v8864_v5, %v8864_v5 }
 0x58b   : > { %3757 = vadd.xlane.f32.xlu1 %v8860_v15 }
 0x58c   : > { %6221 = vmatpush3.bf16.msra.mxu1 %v6629_v55 }
 0x58d   : > { %3759 = vadd.xlane.f32.xlu0 %v8864_v5 }
 0x58f   : > { %3821 = vadd.xlane.f32.xlu1 %v3801_v11 }
 0x591   : > { %v6180_v42 = vpop.f32.mrb[72].mxu1  ;;  %3823 = vadd.xlane.f32.xlu0 %v3802_v45 }
 0x592   : > { %v3293_v41 = vadd.f32 %v6180_v42, %v8810_v17  ;;  %v3284_v4 = vpop.f32.mrb[73].mxu1 }
 0x593   : > { %v3285_v18 = vadd.f32 %v3284_v4, %v8810_v17  ;;  %v6181_v7 = vpop.f32.mrb[74].mxu1  ;;  %3825 = vadd.xlane.f32.xlu1 %v3803_v63 }
 0x594   : > { %v3325_v1 = vmul.f32 %v3293_v41, %v8535_v30  ;;  %v3296_v56 = vadd.f32 %v6181_v7, %v8810_v17  ;;  %v3287_v51 = vpop.f32.mrb[75].mxu1 }
 0x595   : > { %v3323_v57 = vmul.f32 %v3285_v18, %v8539_v23  ;;  %v3288_v13 = vadd.f32 %v3287_v51, %v8810_v17  ;;  %3827 = vadd.xlane.f32.xlu0 %v3804_v54  ;;  %v6630_v23 = vld [vmem:[%s9913_s15 + $0x50] sm:$0xff]  }
 0x596   : > { %v8889_v11 = vadd.f32 %v3325_v1, %v8145_v8  ;;  %v3326_v45 = vmul.f32 %v3296_v56, %v8546_v53  ;;  %6222 = vmatprep.subr.bf16.mxu1 %v6630_v23  ;;  %v6633_v1 = vld [vmem:[%s9913_s15 + $0x68] sm:$0xff]  }
 0x597   : > { %v3324_v30 = vmul.f32 %v3288_v13, %v8553_v50  ;;  %v8901_v42 = vadd.f32 %v3323_v57, %v8114_v39  ;;  %6223 = vmatpush3.bf16.msra.mxu1 %v6630_v23 }
 0x598   : > { %v8894_v58 = vadd.f32 %v3326_v45, %v8161_v19  ;;  %3769 = vadd.xlane.f32.xlu1 %v8889_v11  ;;  %v6631_v19 = vld [vmem:[%s9913_s15 + $0x58] sm:$0xff]   ;;  %v3807_v63 = vmul.f32 %v8889_v11, %v8889_v11 }
 0x599   : > { %v8905_v8 = vadd.f32 %v3324_v30, %v8130_v14  ;;  %v3805_v53 = vmul.f32 %v8901_v42, %v8901_v42  ;;  %6224 = vmatprep.subr.bf16.mxu1 %v6631_v19  ;;  %v6632_v14 = vld [vmem:[%s9913_s15 + $0x60] sm:$0xff]  }
 0x59a   : > { %3771 = vadd.xlane.f32.xlu0 %v8894_v58  ;;  %v3808_v54 = vmul.f32 %v8894_v58, %v8894_v58 }
 0x59b   : > { %6225 = vmatpush3.bf16.msra.mxu1 %v6631_v19  ;;  %v3806_v39 = vmul.f32 %v8905_v8, %v8905_v8 }
 0x59c   : > { %3765 = vadd.xlane.f32.xlu1 %v8901_v42  ;;  %6226 = vmatprep.subr.bf16.mxu1 %v6632_v14 }
 0x59e   : > { %3767 = vadd.xlane.f32.xlu0 %v8905_v8 }
 0x59f   : > { %6227 = vmatpush3.bf16.msra.mxu1 %v6632_v14 }
 0x5a0   : > { %3829 = vadd.xlane.f32.xlu1 %v3805_v53  ;;  %6228 = vmatprep.subr.bf16.mxu1 %v6633_v1 }
 0x5a2   : > { %v6184_v50 = vpop.f32.mrb[76].mxu1  ;;  %3831 = vadd.xlane.f32.xlu0 %v3806_v39 }
 0x5a3   : > { %v3309_v41 = vadd.f32 %v6184_v50, %v8810_v17  ;;  %v3300_v4 = vpop.f32.mrb[77].mxu1  ;;  %6229 = vmatpush3.bf16.msra.mxu1 %v6633_v1 }
 0x5a4   : > { %v3301_v18 = vadd.f32 %v3300_v4, %v8810_v17  ;;  %v6185_v7 = vpop.f32.mrb[78].mxu1  ;;  %3833 = vadd.xlane.f32.xlu1 %v3807_v63 }
 0x5a5   : > { %v3329_v56 = vmul.f32 %v3309_v41, %v8578_v59  ;;  %v3312_v51 = vadd.f32 %v6185_v7, %v8810_v17  ;;  %v3303_v55 = vpop.f32.mrb[79].mxu1  ;;  %v6634_v59 = vld [vmem:[%s9913_s15 + $0x70] sm:$0xff]  }
 0x5a6   : > { %v3327_v57 = vmul.f32 %v3301_v18, %v8582_v46  ;;  %v3304_v13 = vadd.f32 %v3303_v55, %v8810_v17  ;;  %3835 = vadd.xlane.f32.xlu0 %v3808_v54  ;;  %6230 = vmatprep.subr.bf16.mxu1 %v6634_v59 }
 0x5a7   : > { %v8933_v45 = vadd.f32 %v3329_v56, %v8207_v21  ;;  %v3330_v30 = vmul.f32 %v3312_v51, %v8587_v31  ;;  %6231 = vmatpush3.bf16.msra.mxu1 %v6634_v59 }
 0x5a8   : > { %v3328_v23 = vmul.f32 %v3304_v13, %v8591_v40  ;;  %v8947_v21 = vadd.f32 %v3327_v57, %v8176_v28  ;;  %v6638_v13 = vld [vmem:[%s9917_s19 + $0x4] ss:$8 sps:$4 sm:$0xff]  }
 0x5a9   : > { %10133 = vst [vmem:[#allocation55_spill] sm:$0xff] %v8933_v45  ;;  %v8941_v19 = vadd.f32 %v3330_v30, %v8223_v20  ;;  %3777 = vadd.xlane.f32.xlu1 %v8933_v45  ;;  %v6635_v20 = vld [vmem:[%s9913_s15 + $0x78] sm:$0xff]  }
 0x5aa   : > { %v8944_v17 = vpop.f32.mrb[80].mxu1  ;;  %v8958_v40 = vadd.f32 %v3328_v23, %v8192_v36  ;;  %6232 = vmatprep.subr.bf16.mxu1 %v6635_v20  ;;  %v3809_v28 = vmul.f32 %v8947_v21, %v8947_v21  ;;  %v3811_v36 = vmul.f32 %v8933_v45, %v8933_v45 }
 0x5ab   : > { %10134 = vst [vmem:[#allocation52_spill] sm:$0xff] %v8941_v19  ;;  %10135 = vst [vmem:[#allocation53_spill] sm:$0xff] %v8944_v17  ;;  %3779 = vadd.xlane.f32.xlu0 %v8941_v19  ;;  %v8950_v46 = vpop.f32.mrb[81].mxu1  ;;  %6233 = vmatpush3.bf16.msra.mxu1 %v6635_v20  ;;  %v3812_v4 = vmul.f32 %v8941_v19, %v8941_v19  ;;  %v5711_v20 = vld [vmem:[%s9912_s14 + $0x3] sm:$0x7] }
 0x5ac   : > { %10136 = vst [vmem:[#allocation58_spill] sm:$0xff] %v8950_v46  ;;  %v8952_v31 = vpop.f32.mrb[82].mxu1  ;;  %v3810_v39 = vmul.f32 %v8958_v40, %v8958_v40  ;;  %4666 = vmatprep.subr.bf16.mxu1 %v6638_v13 }
 0x5ad   : > { %10137 = vst [vmem:[#allocation56_spill] sm:$0xff] %v8952_v31  ;;  %v8960_v53 = vpop.f32.mrb[83].mxu1  ;;  %3773 = vadd.xlane.f32.xlu1 %v8947_v21 }
 0x5ae   : > { %10138 = vst [vmem:[#allocation57_spill] sm:$0xff] %v8960_v53 }
 0x5af   : > { %3775 = vadd.xlane.f32.xlu0 %v8958_v40 }
 0x5b1   : > { %3837 = vadd.xlane.f32.xlu1 %v3809_v28 }
 0x5b2   : > { %v8968_v14 = vpop.f32.mrb[84].mxu1 }
 0x5b3   : > { %10139 = vst [vmem:[#allocation80_spill] sm:$0xff] %v8968_v14  ;;  %v8970_v50 = vpop.f32.mrb[85].mxu1  ;;  %3839 = vadd.xlane.f32.xlu0 %v3810_v39 }
 0x5b4   : > { %10140 = vst [vmem:[#allocation81_spill] sm:$0xff] %v8970_v50  ;;  %v8974_v63 = vpop.f32.mrb[86].mxu1 }
 0x5b5   : > { %10141 = vst [vmem:[#allocation82_spill] sm:$0xff] %v8974_v63  ;;  %v8976_v41 = vpop.f32.mrb[87].mxu1  ;;  %3841 = vadd.xlane.f32.xlu1 %v3811_v36 }
 0x5b6   : > { %10142 = vst [vmem:[#allocation83_spill] sm:$0xff] %v8976_v41  ;;  %v10152_v41 = vld [vmem:[#allocation51_spill] sm:$0xff] }
 0x5b7   : > { %3843 = vadd.xlane.f32.xlu0 %v3812_v4  ;;  %v9004_v4 = vunpack.c.l.bf16 %v5711_v20 }
 0x5b9   : > { %10151 = vst [vmem:[#allocation92_spill] sm:$0xff] %v9004_v4 }
 0x5ba   : > { %v8980_v18 = vpop.f32.mrb[88].mxu1 }
 0x5bb   : > { %10143 = vst [vmem:[#allocation84_spill] sm:$0xff] %v8980_v18  ;;  %v8982_v7 = vpop.f32.mrb[89].mxu1 }
 0x5bc   : > { %10144 = vst [vmem:[#allocation85_spill] sm:$0xff] %v8982_v7  ;;  %v8984_v54 = vpop.f32.mrb[90].mxu1 }
 0x5bd   : > { %10145 = vst [vmem:[#allocation86_spill] sm:$0xff] %v8984_v54  ;;  %v8986_v1 = vpop.f32.mrb[91].mxu1 }
 0x5be   : > { %10146 = vst [vmem:[#allocation87_spill] sm:$0xff] %v8986_v1 }
 0x5c2   : > { %v8988_v56 = vpop.f32.mrb[92].mxu1 }
 0x5c3   : > { %10147 = vst [vmem:[#allocation88_spill] sm:$0xff] %v8988_v56  ;;  %v8990_v51 = vpop.f32.mrb[93].mxu1 }
 0x5c4   : > { %10148 = vst [vmem:[#allocation89_spill] sm:$0xff] %v8990_v51  ;;  %v8992_v55 = vpop.f32.mrb[94].mxu1 }
 0x5c5   : > { %10149 = vst [vmem:[#allocation90_spill] sm:$0xff] %v8992_v55  ;;  %v8994_v57 = vpop.f32.mrb[95].mxu1 }
 0x5c6   : > { %10150 = vst [vmem:[#allocation91_spill] sm:$0xff] %v8994_v57 }
 0x603   : > { %v3754_v30 = vpop.xlane.xlu1 %3753 }
 0x604   : > { %v9006_v57 = vmul.f32 0.0078125, %v3754_v30 }
 0x605   : > { %v3756_v23 = vpop.xlane.xlu0 %3755 }
 0x606   : > { %v9008_v1 = vmul.f32 0.0078125, %v3756_v23  ;;  %v3863_v20 = vmul.f32 %v9006_v57, %v9006_v57 }
 0x607   : > { %v3750_v59 = vpop.xlane.xlu1 %3749 }
 0x608   : > { %v3781_v28 = vmul.f32 0.0078125, %v3750_v59  ;;  %v3391_v59 = vrot.slane %v9004_v4, %v10152_v41 }
 0x609   : > { %v3752_v39 = vpop.xlane.xlu0 %3751 }
 0x60a   : > { %v9002_v36 = vmul.f32 0.0078125, %v3752_v39  ;;  %v3861_v51 = vmul.f32 %v3781_v28, %v3781_v28 }
 0x60b   : > { %v3814_v55 = vpop.xlane.xlu1 %3813 }
 0x60c   : > { %v3845_v56 = vmul.f32 0.0078125, %v3814_v55  ;;  %v3862_v54 = vmul.f32 %v9002_v36, %v9002_v36  ;;  %v3864_v55 = vmul.f32 %v9008_v1, %v9008_v1 }
 0x60d   : > { %v3816_v13 = vpop.xlane.xlu0 %3815 }
 0x60e   : > { %v3877_v7 = vsub.f32 %v3845_v56, %v3861_v51  ;;  %v3846_v18 = vmul.f32 0.0078125, %v3816_v13  ;;  %v3387_v56 = vrot.slane %v9004_v4, %v10089_v24  ;;  %v9021_v51 = vrot.slane %v3391_v59, %v10089_v24 }
 0x60f   : > { %v3818_v39 = vpop.xlane.xlu1 %3817 }
 0x610   : > { %v3909_v63 = vadd.f32 1e-06, %v3877_v7  ;;  %v3878_v30 = vsub.f32 %v3846_v18, %v3862_v54  ;;  %v3847_v50 = vmul.f32 0.0078125, %v3818_v39  ;;  %v5736_v18 = vld [vmem:[%s9909_s11 + $0x1] sm:$0x1] }
 0x611   : > { %v3820_v23 = vpop.xlane.xlu0 %3819  ;;  %v3959_v59 = vunpack.c.l.bf16 %v5736_v18 }
 0x612   : > { %6900 = vrsqrt.f32 %v3909_v63  ;;  %v3910_v14 = vadd.f32 1e-06, %v3878_v30  ;;  %v3879_v53 = vsub.f32 %v3847_v50, %v3863_v20  ;;  %v3848_v31 = vmul.f32 0.0078125, %v3820_v23  ;;  %v5737_v63 = vld [vmem:[%s9910_s12 + $0x1] sm:$0x1] }
 0x613   : > { %v9030_v20 = vrot.slane %v3387_v56, %v10089_v24  ;;  %v3982_v23 = vunpack.c.l.bf16 %v5737_v63  ;;  %v3580_v63 = vadd.f32 %v8729_v10, %v9021_v51 }
 0x614   : > { %6902 = vrsqrt.f32 %v3910_v14  ;;  %v3911_v7 = vadd.f32 1e-06, %v3879_v53  ;;  %v3880_v54 = vsub.f32 %v3848_v31, %v3864_v55  ;;  %v3762_v13 = vpop.xlane.xlu1 %3761  ;;  %v3576_v14 = vadd.f32 %v8725_v34, %v9021_v51 }
 0x615   : > { %v9038_v55 = vadd.f32 %v8720_v26, %v9030_v20  ;;  %v9048_v34 = vadd.f32 %v8727_v33, %v9030_v20  ;;  %v9053_v26 = vrot.slane %v3982_v23, %v10089_v24  ;;  %v3895_v33 = vsub.f32 %v8819_v35, %v9006_v57 }
 0x616   : > { %6904 = vrsqrt.f32 %v3911_v7  ;;  %v3912_v50 = vadd.f32 1e-06, %v3880_v54  ;;  %v3764_v39 = vpop.xlane.xlu0 %3763  ;;  %v3893_v7 = vsub.f32 %v8828_v48, %v3781_v28  ;;  %v9042_v54 = vrot.slane %v3959_v59, %v10089_v24 }
 0x617   : > { %v4003_v41 = vadd.f32 1.0, %v3576_v14  ;;  %v3894_v28 = vsub.f32 %v8832_v3, %v9002_v36  ;;  %v9061_v48 = vmul.f32 0.0078125, %v3762_v13  ;;  %v9063_v46 = vmul.f32 0.0078125, %v3764_v39 }
 0x618   : > { %6906 = vrsqrt.f32 %v3912_v50  ;;  %v3758_v30 = vpop.xlane.xlu1 %3757  ;;  %v3590_v57 = vadd.f32 %v8744_v16, %v9021_v51  ;;  %v3896_v13 = vsub.f32 %v8824_v6, %v9008_v1  ;;  %v6660_v1 = vld [vmem:[%s9915_s17 + $0x40] sm:$0xff]  }
 0x619   : > { %v9034_v53 = vmul.f32 0.0078125, %v3758_v30  ;;  %6250 = vmatprep.subr.bf16.mxu0 %v6660_v1 }
 0x61a   : > { %v3760_v31 = vpop.xlane.xlu0 %3759  ;;  %6251 = vmatpush3.bf16.msra.mxu0 %v6660_v1 }
 0x61b   : > { %v9044_v56 = vmul.f32 0.0078125, %v3760_v31  ;;  %v3865_v59 = vmul.f32 %v9034_v53, %v9034_v53 }
 0x61c   : > { %v6901_v18 = vpop.eup %6900  ;;  %v3822_v50 = vpop.xlane.xlu1 %3821 }
 0x61d   : > { %v3849_v30 = vmul.f32 0.0078125, %v3822_v50  ;;  %v3941_v31 = vmul.f32 %v6901_v18, %v3893_v7  ;;  %v3866_v10 = vmul.f32 %v9044_v56, %v9044_v56  ;;  %v4004_v50 = vadd.f32 1.0, %v3580_v63 }
 0x61e   : > { %v6903_v14 = vpop.eup %6902  ;;  %v3824_v23 = vpop.xlane.xlu0 %3823  ;;  %v3586_v7 = vadd.f32 %v8738_v9, %v9021_v51  ;;  %v3868_v63 = vmul.f32 %v9063_v46, %v9063_v46 }
 0x61f   : > { %v3881_v17 = vsub.f32 %v3849_v30, %v3865_v59  ;;  %v3850_v4 = vmul.f32 0.0078125, %v3824_v23  ;;  %v3942_v36 = vmul.f32 %v6903_v14, %v3894_v28  ;;  %v3964_v3 = vmul.f32 %v9042_v54, %v3941_v31 }
 0x620   : > { %v6905_v24 = vpop.eup %6904  ;;  %v3826_v39 = vpop.xlane.xlu1 %3825  ;;  %v3867_v28 = vmul.f32 %v9061_v48, %v9061_v48 }
 0x621   : > { %v3943_v18 = vmul.f32 %v6905_v24, %v3895_v33  ;;  %v3913_v35 = vadd.f32 1e-06, %v3881_v17  ;;  %v3882_v19 = vsub.f32 %v3850_v4, %v3866_v10  ;;  %v3851_v59 = vmul.f32 0.0078125, %v3826_v39  ;;  %v6661_v24 = vld [vmem:[%s9915_s17 + $0x48] sm:$0xff]  }
 0x622   : > { %v6907_v30 = vpop.eup %6906  ;;  %v3828_v31 = vpop.xlane.xlu0 %3827  ;;  %v3965_v9 = vmul.f32 %v9042_v54, %v3942_v36  ;;  %v3987_v16 = vadd.f32 %v9053_v26, %v3964_v3  ;;  %v4005_v3 = vadd.f32 1.0, %v3586_v7  ;;  %6252 = vmatprep.subr.bf16.mxu0 %v6661_v24 }
 0x623   : > { %v3966_v17 = vmul.f32 %v9042_v54, %v3943_v18  ;;  %v3944_v4 = vmul.f32 %v6907_v30, %v3896_v13  ;;  %6908 = vrsqrt.f32 %v3913_v35  ;;  %v3914_v14 = vadd.f32 1e-06, %v3882_v19  ;;  %6253 = vmatpush3.bf16.msra.mxu0 %v6661_v24  ;;  %v6636_v24 = vld [vmem:[%s9917_s19] ss:$8 sps:$4 sm:$0xff]  }
 0x624   : > { %v3883_v33 = vsub.f32 %v3851_v59, %v3867_v28  ;;  %v3852_v10 = vmul.f32 0.0078125, %v3828_v31  ;;  %v3988_v23 = vadd.f32 %v9053_v26, %v3965_v9  ;;  %v4019_v36 = vmul.f32 %v4003_v41, %v3987_v16  ;;  %v6662_v41 = vld [vmem:[%s9915_s17 + $0x50] sm:$0xff]  }
 0x625   : > { %v3967_v39 = vmul.f32 %v9042_v54, %v3944_v4  ;;  %6910 = vrsqrt.f32 %v3914_v14  ;;  %v3770_v6 = vpop.xlane.xlu1 %3769  ;;  %v3989_v45 = vadd.f32 %v9053_v26, %v3966_v17  ;;  %v3584_v18 = vadd.f32 %v8734_v47, %v9030_v20  ;;  %6254 = vmatprep.subr.bf16.mxu0 %v6662_v41 }
 0x626   : > { %v3915_v13 = vadd.f32 1e-06, %v3883_v33  ;;  %v3884_v35 = vsub.f32 %v3852_v10, %v3868_v63  ;;  %v4020_v19 = vmul.f32 %v4004_v50, %v3988_v23  ;;  %v4006_v59 = vadd.f32 1.0, %v3590_v57 }
 0x627   : > { %v3772_v7 = vpop.xlane.xlu0 %3771  ;;  %v4035_v30 = vadd.f32 %v4019_v36, %v9038_v55  ;;  %v3990_v28 = vadd.f32 %v9053_v26, %v3967_v39  ;;  %v4021_v31 = vmul.f32 %v4005_v3, %v3989_v45  ;;  %v3588_v47 = vadd.f32 %v8742_v44, %v9030_v20  ;;  %v6663_v55 = vld [vmem:[%s9915_s17 + $0x58] sm:$0xff]   ;;  %6255 = vmatpush3.bf16.msra.mxu0 %v6662_v41 }
 0x628   : > { %6912 = vrsqrt.f32 %v3915_v13  ;;  %v3916_v9 = vadd.f32 1e-06, %v3884_v35  ;;  %v4036_v50 = vadd.f32 %v4020_v19, %v9048_v34  ;;  %v3596_v45 = vadd.f32 %v8748_v22, %v9021_v51  ;;  %6256 = vmatprep.subr.bf16.mxu0 %v6663_v55 }
 0x629   : > { %v3766_v16 = vpop.xlane.xlu1 %3765  ;;  %v4022_v63 = vmul.f32 %v4006_v59, %v3990_v28  ;;  %v4037_v1 = vadd.f32 %v4021_v31, %v3584_v18  ;;  %v3897_v34 = vsub.f32 %v8860_v15, %v9034_v53  ;;  %v9116_v10 = vadd.f32 %v8746_v25, %v9030_v20  ;;  %v6641_v53 = vld [vmem:[%s9917_s19 + $0x14] ss:$8 sps:$4 sm:$0xff]  }
 0x62a   : > { %6914 = vrsqrt.f32 %v3916_v9  ;;  %v9100_v17 = vmul.f32 0.0078125, %v3766_v16  ;;  %v4051_v4 = vpack.c.bf16 %v4036_v50, %v4035_v30  ;;  %v3600_v22 = vadd.f32 %v8752_v37, %v9021_v51  ;;  %v6639_v9 = vld [vmem:[%s9917_s19 + $0x10] ss:$8 sps:$4 sm:$0xff]  }
 0x62b   : > { %v3768_v57 = vpop.xlane.xlu0 %3767  ;;  %v4038_v44 = vadd.f32 %v4022_v63, %v3588_v47  ;;  %v9120_v23 = vmul.f32 0.0078125, %v3770_v6  ;;  %v3898_v39 = vsub.f32 %v8864_v5, %v9044_v56  ;;  %v4007_v6 = vadd.f32 1.0, %v3596_v45  ;;  %v6644_v63 = vld [vmem:[%s9917_s19 + $0x24] ss:$8 sps:$4 sm:$0xff]   ;;  %6257 = vmatpush3.bf16.msra.mxu0 %v6663_v55 }
 0x62c   : > { %v9109_v14 = vmul.f32 0.0078125, %v3768_v57  ;;  %6234 = vmatprep.mubr.bf16.mxu1 %v4051_v4  ;;  %v3869_v25 = vmul.f32 %v9100_v17, %v9100_v17  ;;  %v3606_v35 = vadd.f32 %v8756_v2, %v9021_v51  ;;  %v9131_v19 = vmul.f32 0.0078125, %v3772_v7 }
 0x62d   : > { %v6909_v33 = vpop.eup %6908  ;;  %v3830_v36 = vpop.xlane.xlu1 %3829  ;;  %v4052_v3 = vpack.c.bf16 %v4038_v44, %v4037_v1  ;;  %v4008_v47 = vadd.f32 1.0, %v3600_v22  ;;  %v3610_v2 = vadd.f32 %v8764_v52, %v9021_v51  ;;  %v3899_v7 = vsub.f32 %v8851_v62, %v9061_v48 }
 0x62e   : > { %v3853_v18 = vmul.f32 0.0078125, %v3830_v36  ;;  %v3945_v13 = vmul.f32 %v6909_v33, %v3897_v34  ;;  %v3870_v59 = vmul.f32 %v9109_v14, %v9109_v14  ;;  %v3871_v16 = vmul.f32 %v9120_v23, %v9120_v23 }
 0x62f   : > { %v6911_v37 = vpop.eup %6910  ;;  %v3832_v41 = vpop.xlane.xlu0 %3831  ;;  %6235 = vmatmul.mubr.bf16.vlgmr.msra.gmra.mrb[96].mxu1 %v4052_v3  ;;  %v3900_v52 = vsub.f32 %v8856_v38, %v9063_v46  ;;  %v3872_v48 = vmul.f32 %v9131_v19, %v9131_v19 }
 0x630   : > { %v3885_v30 = vsub.f32 %v3853_v18, %v3869_v25  ;;  %v3854_v56 = vmul.f32 0.0078125, %v3832_v41  ;;  %v3946_v28 = vmul.f32 %v6911_v37, %v3898_v39  ;;  %v3968_v31 = vmul.f32 %v9042_v54, %v3945_v13  ;;  %4667 = vmatpush1.bf16.msra.mxu1 %v6636_v24  ;;  %v6647_v13 = vld [vmem:[%s9917_s19 + $0x34] ss:$8 sps:$4 sm:$0xff]  }
 0x631   : > { %v3834_v50 = vpop.xlane.xlu1 %3833  ;;  %4668 = vmatprep.subr.bf16.mxu1 %v6641_v53  ;;  %v6642_v53 = vld [vmem:[%s9917_s19 + $0x20] ss:$8 sps:$4 sm:$0xff]  }
 0x632   : > { %v6913_v1 = vpop.eup %6912  ;;  %v3917_v45 = vadd.f32 1e-06, %v3885_v30  ;;  %v3886_v57 = vsub.f32 %v3854_v56, %v3870_v59  ;;  %v3855_v4 = vmul.f32 0.0078125, %v3834_v50  ;;  %v3969_v44 = vmul.f32 %v9042_v54, %v3946_v28  ;;  %v6645_v50 = vld [vmem:[%s9917_s19 + $0x30] ss:$8 sps:$4 sm:$0xff]  }
 0x633   : > { %v3836_v34 = vpop.xlane.xlu0 %3835  ;;  %v3991_v24 = vadd.f32 %v9053_v26, %v3968_v31  ;;  %v3947_v33 = vmul.f32 %v6913_v1, %v3899_v7  ;;  %v3598_v30 = vadd.f32 %v8750_v49, %v9030_v20  ;;  %v4009_v31 = vadd.f32 1.0, %v3606_v35 }
 0x634   : > { %v6915_v22 = vpop.eup %6914  ;;  %6916 = vrsqrt.f32 %v3917_v45  ;;  %v3918_v36 = vadd.f32 1e-06, %v3886_v57  ;;  %v3887_v55 = vsub.f32 %v3855_v4, %v3871_v16  ;;  %v3856_v3 = vmul.f32 0.0078125, %v3836_v34  ;;  %4669 = vmatpush1.bf16.msra.mxu1 %v6639_v9 }
 0x635   : > { %v3992_v39 = vadd.f32 %v9053_v26, %v3969_v44  ;;  %v4023_v46 = vmul.f32 %v4007_v6, %v3991_v24  ;;  %v3948_v25 = vmul.f32 %v6915_v22, %v3900_v52  ;;  %v3970_v18 = vmul.f32 %v9042_v54, %v3947_v33  ;;  %4670 = vmatprep.subr.bf16.mxu1 %v6644_v63 }
 0x636   : > { %6918 = vrsqrt.f32 %v3918_v36  ;;  %v3919_v37 = vadd.f32 1e-06, %v3887_v55  ;;  %v3888_v59 = vsub.f32 %v3856_v3, %v3872_v48  ;;  %v3778_v41 = vpop.xlane.xlu1 %3777  ;;  %v3604_v63 = vadd.f32 %v8754_v61, %v9030_v20 }
 0x637   : > { %v4024_v56 = vmul.f32 %v4008_v47, %v3992_v39  ;;  %v4039_v28 = vadd.f32 %v4023_v46, %v9116_v10  ;;  %v3971_v6 = vmul.f32 %v9042_v54, %v3948_v25  ;;  %v3993_v16 = vadd.f32 %v9053_v26, %v3970_v18  ;;  %v6650_v10 = vld [vmem:[%s9917_s19 + $0x44] ss:$8 sps:$4 sm:$0xff]  }
 0x638   : > { %6920 = vrsqrt.f32 %v3919_v37  ;;  %v3920_v9 = vadd.f32 1e-06, %v3888_v59  ;;  %v3780_v7 = vpop.xlane.xlu0 %3779  ;;  %4671 = vmatpush1.bf16.msra.mxu1 %v6642_v53  ;;  %v4010_v49 = vadd.f32 1.0, %v3610_v2  ;;  %v3616_v35 = vadd.f32 %v8769_v27, %v9021_v51  ;;  %v6648_v27 = vld [vmem:[%s9917_s19 + $0x40] ss:$8 sps:$4 sm:$0xff]  }
 0x639   : > { %v4040_v47 = vadd.f32 %v4024_v56, %v3598_v30  ;;  %4672 = vmatprep.subr.bf16.mxu1 %v6647_v13  ;;  %v3994_v45 = vadd.f32 %v9053_v26, %v3971_v6  ;;  %v4025_v57 = vmul.f32 %v4009_v31, %v3993_v16  ;;  %v3608_v61 = vadd.f32 %v8760_v60, %v9030_v20  ;;  %v6653_v60 = vld [vmem:[%s9917_s19 + $0x54] ss:$8 sps:$4 sm:$0xff]   ;;  %v6651_v30 = vld [vmem:[%s9917_s19 + $0x50] ss:$8 sps:$4 sm:$0xff]   ;;  %v6656_v31 = vld [vmem:[%s9917_s19 + $0x64] ss:$8 sps:$4 sm:$0xff]  }
 0x63a   : > { %6922 = vrsqrt.f32 %v3920_v9  ;;  %v3774_v1 = vpop.xlane.xlu1 %3773  ;;  %v3620_v2 = vadd.f32 %v8773_v32, %v9021_v51  ;;  %v9189_v24 = vadd.f32 %v8766_v29, %v9030_v20  ;;  %v3901_v33 = vsub.f32 %v8901_v42, %v9100_v17 }
 0x63b   : > { %v9178_v4 = vmul.f32 0.0078125, %v3774_v1  ;;  %v4053_v44 = vpack.c.bf16 %v4040_v47, %v4039_v28  ;;  %v4026_v48 = vmul.f32 %v4010_v49, %v3994_v45  ;;  %v4041_v34 = vadd.f32 %v4025_v57, %v3604_v63 }
 0x63c   : > { %v3776_v52 = vpop.xlane.xlu0 %3775  ;;  %4673 = vmatpush1.bf16.msra.mxu1 %v6645_v50  ;;  %v4011_v36 = vadd.f32 1.0, %v3616_v35  ;;  %v9200_v55 = vadd.f32 %v8771_v0, %v9030_v20  ;;  %v9202_v3 = vmul.f32 0.0078125, %v3778_v41  ;;  %v3902_v17 = vsub.f32 %v8905_v8, %v9109_v14 }
 0x63d   : > { %v9193_v22 = vmul.f32 0.0078125, %v3776_v52  ;;  %6238 = vmatprep.mubr.bf16.mxu1 %v4053_v44  ;;  %4674 = vmatprep.subr.bf16.mxu1 %v6650_v10  ;;  %v4042_v53 = vadd.f32 %v4026_v48, %v3608_v61  ;;  %v3873_v39 = vmul.f32 %v9178_v4, %v9178_v4  ;;  %v4012_v13 = vadd.f32 1.0, %v3620_v2  ;;  %v6654_v61 = vld [vmem:[%s9917_s19 + $0x60] ss:$8 sps:$4 sm:$0xff]  }
 0x63e   : > { %v6917_v32 = vpop.eup %6916  ;;  %v3838_v29 = vpop.xlane.xlu1 %3837  ;;  %v9208_v37 = vmul.f32 0.0078125, %v3780_v7  ;;  %v3626_v7 = vadd.f32 %v8779_v12, %v9021_v51  ;;  %v3630_v16 = vadd.f32 %v8783_v43, %v9021_v51  ;;  %v3903_v50 = vsub.f32 %v8889_v11, %v9120_v23 }
 0x63f   : > { %v3857_v46 = vmul.f32 0.0078125, %v3838_v29  ;;  %v3949_v25 = vmul.f32 %v6917_v32, %v3901_v33  ;;  %v3874_v0 = vmul.f32 %v9193_v22, %v9193_v22  ;;  %v4054_v41 = vpack.c.bf16 %v4042_v53, %v4041_v34 }
 0x640   : > { %v6919_v18 = vpop.eup %6918  ;;  %v3840_v59 = vpop.xlane.xlu0 %3839  ;;  %4675 = vmatpush1.bf16.msra.mxu1 %v6648_v27  ;;  %v3875_v63 = vmul.f32 %v9202_v3, %v9202_v3  ;;  %v3904_v12 = vsub.f32 %v8894_v58, %v9131_v19  ;;  %v3876_v43 = vmul.f32 %v9208_v37, %v9208_v37  ;;  %v6659_v19 = vld [vmem:[%s9917_s19 + $0x74] ss:$8 sps:$4 sm:$0xff]   ;;  %v4013_v32 = vadd.f32 1.0, %v3626_v7 }
 0x641   : > { %v3889_v14 = vsub.f32 %v3857_v46, %v3873_v39  ;;  %v3858_v56 = vmul.f32 0.0078125, %v3840_v59  ;;  %v3950_v28 = vmul.f32 %v6919_v18, %v3902_v17  ;;  %v3972_v6 = vmul.f32 %v9042_v54, %v3949_v25  ;;  %4676 = vmatprep.subr.bf16.mxu1 %v6653_v60  ;;  %6239 = vmatmul.mubr.bf16.gmra.mrb[100].mxu1 %v4054_v41  ;;  %v6657_v18 = vld [vmem:[%s9917_s19 + $0x70] ss:$8 sps:$4 sm:$0xff]  }
 0x642   : > { %v6921_v9 = vpop.eup %6920  ;;  %v3842_v49 = vpop.xlane.xlu1 %3841  ;;  %v4014_v41 = vadd.f32 1.0, %v3630_v16  ;;  %v10155_v16 = vld [vmem:[#allocation73_spill] sm:$0xff] }
 0x643   : > { %v3921_v47 = vadd.f32 1e-06, %v3889_v14  ;;  %v3890_v10 = vsub.f32 %v3858_v56, %v3874_v0  ;;  %v3859_v35 = vmul.f32 0.0078125, %v3842_v49  ;;  %v3973_v1 = vmul.f32 %v9042_v54, %v3950_v28  ;;  %v10154_v14 = vld [vmem:[#allocation71_spill] sm:$0xff] }
 0x644   : > { %v6923_v45 = vpop.eup %6922  ;;  %v3844_v57 = vpop.xlane.xlu0 %3843  ;;  %v3995_v23 = vadd.f32 %v9053_v26, %v3972_v6  ;;  %v3951_v44 = vmul.f32 %v6921_v9, %v3903_v50  ;;  %4677 = vmatpush1.bf16.msra.mxu1 %v6651_v30  ;;  %v3628_v56 = vadd.f32 %v10154_v14, %v9030_v20  ;;  %v3905_v9 = vsub.f32 %v8947_v21, %v9178_v4 }
 0x645   : > { %6924 = vrsqrt.f32 %v3921_v47  ;;  %v3922_v2 = vadd.f32 1e-06, %v3890_v10  ;;  %v3891_v52 = vsub.f32 %v3859_v35, %v3875_v63  ;;  %v3860_v48 = vmul.f32 0.0078125, %v3844_v57  ;;  %4678 = vmatprep.subr.bf16.mxu1 %v6656_v31  ;;  %v10156_v35 = vld [vmem:[#allocation75_spill] sm:$0xff] }
 0x646   : > { %v3996_v34 = vadd.f32 %v9053_v26, %v3973_v1  ;;  %v4027_v27 = vmul.f32 %v4011_v36, %v3995_v23  ;;  %v3952_v33 = vmul.f32 %v6923_v45, %v3904_v12  ;;  %v3974_v60 = vmul.f32 %v9042_v54, %v3951_v44  ;;  %v10153_v36 = vld [vmem:[#allocation70_spill] sm:$0xff]  ;;  %v10157_v45 = vld [vmem:[#allocation55_spill] sm:$0xff]  ;;  %v10158_v44 = vld [vmem:[#allocation77_spill] sm:$0xff] }
 0x647   : > { %6926 = vrsqrt.f32 %v3922_v2  ;;  %v3923_v29 = vadd.f32 1e-06, %v3891_v52  ;;  %v3892_v53 = vsub.f32 %v3860_v48, %v3876_v43  ;;  %v3624_v0 = vadd.f32 %v10153_v36, %v9030_v20 }
 0x648   : > { %v4028_v17 = vmul.f32 %v4012_v13, %v3996_v34  ;;  %v4043_v39 = vadd.f32 %v4027_v27, %v9189_v24  ;;  %v3975_v46 = vmul.f32 %v9042_v54, %v3952_v33  ;;  %v3997_v25 = vadd.f32 %v9053_v26, %v3974_v60  ;;  %4679 = vmatpush1.bf16.msra.mxu1 %v6654_v61  ;;  %v10161_v60 = vld [vmem:[#allocation79_spill] sm:$0xff] }
 0x649   : > { %6928 = vrsqrt.f32 %v3923_v29  ;;  %v3924_v59 = vadd.f32 1e-06, %v3892_v53  ;;  %4680 = vmatprep.subr.bf16.mxu1 %v6659_v19  ;;  %v3906_v63 = vsub.f32 %v8958_v40, %v9193_v22  ;;  %v3640_v1 = vadd.f32 %v10156_v35, %v9021_v51  ;;  %v10159_v22 = vld [vmem:[#allocation52_spill] sm:$0xff] }
 0x64a   : > { %v4044_v13 = vadd.f32 %v4028_v17, %v9200_v55  ;;  %v3998_v24 = vadd.f32 %v9053_v26, %v3975_v46  ;;  %v4029_v30 = vmul.f32 %v4013_v32, %v3997_v25  ;;  %v3636_v55 = vadd.f32 %v10155_v16, %v9021_v51  ;;  %v10166_v16 = vld [vmem:[#allocation59_spill] sm:$0xff] }
 0x64b   : > { %6930 = vrsqrt.f32 %v3924_v59  ;;  %v3907_v12 = vsub.f32 %v10157_v45, %v9202_v3  ;;  %v3646_v61 = vadd.f32 %v10158_v44, %v9021_v51  ;;  %v3908_v2 = vsub.f32 %v10159_v22, %v9208_v37  ;;  %v10160_v3 = vld [vmem:[#allocation72_spill] sm:$0xff]  ;;  %v10162_v37 = vld [vmem:[#allocation74_spill] sm:$0xff] }
 0x64c   : > { %v4055_v28 = vpack.c.bf16 %v4044_v13, %v4043_v39  ;;  %v4030_v6 = vmul.f32 %v4014_v41, %v3998_v24  ;;  %v4045_v31 = vadd.f32 %v4029_v30, %v3624_v0  ;;  %4681 = vmatpush1.bf16.msra.mxu1 %v6657_v18  ;;  %v4015_v23 = vadd.f32 1.0, %v3636_v55  ;;  %v10163_v41 = vld [vmem:[#allocation76_spill] sm:$0xff] }
 0x64d   : > { %v3634_v27 = vadd.f32 %v10160_v3, %v9030_v20  ;;  %v4016_v33 = vadd.f32 1.0, %v3640_v1  ;;  %v3650_v32 = vadd.f32 %v10161_v60, %v9021_v51  ;;  %v3638_v46 = vadd.f32 %v10162_v37, %v9030_v20  ;;  %v10167_v55 = vld [vmem:[#allocation60_spill] sm:$0xff] }
 0x64e   : > { %6242 = vmatprep.mubr.bf16.mxu1 %v4055_v28  ;;  %v4046_v7 = vadd.f32 %v4030_v6, %v3628_v56  ;;  %v4017_v25 = vadd.f32 1.0, %v3646_v61  ;;  %v3644_v13 = vadd.f32 %v10163_v41, %v9030_v20  ;;  %v10164_v56 = vld [vmem:[#allocation78_spill] sm:$0xff]  ;;  %v6665_v35 = vld [vmem:[%s9915_s17 + $0x68] sm:$0xff]   ;;  %v6666_v1 = vld [vmem:[%s9915_s17 + $0x70] sm:$0xff]  }
 0x64f   : > { %v6925_v50 = vpop.eup %6924  ;;  %v4018_v51 = vadd.f32 1.0, %v3650_v32  ;;  %v3648_v28 = vadd.f32 %v10164_v56, %v9030_v20  ;;  %v10169_v20 = vld [vmem:[#allocation62_spill] sm:$0xff] }
 0x650   : > { %v4056_v49 = vpack.c.bf16 %v4046_v7, %v4045_v31  ;;  %v3953_v47 = vmul.f32 %v6925_v50, %v3905_v9 }
 0x651   : > { %v6927_v10 = vpop.eup %6926 }
 0x652   : > { %6243 = vmatmul.mubr.bf16.gmra.mrb[104].mxu1 %v4056_v49  ;;  %v3954_v4 = vmul.f32 %v6927_v10, %v3906_v63  ;;  %v3976_v43 = vmul.f32 %v9042_v54, %v3953_v47  ;;  %v10170_v63 = vld [vmem:[#allocation63_spill] sm:$0xff]  ;;  %v10171_v49 = vld [vmem:[#allocation64_spill] sm:$0xff]  ;;  %v10172_v10 = vld [vmem:[#allocation65_spill] sm:$0xff] }
 0x653   : > { %v6929_v57 = vpop.eup %6928  ;;  %v6664_v47 = vld [vmem:[%s9915_s17 + $0x60] sm:$0xff]  }
 0x654   : > { %v3977_v52 = vmul.f32 %v9042_v54, %v3954_v4  ;;  %v3999_v48 = vadd.f32 %v9053_v26, %v3976_v43  ;;  %v3955_v19 = vmul.f32 %v6929_v57, %v3907_v12  ;;  %6258 = vmatprep.subr.bf16.mxu0 %v6664_v47  ;;  %v10173_v12 = vld [vmem:[#allocation66_spill] sm:$0xff] }
 0x655   : > { %v6931_v34 = vpop.eup %6930  ;;  %6259 = vmatpush3.bf16.msra.mxu0 %v6664_v47  ;;  %v6667_v4 = vld [vmem:[%s9915_s17 + $0x78] sm:$0xff]   ;;  %v5754_v43 = vld [vmem:[%s9914_s16 + $0x1] sm:$0x1] }
 0x656   : > { %v4000_v29 = vadd.f32 %v9053_v26, %v3977_v52  ;;  %v4031_v53 = vmul.f32 %v4015_v23, %v3999_v48  ;;  %v3956_v17 = vmul.f32 %v6931_v34, %v3908_v2  ;;  %v3978_v39 = vmul.f32 %v9042_v54, %v3955_v19  ;;  %6260 = vmatprep.subr.bf16.mxu0 %v6665_v35  ;;  %v10174_v23 = vld [vmem:[#allocation50_spill] sm:$0xff] }
 0x657   : > { %v4078_v57 = vunpack.c.l.bf16 %v5754_v43 }
 0x658   : > { %v4032_v18 = vmul.f32 %v4016_v33, %v4000_v29  ;;  %v4047_v36 = vadd.f32 %v4031_v53, %v3634_v27  ;;  %v3979_v0 = vmul.f32 %v9042_v54, %v3956_v17  ;;  %v4001_v59 = vadd.f32 %v9053_v26, %v3978_v39 }
 0x659   : > { %v10165_v54 = vmov 0   ;;  %6261 = vmatpush3.bf16.msra.mxu0 %v6665_v35  ;;  %v9317_v44 = vrot.slane %v4078_v57, %v10174_v23 }
 0x65a   : > { %v4048_v24 = vadd.f32 %v4032_v18, %v3638_v46  ;;  %v4002_v30 = vadd.f32 %v9053_v26, %v3979_v0  ;;  %v4033_v14 = vmul.f32 %v4017_v25, %v4001_v59  ;;  %v10168_v26 = vld [vmem:[#allocation61_spill] sm:$0xff]  ;;  %6262 = vmatprep.subr.bf16.mxu0 %v6666_v1 }
 0x65c   : > { %v4057_v6 = vpack.c.bf16 %v4048_v24, %v4047_v36  ;;  %v4034_v31 = vmul.f32 %v4018_v51, %v4002_v30  ;;  %v4049_v9 = vadd.f32 %v4033_v14, %v3644_v13 }
 0x65d   : > { %6263 = vmatpush3.bf16.msra.mxu0 %v6666_v1 }
 0x65e   : > { %6246 = vmatprep.mubr.bf16.mxu1 %v4057_v6  ;;  %v4050_v7 = vadd.f32 %v4034_v31, %v3648_v28  ;;  %6264 = vmatprep.subr.bf16.mxu0 %v6667_v4 }
 0x660   : > { %v4058_v50 = vpack.c.bf16 %v4050_v7, %v4049_v9 }
 0x661   : > { %6265 = vmatpush3.bf16.msra.mxu0 %v6667_v4 }
 0x662   : > { %6247 = vmatmul.mubr.bf16.gmra.mrb[108].mxu1 %v4058_v50 }
 0x663   : > { %4698 = vmatprep.mubr.bf16.mxu1 %v10165_v54 }
 0x66a   : > { %4699 = vmatmul.mubr.bf16.vlgmr.msra.gmra.mrb[112].mxu1 %v10166_v16 }
 0x66b   : > { %4708 = vmatprep.mubr.bf16.mxu1 %v10165_v54 }
 0x672   : > { %4709 = vmatmul.mubr.bf16.gmra.mrb[116].mxu1 %v10167_v55 }
 0x673   : > { %4718 = vmatprep.mubr.bf16.mxu1 %v10165_v54 }
 0x67a   : > { %4719 = vmatmul.mubr.bf16.gmra.mrb[120].mxu1 %v10168_v26 }
 0x67b   : > { %4728 = vmatprep.mubr.bf16.mxu1 %v10165_v54 }
 0x682   : > { %4729 = vmatmul.mubr.bf16.gmra.mrb[124].mxu1 %v10169_v20 }
 0x683   : > { %4738 = vmatprep.mubr.bf16.mxu1 %v10165_v54 }
 0x68a   : > { %4739 = vmatmul.mubr.bf16.gmra.mrb[128].mxu1 %v10170_v63 }
 0x68b   : > { %4748 = vmatprep.mubr.bf16.mxu1 %v10165_v54 }
 0x692   : > { %4749 = vmatmul.mubr.bf16.gmra.mrb[132].mxu1 %v10171_v49 }
 0x693   : > { %4758 = vmatprep.mubr.bf16.mxu1 %v10165_v54 }
 0x69a   : > { %4759 = vmatmul.mubr.bf16.gmra.mrb[136].mxu1 %v10172_v10 }
 0x69b   : > { %4768 = vmatprep.mubr.bf16.mxu1 %v10165_v54 }
 0x6a2   : > { %4769 = vmatmul.mubr.bf16.gmra.mrb[140].mxu1 %v10173_v12 }
 0x702   : > { %v6236_v61 = vpop.f32.mrb[96].mxu1 }
 0x703   : > { %v4174_v2 = vadd.f32 %v6236_v61, %v9317_v44  ;;  %v4165_v52 = vpop.f32.mrb[97].mxu1 }
 0x704   : > { %v4166_v48 = vadd.f32 %v4165_v52, %v9317_v44  ;;  %v6237_v19 = vpop.f32.mrb[98].mxu1 }
 0x705   : > { %v5765_v34 = vmul.f32 -1.442695, %v4174_v2  ;;  %v4177_v3 = vadd.f32 %v6237_v19, %v9317_v44  ;;  %v4168_v27 = vpop.f32.mrb[99].mxu1 }
 0x706   : > { %v5763_v33 = vmul.f32 -1.442695, %v4166_v48  ;;  %v4169_v60 = vadd.f32 %v4168_v27, %v9317_v44 }
 0x707   : > { %6932 = vpow2.f32 %v5765_v34  ;;  %v5766_v32 = vmul.f32 -1.442695, %v4177_v3 }
 0x708   : > { %6934 = vpow2.f32 %v5763_v33  ;;  %v5764_v29 = vmul.f32 -1.442695, %v4169_v60 }
 0x709   : > { %6936 = vpow2.f32 %v5766_v32 }
 0x70a   : > { %6938 = vpow2.f32 %v5764_v29 }
 0x711   : > { %v6933_v53 = vpop.eup %6932 }
 0x712   : > { %v6935_v17 = vpop.eup %6934  ;;  %v4278_v39 = vadd.f32 1.0, %v6933_v53 }
 0x713   : > { %v6937_v37 = vpop.eup %6936  ;;  %v4276_v46 = vadd.f32 1.0, %v6935_v17 }
 0x714   : > { %v6939_v25 = vpop.eup %6938  ;;  %6940 = vrcp.f32 %v4278_v39  ;;  %v4279_v18 = vadd.f32 1.0, %v6937_v37  ;;  %v6240_v0 = vpop.f32.mrb[100].mxu1 }
 0x715   : > { %6942 = vrcp.f32 %v4276_v46  ;;  %v4277_v36 = vadd.f32 1.0, %v6939_v25  ;;  %v4190_v59 = vadd.f32 %v6240_v0, %v9317_v44  ;;  %v4181_v41 = vpop.f32.mrb[101].mxu1 }
 0x716   : > { %6944 = vrcp.f32 %v4279_v18  ;;  %v4182_v13 = vadd.f32 %v4181_v41, %v9317_v44  ;;  %v6241_v51 = vpop.f32.mrb[102].mxu1 }
 0x717   : > { %6946 = vrcp.f32 %v4277_v36  ;;  %v5769_v24 = vmul.f32 -1.442695, %v4190_v59  ;;  %v4193_v30 = vadd.f32 %v6241_v51, %v9317_v44  ;;  %v4184_v14 = vpop.f32.mrb[103].mxu1 }
 0x718   : > { %v5767_v56 = vmul.f32 -1.442695, %v4182_v13  ;;  %v4185_v28 = vadd.f32 %v4184_v14, %v9317_v44 }
 0x719   : > { %6948 = vpow2.f32 %v5769_v24  ;;  %v5770_v6 = vmul.f32 -1.442695, %v4193_v30 }
 0x71a   : > { %6950 = vpow2.f32 %v5767_v56  ;;  %v5768_v31 = vmul.f32 -1.442695, %v4185_v28 }
 0x71b   : > { %6952 = vpow2.f32 %v5770_v6 }
 0x71c   : > { %6954 = vpow2.f32 %v5768_v31 }
 0x71e   : > { %v6941_v9 = vpop.eup %6940 }
 0x71f   : > { %v6943_v7 = vpop.eup %6942  ;;  %v4326_v16 = vmul.f32 %v6941_v9, %v4174_v2 }
 0x720   : > { %v6945_v50 = vpop.eup %6944  ;;  %v4324_v26 = vmul.f32 %v6943_v7, %v4166_v48 }
 0x721   : > { %v6947_v54 = vpop.eup %6946  ;;  %v4327_v55 = vmul.f32 %v6945_v50, %v4177_v3 }
 0x722   : > { %v4325_v20 = vmul.f32 %v6947_v54, %v4169_v60 }
 0x723   : > { %v4341_v63 = vpack.c.bf16 %v4327_v55, %v4326_v16  ;;  %v6949_v49 = vpop.eup %6948 }
 0x724   : > { %v4340_v47 = vpack.c.bf16 %v4325_v20, %v4324_v26  ;;  %v6951_v10 = vpop.eup %6950  ;;  %v4282_v35 = vadd.f32 1.0, %v6949_v49 }
 0x725   : > { %v6244_v1 = vpop.f32.mrb[104].mxu1  ;;  %v6953_v12 = vpop.eup %6952  ;;  %v4280_v4 = vadd.f32 1.0, %v6951_v10 }
 0x726   : > { %v9328_v43 = vadd.f32 %v6244_v1, %v9317_v44  ;;  %v4197_v57 = vpop.f32.mrb[105].mxu1  ;;  %6266 = vmatprep.mubr.bf16.mxu0 %v4340_v47  ;;  %v6955_v61 = vpop.eup %6954  ;;  %6956 = vrcp.f32 %v4282_v35  ;;  %v4283_v52 = vadd.f32 1.0, %v6953_v12 }
 0x727   : > { %v9331_v2 = vadd.f32 %v4197_v57, %v9317_v44  ;;  %v6245_v48 = vpop.f32.mrb[106].mxu1  ;;  %6267 = vmatmul.mubr.bf16.vlgmr.msra.gmra.mrb[112].mxu0 %v4341_v63  ;;  %6958 = vrcp.f32 %v4280_v4  ;;  %v4281_v19 = vadd.f32 1.0, %v6955_v61 }
 0x728   : > { %v5773_v34 = vmul.f32 -1.442695, %v9328_v43  ;;  %v4209_v3 = vadd.f32 %v6245_v48, %v9317_v44  ;;  %v4200_v27 = vpop.f32.mrb[107].mxu1  ;;  %6960 = vrcp.f32 %v4283_v52 }
 0x729   : > { %v5771_v33 = vmul.f32 -1.442695, %v9331_v2  ;;  %v4201_v60 = vadd.f32 %v4200_v27, %v9317_v44  ;;  %6962 = vrcp.f32 %v4281_v19 }
 0x72a   : > { %v5774_v32 = vmul.f32 -1.442695, %v4209_v3  ;;  %6964 = vpow2.f32 %v5773_v34 }
 0x72b   : > { %v5772_v29 = vmul.f32 -1.442695, %v4201_v60  ;;  %6966 = vpow2.f32 %v5771_v33 }
 0x72c   : > { %6968 = vpow2.f32 %v5774_v32 }
 0x72d   : > { %6970 = vpow2.f32 %v5772_v29 }
 0x730   : > { %v6957_v53 = vpop.eup %6956 }
 0x731   : > { %v6959_v17 = vpop.eup %6958  ;;  %v4330_v46 = vmul.f32 %v6957_v53, %v4190_v59 }
 0x732   : > { %v6961_v39 = vpop.eup %6960  ;;  %v4328_v36 = vmul.f32 %v6959_v17, %v4182_v13 }
 0x733   : > { %v6963_v37 = vpop.eup %6962  ;;  %v4331_v25 = vmul.f32 %v6961_v39, %v4193_v30 }
 0x734   : > { %v6965_v18 = vpop.eup %6964  ;;  %v4329_v0 = vmul.f32 %v6963_v37, %v4185_v28 }
 0x735   : > { %v6248_v41 = vpop.f32.mrb[108].mxu1  ;;  %v6967_v51 = vpop.eup %6966  ;;  %v4286_v24 = vadd.f32 1.0, %v6965_v18  ;;  %v4343_v6 = vpack.c.bf16 %v4331_v25, %v4330_v46 }
 0x736   : > { %v9338_v14 = vadd.f32 %v6248_v41, %v9317_v44  ;;  %v4213_v56 = vpop.f32.mrb[109].mxu1  ;;  %v6969_v31 = vpop.eup %6968  ;;  %v4284_v9 = vadd.f32 1.0, %v6967_v51  ;;  %v4342_v54 = vpack.c.bf16 %v4329_v0, %v4328_v36 }
 0x737   : > { %v9341_v7 = vadd.f32 %v4213_v56, %v9317_v44  ;;  %v6249_v50 = vpop.f32.mrb[110].mxu1  ;;  %v6971_v59 = vpop.eup %6970  ;;  %6972 = vrcp.f32 %v4286_v24  ;;  %v4287_v30 = vadd.f32 1.0, %v6969_v31 }
 0x738   : > { %v5777_v13 = vmul.f32 -1.442695, %v9338_v14  ;;  %v4225_v28 = vadd.f32 %v6249_v50, %v9317_v44  ;;  %v4216_v16 = vpop.f32.mrb[111].mxu1  ;;  %6974 = vrcp.f32 %v4284_v9  ;;  %v4285_v55 = vadd.f32 1.0, %v6971_v59  ;;  %6270 = vmatprep.mubr.bf16.mxu0 %v4342_v54 }
 0x739   : > { %v5775_v26 = vmul.f32 -1.442695, %v9341_v7  ;;  %v4217_v20 = vadd.f32 %v4216_v16, %v9317_v44  ;;  %6976 = vrcp.f32 %v4287_v30  ;;  %6271 = vmatmul.mubr.bf16.gmra.mrb[116].mxu0 %v4343_v6 }
 0x73a   : > { %v5778_v63 = vmul.f32 -1.442695, %v4225_v28  ;;  %6978 = vrcp.f32 %v4285_v55 }
 0x73b   : > { %v5776_v49 = vmul.f32 -1.442695, %v4217_v20  ;;  %6980 = vpow2.f32 %v5777_v13 }
 0x73c   : > { %6982 = vpow2.f32 %v5775_v26 }
 0x73d   : > { %v9347_v47 = vpop.f32.mrb[112].mxu1  ;;  %6984 = vpow2.f32 %v5778_v63 }
 0x73e   : > { %v9349_v10 = vpop.f32.mrb[113].mxu1  ;;  %6986 = vpow2.f32 %v5776_v49 }
 0x73f   : > { %v9351_v35 = vpop.f32.mrb[114].mxu1 }
 0x740   : > { %v9353_v1 = vpop.f32.mrb[115].mxu1 }
 0x741   : > { %v6973_v12 = vpop.eup %6972 }
 0x742   : > { %v6975_v44 = vpop.eup %6974  ;;  %v4334_v61 = vmul.f32 %v6973_v12, %v9328_v43 }
 0x743   : > { %v6977_v4 = vpop.eup %6976  ;;  %v4332_v34 = vmul.f32 %v6975_v44, %v9331_v2 }
 0x744   : > { %v6979_v57 = vpop.eup %6978  ;;  %v4335_v52 = vmul.f32 %v6977_v4, %v4209_v3 }
 0x745   : > { %v9356_v48 = vpop.f32.mrb[116].mxu1  ;;  %v6981_v19 = vpop.eup %6980  ;;  %v4333_v27 = vmul.f32 %v6979_v57, %v4201_v60 }
 0x746   : > { %v9359_v33 = vpop.f32.mrb[117].mxu1  ;;  %v6983_v32 = vpop.eup %6982  ;;  %v4290_v29 = vadd.f32 1.0, %v6981_v19  ;;  %v4345_v17 = vpack.c.bf16 %v4335_v52, %v4334_v61 }
 0x747   : > { %v9361_v53 = vpop.f32.mrb[118].mxu1  ;;  %v6985_v39 = vpop.eup %6984  ;;  %v4288_v37 = vadd.f32 1.0, %v6983_v32  ;;  %v4344_v25 = vpack.c.bf16 %v4333_v27, %v4332_v34  ;;  %v5795_v32 = vld [vmem:[%s9916_s18 + $0x1] sm:$0x1] }
 0x748   : > { %v9363_v46 = vpop.f32.mrb[119].mxu1  ;;  %v6987_v43 = vpop.eup %6986  ;;  %6988 = vrcp.f32 %v4290_v29  ;;  %v4291_v3 = vadd.f32 1.0, %v6985_v39  ;;  %v10182_v29 = vld [vmem:[#allocation49_spill] sm:$0xff]  ;;  %v10184_v39 = vld [vmem:[#allocation92_spill] sm:$0xff] }
 0x749   : > { %6990 = vrcp.f32 %v4288_v37  ;;  %v4289_v18 = vadd.f32 1.0, %v6987_v43  ;;  %6274 = vmatprep.mubr.bf16.mxu0 %v4344_v25  ;;  %v4367_v25 = vunpack.c.l.bf16 %v5795_v32 }
 0x74a   : > { %6992 = vrcp.f32 %v4291_v3  ;;  %6275 = vmatmul.mubr.bf16.gmra.mrb[120].mxu0 %v4345_v17  ;;  %v10183_v17 = vsub.s32 4, %v10182_v29 }
 0x74b   : > { %6994 = vrcp.f32 %v4289_v18  ;;  %v9425_v3 = vrot.slane %v4367_v25, %v10174_v23 }
 0x74c   : > { %v3395_v37 = vrot.slane %v10184_v39, %v10183_v17  ;;  %v10188_v39 = vld [vmem:[#allocation57_spill] sm:$0xff] }
 0x74d   : > { %v9365_v2 = vpop.f32.mrb[120].mxu1 }
 0x74e   : > { %v9367_v60 = vpop.f32.mrb[121].mxu1  ;;  %v9422_v43 = vrot.slane %v3395_v37, %v10174_v23 }
 0x74f   : > { %v9369_v36 = vpop.f32.mrb[122].mxu1 }
 0x750   : > { %v9371_v0 = vpop.f32.mrb[123].mxu1  ;;  %v3690_v37 = vadd.f32 %v10188_v39, %v9422_v43 }
 0x752   : > { %v6989_v41 = vpop.eup %6988 }
 0x753   : > { %v6991_v51 = vpop.eup %6990  ;;  %v4338_v31 = vmul.f32 %v6989_v41, %v9338_v14  ;;  %v10185_v41 = vld [vmem:[#allocation53_spill] sm:$0xff] }
 0x754   : > { %v6993_v24 = vpop.eup %6992  ;;  %v4336_v54 = vmul.f32 %v6991_v51, %v9341_v7  ;;  %v3695_v51 = vadd.f32 %v10185_v41, %v9422_v43 }
 0x755   : > { %v9373_v56 = vpop.f32.mrb[124].mxu1  ;;  %v6995_v6 = vpop.eup %6994  ;;  %v4339_v9 = vmul.f32 %v6993_v24, %v4225_v28 }
 0x756   : > { %v9376_v50 = vpop.f32.mrb[125].mxu1  ;;  %v4337_v59 = vmul.f32 %v6995_v6, %v4217_v20 }
 0x757   : > { %v9379_v30 = vpop.f32.mrb[126].mxu1  ;;  %v4347_v16 = vpack.c.bf16 %v4339_v9, %v4338_v31  ;;  %v10186_v31 = vld [vmem:[#allocation58_spill] sm:$0xff] }
 0x758   : > { %v9381_v13 = vpop.f32.mrb[127].mxu1  ;;  %v4346_v55 = vpack.c.bf16 %v4337_v59, %v4336_v54  ;;  %v3687_v9 = vadd.f32 %v10186_v31, %v9422_v43 }
 0x75a   : > { %6278 = vmatprep.mubr.bf16.mxu0 %v4346_v55 }
 0x75b   : > { %6279 = vmatmul.mubr.bf16.gmra.mrb[124].mxu0 %v4347_v16  ;;  %v10187_v16 = vld [vmem:[#allocation56_spill] sm:$0xff] }
 0x75c   : > { %v3698_v55 = vadd.f32 %v10187_v16, %v9422_v43 }
 0x75d   : > { %v9383_v26 = vpop.f32.mrb[128].mxu1 }
 0x75e   : > { %v9385_v63 = vpop.f32.mrb[129].mxu1 }
 0x75f   : > { %v9387_v49 = vpop.f32.mrb[130].mxu1 }
 0x760   : > { %v9389_v14 = vpop.f32.mrb[131].mxu1 }
 0x765   : > { %v9391_v28 = vpop.f32.mrb[132].mxu1 }
 0x766   : > { %v9393_v7 = vpop.f32.mrb[133].mxu1 }
 0x767   : > { %v9395_v20 = vpop.f32.mrb[134].mxu1 }
 0x768   : > { %v9397_v12 = vpop.f32.mrb[135].mxu1 }
 0x76d   : > { %v9399_v44 = vpop.f32.mrb[136].mxu1 }
 0x76e   : > { %10175 = vst [vmem:[#allocation70_spill] sm:$0xff] %v9399_v44  ;;  %v9401_v4 = vpop.f32.mrb[137].mxu1 }
 0x76f   : > { %v9403_v57 = vpop.f32.mrb[138].mxu1 }
 0x770   : > { %10176 = vst [vmem:[#allocation71_spill] sm:$0xff] %v9403_v57  ;;  %v9405_v61 = vpop.f32.mrb[139].mxu1 }
 0x771   : > { %10177 = vst [vmem:[#allocation73_spill] sm:$0xff] %v9405_v61 }
 0x775   : > { %v9407_v52 = vpop.f32.mrb[140].mxu1 }
 0x776   : > { %10178 = vst [vmem:[#allocation75_spill] sm:$0xff] %v9407_v52  ;;  %v9409_v19 = vpop.f32.mrb[141].mxu1 }
 0x777   : > { %10179 = vst [vmem:[#allocation55_spill] sm:$0xff] %v9409_v19  ;;  %v9411_v34 = vpop.f32.mrb[142].mxu1 }
 0x778   : > { %10180 = vst [vmem:[#allocation77_spill] sm:$0xff] %v9411_v34  ;;  %v9413_v27 = vpop.f32.mrb[143].mxu1  ;;  %v10189_v34 = vld [vmem:[#allocation67_spill] sm:$0xff] }
 0x779   : > { %10181 = vst [vmem:[#allocation52_spill] sm:$0xff] %v9413_v27 }
 0x7fa   : > { %v6268_v18 = vpop.f32.mrb[112].mxu0 }
 0x7fb   : > { %v4463_v24 = vadd.f32 %v6268_v18, %v9425_v3  ;;  %v4454_v6 = vpop.f32.mrb[113].mxu0 }
 0x7fc   : > { %v4455_v54 = vadd.f32 %v4454_v6, %v9425_v3  ;;  %v6269_v59 = vpop.f32.mrb[114].mxu0  ;;  %v10190_v6 = vld [vmem:[#allocation54_spill] sm:$0xff] }
 0x7fd   : > { %v4519_v32 = vmul.f32 %v4463_v24, %v3695_v51  ;;  %v4466_v29 = vadd.f32 %v6269_v59, %v9425_v3  ;;  %v4457_v17 = vpop.f32.mrb[115].mxu0  ;;  %v10191_v51 = vld [vmem:[#allocation68_spill] sm:$0xff] }
 0x7fe   : > { %v4517_v25 = vmul.f32 %v4455_v54, %v3687_v9  ;;  %v4458_v18 = vadd.f32 %v4457_v17, %v9425_v3  ;;  %v10192_v9 = vld [vmem:[#allocation69_spill] sm:$0xff] }
 0x7ff   : > { %v4520_v41 = vmul.f32 %v4466_v29, %v3698_v55  ;;  %v9440_v52 = vadd.f32 %v4519_v32, %v10189_v34  ;;  %v10193_v29 = vld [vmem:[#allocation80_spill] sm:$0xff] }
 0x800   : > { %v4518_v31 = vmul.f32 %v4458_v18, %v3690_v37  ;;  %v9448_v24 = vadd.f32 %v4517_v25, %v10191_v51  ;;  %v3711_v17 = vadd.f32 %v10193_v29, %v9422_v43  ;;  %v10194_v25 = vld [vmem:[#allocation81_spill] sm:$0xff] }
 0x801   : > { %4783 = vadd.xlane.f32.xlu1 %v9440_v52  ;;  %v9444_v57 = vadd.f32 %v4520_v41, %v10190_v6  ;;  %v4829_v16 = vmul.f32 %v9440_v52, %v9440_v52  ;;  %v3703_v18 = vadd.f32 %v10194_v25, %v9422_v43  ;;  %v10195_v6 = vld [vmem:[#allocation82_spill] sm:$0xff] }
 0x802   : > { %v9452_v54 = vadd.f32 %v4518_v31, %v10192_v9  ;;  %v4827_v34 = vmul.f32 %v9448_v24, %v9448_v24  ;;  %v3714_v51 = vadd.f32 %v10195_v6, %v9422_v43 }
 0x803   : > { %4785 = vadd.xlane.f32.xlu0 %v9444_v57  ;;  %v4830_v32 = vmul.f32 %v9444_v57, %v9444_v57 }
 0x804   : > { %v4828_v59 = vmul.f32 %v9452_v54, %v9452_v54 }
 0x805   : > { %4779 = vadd.xlane.f32.xlu1 %v9448_v24 }
 0x807   : > { %4781 = vadd.xlane.f32.xlu0 %v9452_v54 }
 0x809   : > { %4843 = vadd.xlane.f32.xlu1 %v4827_v34 }
 0x80b   : > { %4845 = vadd.xlane.f32.xlu0 %v4828_v59 }
 0x80c   : > { %v6272_v55 = vpop.f32.mrb[116].mxu0 }
 0x80d   : > { %4847 = vadd.xlane.f32.xlu1 %v4829_v16  ;;  %v4479_v39 = vadd.f32 %v6272_v55, %v9425_v3  ;;  %v4470_v37 = vpop.f32.mrb[117].mxu0  ;;  %v10196_v16 = vld [vmem:[#allocation83_spill] sm:$0xff] }
 0x80e   : > { %v4471_v41 = vadd.f32 %v4470_v37, %v9425_v3  ;;  %v6273_v31 = vpop.f32.mrb[118].mxu0  ;;  %v3706_v29 = vadd.f32 %v10196_v16, %v9422_v43 }
 0x80f   : > { %4849 = vadd.xlane.f32.xlu0 %v4830_v32  ;;  %v4523_v9 = vmul.f32 %v4479_v39, %v3711_v17  ;;  %v4482_v34 = vadd.f32 %v6273_v31, %v9425_v3  ;;  %v4473_v59 = vpop.f32.mrb[119].mxu0  ;;  %v6668_v39 = vld [vmem:[%s9919_s21] sm:$0xff]  }
 0x810   : > { %v4521_v27 = vmul.f32 %v4471_v41, %v3703_v18  ;;  %v4474_v55 = vadd.f32 %v4473_v59, %v9425_v3  ;;  %6282 = vmatprep.subr.bf16.mxu0 %v6668_v39  ;;  %v10197_v18 = vld [vmem:[#allocation84_spill] sm:$0xff] }
 0x811   : > { %v4524_v44 = vmul.f32 %v4482_v34, %v3714_v51  ;;  %v9476_v25 = vadd.f32 %v4523_v9, %v8851_v62  ;;  %6283 = vmatpush3.bf16.msra.mxu0 %v6668_v39  ;;  %v3727_v41 = vadd.f32 %v10197_v18, %v9422_v43  ;;  %v10198_v51 = vld [vmem:[#allocation85_spill] sm:$0xff] }
 0x812   : > { %v4522_v37 = vmul.f32 %v4474_v55, %v3706_v29  ;;  %v9484_v17 = vadd.f32 %v4521_v27, %v8860_v15  ;;  %v3719_v9 = vadd.f32 %v10198_v51, %v9422_v43  ;;  %v10199_v29 = vld [vmem:[#allocation86_spill] sm:$0xff] }
 0x813   : > { %4791 = vadd.xlane.f32.xlu1 %v9476_v25  ;;  %v9480_v32 = vadd.f32 %v4524_v44, %v8856_v38  ;;  %v6669_v44 = vld [vmem:[%s9919_s21 + $0x8] sm:$0xff]   ;;  %v3730_v55 = vadd.f32 %v10199_v29, %v9422_v43 }
 0x814   : > { %v9491_v62 = vadd.f32 %v4522_v37, %v8864_v5  ;;  %v4831_v38 = vmul.f32 %v9484_v17, %v9484_v17  ;;  %v4833_v5 = vmul.f32 %v9476_v25, %v9476_v25  ;;  %6284 = vmatprep.subr.bf16.mxu0 %v6669_v44 }
 0x815   : > { %4793 = vadd.xlane.f32.xlu0 %v9480_v32  ;;  %v4834_v16 = vmul.f32 %v9480_v32, %v9480_v32  ;;  %6285 = vmatpush3.bf16.msra.mxu0 %v6669_v44 }
 0x816   : > { %v4832_v15 = vmul.f32 %v9491_v62, %v9491_v62 }
 0x817   : > { %4787 = vadd.xlane.f32.xlu1 %v9484_v17 }
 0x819   : > { %4789 = vadd.xlane.f32.xlu0 %v9491_v62 }
 0x81b   : > { %4851 = vadd.xlane.f32.xlu1 %v4831_v38 }
 0x81d   : > { %v6276_v27 = vpop.f32.mrb[120].mxu0  ;;  %4853 = vadd.xlane.f32.xlu0 %v4832_v15  ;;  %v6670_v15 = vld [vmem:[%s9919_s21 + $0x10] sm:$0xff]  }
 0x81e   : > { %v4495_v31 = vadd.f32 %v6276_v27, %v9425_v3  ;;  %v4486_v6 = vpop.f32.mrb[121].mxu0  ;;  %v10200_v27 = vld [vmem:[#allocation87_spill] sm:$0xff]  ;;  %6286 = vmatprep.subr.bf16.mxu0 %v6670_v15 }
 0x81f   : > { %v4487_v34 = vadd.f32 %v4486_v6, %v9425_v3  ;;  %v6277_v59 = vpop.f32.mrb[122].mxu0  ;;  %4855 = vadd.xlane.f32.xlu1 %v4833_v5  ;;  %v3722_v18 = vadd.f32 %v10200_v27, %v9422_v43  ;;  %6287 = vmatpush3.bf16.msra.mxu0 %v6670_v15  ;;  %v10202_v15 = vld [vmem:[#allocation89_spill] sm:$0xff] }
 0x820   : > { %v4527_v37 = vmul.f32 %v4495_v31, %v3727_v41  ;;  %v4498_v39 = vadd.f32 %v6277_v59, %v9425_v3  ;;  %v4489_v38 = vpop.f32.mrb[123].mxu0  ;;  %v6671_v59 = vld [vmem:[%s9919_s21 + $0x18] sm:$0xff]   ;;  %v3735_v27 = vadd.f32 %v10202_v15, %v9422_v43 }
 0x821   : > { %v4525_v6 = vmul.f32 %v4487_v34, %v3719_v9  ;;  %v4490_v5 = vadd.f32 %v4489_v38, %v9425_v3  ;;  %4857 = vadd.xlane.f32.xlu0 %v4834_v16  ;;  %6288 = vmatprep.subr.bf16.mxu0 %v6671_v59 }
 0x822   : > { %v4528_v51 = vmul.f32 %v4498_v39, %v3730_v55  ;;  %v9521_v44 = vadd.f32 %v4527_v37, %v8889_v11  ;;  %v10201_v55 = vld [vmem:[#allocation88_spill] sm:$0xff] }
 0x823   : > { %v4526_v41 = vmul.f32 %v4490_v5, %v3722_v18  ;;  %v9532_v9 = vadd.f32 %v4525_v6, %v8901_v42  ;;  %6289 = vmatpush3.bf16.msra.mxu0 %v6671_v59  ;;  %v3743_v37 = vadd.f32 %v10201_v55, %v9422_v43 }
 0x824   : > { %4799 = vadd.xlane.f32.xlu1 %v9521_v44  ;;  %v9525_v31 = vadd.f32 %v4528_v51, %v8894_v58  ;;  %v6672_v58 = vld [vmem:[%s9919_s21 + $0x20] sm:$0xff]   ;;  %v4837_v29 = vmul.f32 %v9521_v44, %v9521_v44  ;;  %v6674_v51 = vld [vmem:[%s9919_s21 + $0x30] sm:$0xff]  }
 0x825   : > { %v9536_v11 = vadd.f32 %v4526_v41, %v8905_v8  ;;  %v4835_v34 = vmul.f32 %v9532_v9, %v9532_v9  ;;  %6290 = vmatprep.subr.bf16.mxu0 %v6672_v58  ;;  %v6673_v8 = vld [vmem:[%s9919_s21 + $0x28] sm:$0xff]   ;;  %v10203_v41 = vld [vmem:[#allocation90_spill] sm:$0xff] }
 0x826   : > { %4801 = vadd.xlane.f32.xlu0 %v9525_v31  ;;  %v4838_v5 = vmul.f32 %v9525_v31, %v9525_v31  ;;  %v3746_v59 = vadd.f32 %v10203_v41, %v9422_v43 }
 0x827   : > { %6291 = vmatpush3.bf16.msra.mxu0 %v6672_v58  ;;  %v4836_v42 = vmul.f32 %v9536_v11, %v9536_v11 }
 0x828   : > { %4795 = vadd.xlane.f32.xlu1 %v9532_v9  ;;  %6292 = vmatprep.subr.bf16.mxu0 %v6673_v8 }
 0x82a   : > { %4797 = vadd.xlane.f32.xlu0 %v9536_v11 }
 0x82b   : > { %6293 = vmatpush3.bf16.msra.mxu0 %v6673_v8  ;;  %v10204_v8 = vld [vmem:[#allocation91_spill] sm:$0xff] }
 0x82c   : > { %4859 = vadd.xlane.f32.xlu1 %v4835_v34  ;;  %6294 = vmatprep.subr.bf16.mxu0 %v6674_v51 }
 0x82e   : > { %v6280_v16 = vpop.f32.mrb[124].mxu0  ;;  %4861 = vadd.xlane.f32.xlu0 %v4836_v42 }
 0x82f   : > { %v4511_v39 = vadd.f32 %v6280_v16, %v9425_v3  ;;  %v4502_v38 = vpop.f32.mrb[125].mxu0  ;;  %v3738_v16 = vadd.f32 %v10204_v8, %v9422_v43  ;;  %6295 = vmatpush3.bf16.msra.mxu0 %v6674_v51  ;;  %v4565_v51 = vld [vmem:[%s9918_s20] sm:$0x3] }
 0x830   : > { %v4503_v18 = vadd.f32 %v4502_v38, %v9425_v3  ;;  %v6281_v6 = vpop.f32.mrb[126].mxu0  ;;  %4863 = vadd.xlane.f32.xlu1 %v4837_v29  ;;  %v4566_v8 = vunpack.c.l.bf16 %v4565_v51 }
 0x831   : > { %v4531_v58 = vmul.f32 %v4511_v39, %v3743_v37  ;;  %v4514_v34 = vadd.f32 %v6281_v6, %v9425_v3  ;;  %v4505_v42 = vpop.f32.mrb[127].mxu0  ;;  %v6675_v37 = vld [vmem:[%s9919_s21 + $0x38] sm:$0xff]  }
 0x832   : > { %v4529_v55 = vmul.f32 %v4503_v18, %v3735_v27  ;;  %v4506_v29 = vadd.f32 %v4505_v42, %v9425_v3  ;;  %4865 = vadd.xlane.f32.xlu0 %v4838_v5  ;;  %6296 = vmatprep.subr.bf16.mxu0 %v6675_v37 }
 0x833   : > { %v4532_v38 = vmul.f32 %v4514_v34, %v3746_v59  ;;  %v9569_v15 = vadd.f32 %v4531_v58, %v10157_v45  ;;  %6297 = vmatpush3.bf16.msra.mxu0 %v6675_v37 }
 0x834   : > { %v4530_v19 = vmul.f32 %v4506_v29, %v3738_v16  ;;  %v9580_v43 = vadd.f32 %v4529_v55, %v8947_v21 }
 0x835   : > { %10205 = vst [vmem:[#allocation72_spill] sm:$0xff] %v9569_v15  ;;  %4807 = vadd.xlane.f32.xlu1 %v9569_v15  ;;  %v9576_v39 = vadd.f32 %v4532_v38, %v10159_v22  ;;  %v4841_v21 = vmul.f32 %v9569_v15, %v9569_v15 }
 0x836   : > { %10207 = vst [vmem:[#allocation74_spill] sm:$0xff] %v9580_v43  ;;  %v9584_v45 = vadd.f32 %v4530_v19, %v8958_v40  ;;  %v4839_v3 = vmul.f32 %v9580_v43, %v9580_v43 }
 0x837   : > { %10206 = vst [vmem:[#allocation79_spill] sm:$0xff] %v9576_v39  ;;  %4809 = vadd.xlane.f32.xlu0 %v9576_v39  ;;  %v4842_v27 = vmul.f32 %v9576_v39, %v9576_v39  ;;  %v10209_v39 = vld [vmem:[#allocation51_spill] sm:$0xff] }
 0x838   : > { %10208 = vst [vmem:[#allocation76_spill] sm:$0xff] %v9584_v45  ;;  %v4840_v22 = vmul.f32 %v9584_v45, %v9584_v45  ;;  %v4575_v15 = vrot.slane %v4566_v8, %v10209_v39 }
 0x839   : > { %4803 = vadd.xlane.f32.xlu1 %v9580_v43 }
 0x83b   : > { %4805 = vadd.xlane.f32.xlu0 %v9584_v45  ;;  %v4571_v45 = vrot.slane %v4566_v8, %v10174_v23 }
 0x83d   : > { %4867 = vadd.xlane.f32.xlu1 %v4839_v3  ;;  %v9608_v39 = vrot.slane %v4571_v45, %v10174_v23 }
 0x83f   : > { %4869 = vadd.xlane.f32.xlu0 %v4840_v22  ;;  %v4705_v45 = vadd.f32 %v9351_v35, %v9608_v39 }
 0x841   : > { %4871 = vadd.xlane.f32.xlu1 %v4841_v21 }
 0x843   : > { %4873 = vadd.xlane.f32.xlu0 %v4842_v27 }
 0x88e   : > { %v4784_v40 = vpop.xlane.xlu1 %4783 }
 0x88f   : > { %v4813_v58 = vmul.f32 0.0078125, %v4784_v40 }
 0x890   : > { %v4786_v19 = vpop.xlane.xlu0 %4785 }
 0x891   : > { %v9598_v16 = vmul.f32 0.0078125, %v4786_v19  ;;  %v4893_v22 = vmul.f32 %v4813_v58, %v4813_v58  ;;  %v4925_v35 = vsub.f32 %v9440_v52, %v4813_v58 }
 0x892   : > { %v4780_v18 = vpop.xlane.xlu1 %4779 }
 0x893   : > { %v4811_v6 = vmul.f32 0.0078125, %v4780_v18 }
 0x894   : > { %v4782_v5 = vpop.xlane.xlu0 %4781 }
 0x895   : > { %v4812_v41 = vmul.f32 0.0078125, %v4782_v5  ;;  %v4891_v34 = vmul.f32 %v4811_v6, %v4811_v6  ;;  %v4894_v5 = vmul.f32 %v9598_v16, %v9598_v16 }
 0x896   : > { %v4844_v59 = vpop.xlane.xlu1 %4843 }
 0x897   : > { %v4875_v42 = vmul.f32 0.0078125, %v4844_v59  ;;  %v4892_v29 = vmul.f32 %v4812_v41, %v4812_v41 }
 0x898   : > { %v4846_v55 = vpop.xlane.xlu0 %4845 }
 0x899   : > { %v4907_v38 = vsub.f32 %v4875_v42, %v4891_v34  ;;  %v4876_v37 = vmul.f32 0.0078125, %v4846_v55  ;;  %v9605_v55 = vrot.slane %v4575_v15, %v10174_v23 }
 0x89a   : > { %v4848_v3 = vpop.xlane.xlu1 %4847 }
 0x89b   : > { %v4939_v21 = vadd.f32 1e-06, %v4907_v38  ;;  %v4908_v27 = vsub.f32 %v4876_v37, %v4892_v29  ;;  %v4877_v18 = vmul.f32 0.0078125, %v4848_v3  ;;  %v4703_v3 = vadd.f32 %v9349_v10, %v9605_v55 }
 0x89c   : > { %v4850_v40 = vpop.xlane.xlu0 %4849  ;;  %v4707_v8 = vadd.f32 %v9353_v1, %v9605_v55 }
 0x89d   : > { %6996 = vrsqrt.f32 %v4939_v21  ;;  %v4940_v59 = vadd.f32 1e-06, %v4908_v27  ;;  %v4909_v51 = vsub.f32 %v4877_v18, %v4893_v22  ;;  %v4878_v19 = vmul.f32 0.0078125, %v4850_v40 }
 0x89e   : > { %v4923_v21 = vsub.f32 %v9448_v24, %v4811_v6  ;;  %v4701_v18 = vadd.f32 %v9347_v47, %v9608_v39  ;;  %v4987_v40 = vadd.f32 1.0, %v4703_v3  ;;  %v4713_v24 = vadd.f32 %v9359_v33, %v9605_v55 }
 0x89f   : > { %6998 = vrsqrt.f32 %v4940_v59  ;;  %v4941_v34 = vadd.f32 1e-06, %v4909_v51  ;;  %v4910_v42 = vsub.f32 %v4878_v19, %v4894_v5  ;;  %v4924_v59 = vsub.f32 %v9452_v54, %v4812_v41 }
 0x8a0   : > { %v4792_v38 = vpop.xlane.xlu1 %4791  ;;  %v4988_v19 = vadd.f32 1.0, %v4707_v8  ;;  %v4717_v6 = vadd.f32 %v9363_v46, %v9605_v55  ;;  %v4926_v3 = vsub.f32 %v9444_v57, %v9598_v16 }
 0x8a1   : > { %7000 = vrsqrt.f32 %v4941_v34  ;;  %v4942_v29 = vadd.f32 1e-06, %v4910_v42  ;;  %v9628_v34 = vmul.f32 0.0078125, %v4792_v38 }
 0x8a2   : > { %v4794_v37 = vpop.xlane.xlu0 %4793  ;;  %v4990_v61 = vadd.f32 1.0, %v4717_v6 }
 0x8a3   : > { %7002 = vrsqrt.f32 %v4942_v29  ;;  %v9635_v8 = vmul.f32 0.0078125, %v4794_v37 }
 0x8a4   : > { %v4788_v22 = vpop.xlane.xlu1 %4787 }
 0x8a5   : > { %v9615_v27 = vmul.f32 0.0078125, %v4788_v22 }
 0x8a6   : > { %v4790_v5 = vpop.xlane.xlu0 %4789 }
 0x8a7   : > { %v6997_v15 = vpop.eup %6996  ;;  %v9622_v10 = vmul.f32 0.0078125, %v4790_v5  ;;  %v4895_v42 = vmul.f32 %v9615_v27, %v9615_v27  ;;  %v4711_v5 = vadd.f32 %v9356_v48, %v9608_v39 }
 0x8a8   : > { %v4971_v51 = vmul.f32 %v6997_v15, %v4923_v21  ;;  %v4852_v47 = vpop.xlane.xlu1 %4851 }
 0x8a9   : > { %v6999_v1 = vpop.eup %6998  ;;  %v4879_v54 = vmul.f32 0.0078125, %v4852_v47  ;;  %v4896_v33 = vmul.f32 %v9622_v10, %v9622_v10 }
 0x8aa   : > { %v4972_v41 = vmul.f32 %v6999_v1, %v4924_v59  ;;  %v4854_v46 = vpop.xlane.xlu0 %4853  ;;  %v5003_v38 = vmul.f32 %v4987_v40, %v4971_v51  ;;  %v4989_v59 = vadd.f32 1.0, %v4713_v24  ;;  %v4897_v1 = vmul.f32 %v9628_v34, %v9628_v34 }
 0x8ab   : > { %v7001_v29 = vpop.eup %7000  ;;  %v4911_v21 = vsub.f32 %v4879_v54, %v4895_v42  ;;  %v4880_v15 = vmul.f32 0.0078125, %v4854_v46  ;;  %v4898_v40 = vmul.f32 %v9635_v8, %v9635_v8  ;;  %v4715_v54 = vadd.f32 %v9361_v53, %v9608_v39 }
 0x8ac   : > { %v4973_v22 = vmul.f32 %v7001_v29, %v4925_v35  ;;  %v5004_v52 = vmul.f32 %v4988_v19, %v4972_v41  ;;  %v4856_v57 = vpop.xlane.xlu1 %4855  ;;  %v5019_v16 = vadd.f32 %v5003_v38, %v4701_v18  ;;  %v4727_v53 = vadd.f32 %v9371_v0, %v9605_v55 }
 0x8ad   : > { %v7003_v58 = vpop.eup %7002  ;;  %v4943_v47 = vadd.f32 1e-06, %v4911_v21  ;;  %v4912_v23 = vsub.f32 %v4880_v15, %v4896_v33  ;;  %v4881_v43 = vmul.f32 0.0078125, %v4856_v57  ;;  %v4721_v15 = vadd.f32 %v9365_v2, %v9608_v39 }
 0x8ae   : > { %v4974_v37 = vmul.f32 %v7003_v58, %v4926_v3  ;;  %v4858_v51 = vpop.xlane.xlu0 %4857  ;;  %v5020_v19 = vadd.f32 %v5004_v52, %v4705_v45  ;;  %v5005_v35 = vmul.f32 %v4989_v59, %v4973_v22  ;;  %v4927_v52 = vsub.f32 %v9484_v17, %v9615_v27 }
 0x8af   : > { %7004 = vrsqrt.f32 %v4943_v47  ;;  %v4944_v42 = vadd.f32 1e-06, %v4912_v23  ;;  %v4913_v48 = vsub.f32 %v4881_v43, %v4897_v1  ;;  %v4882_v24 = vmul.f32 0.0078125, %v4858_v51 }
 0x8b0   : > { %v5035_v41 = vpack.c.bf16 %v5020_v19, %v5019_v16  ;;  %v5006_v18 = vmul.f32 %v4990_v61, %v4974_v37  ;;  %v5021_v29 = vadd.f32 %v5005_v35, %v4711_v5  ;;  %v4723_v23 = vadd.f32 %v9367_v60, %v9605_v55 }
 0x8b1   : > { %7006 = vrsqrt.f32 %v4944_v42  ;;  %v4945_v3 = vadd.f32 1e-06, %v4913_v48  ;;  %v4914_v33 = vsub.f32 %v4882_v24, %v4898_v40  ;;  %v4800_v6 = vpop.xlane.xlu1 %4799  ;;  %v4725_v60 = vadd.f32 %v9369_v36, %v9608_v39 }
 0x8b2   : > { %6298 = vmatprep.mubr.bf16.mxu0 %v5035_v41  ;;  %v5022_v46 = vadd.f32 %v5006_v18, %v4715_v54  ;;  %v4991_v59 = vadd.f32 1.0, %v4723_v23  ;;  %v4733_v1 = vadd.f32 %v9376_v50, %v9605_v55  ;;  %v9663_v57 = vmul.f32 0.0078125, %v4800_v6 }
 0x8b3   : > { %7008 = vrsqrt.f32 %v4945_v3  ;;  %v4946_v38 = vadd.f32 1e-06, %v4914_v33  ;;  %v4802_v45 = vpop.xlane.xlu0 %4801  ;;  %v4928_v16 = vsub.f32 %v9491_v62, %v9622_v10  ;;  %v4992_v47 = vadd.f32 1.0, %v4727_v53 }
 0x8b4   : > { %v5036_v22 = vpack.c.bf16 %v5022_v46, %v5021_v29  ;;  %v4731_v40 = vadd.f32 %v9373_v56, %v9608_v39  ;;  %v9671_v36 = vmul.f32 0.0078125, %v4802_v45  ;;  %v4993_v48 = vadd.f32 1.0, %v4733_v1 }
 0x8b5   : > { %7010 = vrsqrt.f32 %v4946_v38  ;;  %v4796_v43 = vpop.xlane.xlu1 %4795  ;;  %v4737_v24 = vadd.f32 %v9381_v13, %v9605_v55  ;;  %v4929_v54 = vsub.f32 %v9476_v25, %v9628_v34  ;;  %v4901_v56 = vmul.f32 %v9663_v57, %v9663_v57 }
 0x8b6   : > { %v9649_v21 = vmul.f32 0.0078125, %v4796_v43  ;;  %6299 = vmatmul.mubr.bf16.vlgmr.msra.gmra.mrb[128].mxu0 %v5036_v22  ;;  %v4930_v46 = vsub.f32 %v9480_v32, %v9635_v8  ;;  %v4902_v38 = vmul.f32 %v9671_v36, %v9671_v36  ;;  %v4735_v32 = vadd.f32 %v9379_v30, %v9608_v39 }
 0x8b7   : > { %v4798_v61 = vpop.xlane.xlu0 %4797  ;;  %v4994_v43 = vadd.f32 1.0, %v4737_v24 }
 0x8b8   : > { %v9657_v58 = vmul.f32 0.0078125, %v4798_v61  ;;  %v4899_v2 = vmul.f32 %v9649_v21, %v9649_v21 }
 0x8b9   : > { %v7005_v5 = vpop.eup %7004  ;;  %v4860_v0 = vpop.xlane.xlu1 %4859 }
 0x8ba   : > { %v4883_v17 = vmul.f32 0.0078125, %v4860_v0  ;;  %v4975_v27 = vmul.f32 %v7005_v5, %v4927_v52  ;;  %v4900_v50 = vmul.f32 %v9657_v58, %v9657_v58 }
 0x8bb   : > { %v7007_v37 = vpop.eup %7006  ;;  %v4862_v51 = vpop.xlane.xlu0 %4861 }
 0x8bc   : > { %v4915_v19 = vsub.f32 %v4883_v17, %v4899_v2  ;;  %v4884_v35 = vmul.f32 0.0078125, %v4862_v51  ;;  %v4976_v42 = vmul.f32 %v7007_v37, %v4928_v16  ;;  %v5007_v62 = vmul.f32 %v4991_v59, %v4975_v27 }
 0x8bd   : > { %v7009_v10 = vpop.eup %7008  ;;  %v4864_v41 = vpop.xlane.xlu1 %4863  ;;  %v4931_v51 = vsub.f32 %v9532_v9, %v9649_v21 }
 0x8be   : > { %v4947_v18 = vadd.f32 1e-06, %v4915_v19  ;;  %v4916_v29 = vsub.f32 %v4884_v35, %v4900_v50  ;;  %v4885_v3 = vmul.f32 0.0078125, %v4864_v41  ;;  %v5008_v33 = vmul.f32 %v4992_v47, %v4976_v42 }
 0x8bf   : > { %v7011_v6 = vpop.eup %7010  ;;  %v4866_v45 = vpop.xlane.xlu0 %4865  ;;  %v5023_v13 = vadd.f32 %v5007_v62, %v4721_v15  ;;  %v4977_v22 = vmul.f32 %v7009_v10, %v4929_v54  ;;  %v4747_v50 = vadd.f32 %v9389_v14, %v9605_v55  ;;  %v4745_v42 = vadd.f32 %v9387_v49, %v9608_v39 }
 0x8c0   : > { %7012 = vrsqrt.f32 %v4947_v18  ;;  %v4948_v25 = vadd.f32 1e-06, %v4916_v29  ;;  %v4917_v34 = vsub.f32 %v4885_v3, %v4901_v56  ;;  %v4886_v23 = vmul.f32 0.0078125, %v4866_v45 }
 0x8c1   : > { %v5024_v53 = vadd.f32 %v5008_v33, %v4725_v60  ;;  %v4978_v61 = vmul.f32 %v7011_v6, %v4930_v46  ;;  %v5009_v52 = vmul.f32 %v4993_v48, %v4977_v22  ;;  %v4743_v60 = vadd.f32 %v9385_v63, %v9605_v55 }
 0x8c2   : > { %7014 = vrsqrt.f32 %v4948_v25  ;;  %v4949_v5 = vadd.f32 1e-06, %v4917_v34  ;;  %v4918_v59 = vsub.f32 %v4886_v23, %v4902_v38  ;;  %v4808_v1 = vpop.xlane.xlu1 %4807  ;;  %v4753_v62 = vadd.f32 %v9393_v7, %v9605_v55 }
 0x8c3   : > { %v5037_v8 = vpack.c.bf16 %v5024_v53, %v5023_v13  ;;  %v5010_v0 = vmul.f32 %v4994_v43, %v4978_v61  ;;  %v5025_v16 = vadd.f32 %v5009_v52, %v4731_v40  ;;  %v4741_v40 = vadd.f32 %v9383_v26, %v9608_v39 }
 0x8c4   : > { %7016 = vrsqrt.f32 %v4949_v5  ;;  %v4950_v15 = vadd.f32 1e-06, %v4918_v59  ;;  %v4810_v2 = vpop.xlane.xlu0 %4809  ;;  %v4995_v63 = vadd.f32 1.0, %v4743_v60  ;;  %v9703_v10 = vmul.f32 0.0078125, %v4808_v1 }
 0x8c5   : > { %6302 = vmatprep.mubr.bf16.mxu0 %v5037_v8  ;;  %v5026_v17 = vadd.f32 %v5010_v0, %v4735_v32  ;;  %v4932_v26 = vsub.f32 %v9536_v11, %v9657_v58  ;;  %v4996_v54 = vadd.f32 1.0, %v4747_v50  ;;  %v4751_v56 = vadd.f32 %v9391_v28, %v9608_v39 }
 0x8c6   : > { %7018 = vrsqrt.f32 %v4950_v15  ;;  %v4804_v27 = vpop.xlane.xlu1 %4803  ;;  %v9711_v49 = vmul.f32 0.0078125, %v4810_v2  ;;  %v4997_v33 = vadd.f32 1.0, %v4753_v62  ;;  %v4757_v6 = vadd.f32 %v9397_v12, %v9605_v55 }
 0x8c7   : > { %v9689_v37 = vmul.f32 0.0078125, %v4804_v27  ;;  %v5038_v47 = vpack.c.bf16 %v5026_v17, %v5025_v16  ;;  %v4933_v46 = vsub.f32 %v9521_v44, %v9663_v57  ;;  %v4905_v28 = vmul.f32 %v9703_v10, %v9703_v10 }
 0x8c8   : > { %v4806_v30 = vpop.xlane.xlu0 %4805  ;;  %v4934_v23 = vsub.f32 %v9525_v31, %v9671_v36  ;;  %v4906_v43 = vmul.f32 %v9711_v49, %v9711_v49  ;;  %v4998_v5 = vadd.f32 1.0, %v4757_v6  ;;  %v4755_v31 = vadd.f32 %v9395_v20, %v9608_v39 }
 0x8c9   : > { %v9697_v19 = vmul.f32 0.0078125, %v4806_v30  ;;  %6303 = vmatmul.mubr.bf16.gmra.mrb[132].mxu0 %v5038_v47  ;;  %v4903_v9 = vmul.f32 %v9689_v37, %v9689_v37  ;;  %v4763_v60 = vadd.f32 %v9401_v4, %v9605_v55  ;;  %v10210_v47 = vld [vmem:[#allocation73_spill] sm:$0xff]  ;;  %v10211_v30 = vld [vmem:[#allocation74_spill] sm:$0xff] }
 0x8ca   : > { %v7013_v35 = vpop.eup %7012  ;;  %v4868_v14 = vpop.xlane.xlu1 %4867  ;;  %v4767_v50 = vadd.f32 %v10210_v47, %v9605_v55  ;;  %v10214_v4 = vld [vmem:[#allocation70_spill] sm:$0xff] }
 0x8cb   : > { %v4887_v21 = vmul.f32 0.0078125, %v4868_v14  ;;  %v4979_v48 = vmul.f32 %v7013_v35, %v4931_v51  ;;  %v4904_v7 = vmul.f32 %v9697_v19, %v9697_v19  ;;  %v10212_v51 = vld [vmem:[#allocation55_spill] sm:$0xff] }
 0x8cc   : > { %v7015_v24 = vpop.eup %7014  ;;  %v4870_v41 = vpop.xlane.xlu0 %4869  ;;  %v4773_v35 = vadd.f32 %v10212_v51, %v9605_v55 }
 0x8cd   : > { %v4919_v18 = vsub.f32 %v4887_v21, %v4903_v9  ;;  %v4888_v29 = vmul.f32 0.0078125, %v4870_v41  ;;  %v4980_v3 = vmul.f32 %v7015_v24, %v4932_v26  ;;  %v5011_v11 = vmul.f32 %v4995_v63, %v4979_v48  ;;  %v10215_v48 = vld [vmem:[#allocation52_spill] sm:$0xff] }
 0x8ce   : > { %v7017_v58 = vpop.eup %7016  ;;  %v4872_v38 = vpop.xlane.xlu1 %4871  ;;  %v4999_v63 = vadd.f32 1.0, %v4763_v60  ;;  %v4761_v9 = vadd.f32 %v10214_v4, %v9608_v39  ;;  %v5000_v21 = vadd.f32 1.0, %v4767_v50  ;;  %v4777_v24 = vadd.f32 %v10215_v48, %v9605_v55 }
 0x8cf   : > { %v4951_v45 = vadd.f32 1e-06, %v4919_v18  ;;  %v4920_v13 = vsub.f32 %v4888_v29, %v4904_v7  ;;  %v4889_v22 = vmul.f32 0.0078125, %v4872_v38  ;;  %v5012_v25 = vmul.f32 %v4996_v54, %v4980_v3  ;;  %v10217_v18 = vld [vmem:[#allocation71_spill] sm:$0xff] }
 0x8d0   : > { %v7019_v34 = vpop.eup %7018  ;;  %v4874_v53 = vpop.xlane.xlu0 %4873  ;;  %v5027_v12 = vadd.f32 %v5011_v11, %v4741_v40  ;;  %v4981_v61 = vmul.f32 %v7017_v58, %v4933_v46  ;;  %v4935_v40 = vsub.f32 %v10211_v30, %v9689_v37  ;;  %v10216_v37 = vld [vmem:[#allocation72_spill] sm:$0xff]  ;;  %v4765_v29 = vadd.f32 %v10217_v18, %v9608_v39  ;;  %v10226_v30 = vld [vmem:[#allocation21_spill] sm:$0xff] }
 0x8d1   : > { %7020 = vrsqrt.f32 %v4951_v45  ;;  %v4952_v44 = vadd.f32 1e-06, %v4920_v13  ;;  %v4921_v57 = vsub.f32 %v4889_v22, %v4905_v28  ;;  %v4890_v52 = vmul.f32 0.0078125, %v4874_v53  ;;  %v10219_v28 = vld [vmem:[#allocation75_spill] sm:$0xff]  ;;  %v10220_v22 = vld [vmem:[#allocation77_spill] sm:$0xff] }
 0x8d2   : > { %v5028_v59 = vadd.f32 %v5012_v25, %v4745_v42  ;;  %v4982_v1 = vmul.f32 %v7019_v34, %v4934_v23  ;;  %v5013_v32 = vmul.f32 %v4997_v33, %v4981_v61  ;;  %v10213_v42 = vld [vmem:[#allocation76_spill] sm:$0xff]  ;;  %v4937_v54 = vsub.f32 %v10216_v37, %v9703_v10  ;;  %v10234_v18 = vld [vmem:[#allocation29_spill] sm:$0xff] }
 0x8d3   : > { %7022 = vrsqrt.f32 %v4952_v44  ;;  %v4953_v8 = vadd.f32 1e-06, %v4921_v57  ;;  %v4922_v0 = vsub.f32 %v4890_v52, %v4906_v43  ;;  %v4936_v62 = vsub.f32 %v10213_v42, %v9697_v19  ;;  %v10218_v19 = vld [vmem:[#allocation79_spill] sm:$0xff]  ;;  %v5059_v44 = vld [vmem:[%s10221_s22] sm:$0x1]  ;;  %s7092_s22 = scalar_lea.vmem %s7091_s0, 32 }
 0x8d4   : > { %v5039_v36 = vpack.c.bf16 %v5028_v59, %v5027_v12  ;;  %v5014_v16 = vmul.f32 %v4998_v5, %v4982_v1  ;;  %v5029_v15 = vadd.f32 %v5013_v32, %v4751_v56  ;;  %v5001_v3 = vadd.f32 1.0, %v4773_v35  ;;  %v10222_v57 = vld [vmem:[#allocation50_spill] sm:$0xff]  ;;  %v10229_v35 = vld [vmem:[#allocation19_spill] sm:$0xff] }
 0x8d5   : > { %7024 = vrsqrt.f32 %v4953_v8  ;;  %v4954_v2 = vadd.f32 1e-06, %v4922_v0  ;;  %v4938_v11 = vsub.f32 %v10218_v19, %v9711_v49  ;;  %v4771_v55 = vadd.f32 %v10219_v28, %v9608_v39  ;;  %v7028_v5 = vld [vmem:[%s7546_s30] sm:$0xff]  ;;  %s10264_s30 = sld [smem:[#allocation12_spill]] }
 0x8d6   : > { %6306 = vmatprep.mubr.bf16.mxu0 %v5039_v36  ;;  %v5030_v17 = vadd.f32 %v5014_v16, %v4755_v31  ;;  %v5002_v38 = vadd.f32 1.0, %v4777_v24  ;;  %v4775_v25 = vadd.f32 %v10220_v22, %v9608_v39  ;;  %v7164_v12 = vmov 0.0|0.0   ;;  %v7029_v59 = vld [vmem:[%s7552_s1] sm:$0xff]  ;;  %s10271_s1 = sld [smem:[#allocation17_spill]] }
 0x8d7   : > { %7026 = vrsqrt.f32 %v4954_v2  ;;  %6349 = vmatprep.subr.bf16.mxu1 %v7164_v12  ;;  %v7166_v61 = vmov 0.0   ;;  %v5060_v39 = vunpack.c.l.bf16 %v5059_v44  ;;  %v5210_v1 = vsub.f32 %v7028_v5, %v7029_v59  ;;  %v10223_v16 = vld [vmem:[#allocation22_spill] sm:$0xff]  ;;  %v10243_v22 = vld [vmem:[#allocation27_spill] sm:$0xff] }
 0x8d8   : > { %v5040_v27 = vpack.c.bf16 %v5030_v17, %v5029_v15  ;;  %6346 = vmatprep.mubr.msk.f32.mxu1 %vm7165_vm2, %v7166_v61  ;;  %v10224_v15 = vld [vmem:[#allocation23_spill] sm:$0xff] }
 0x8d9   : > { %v9756_v52 = vrot.slane %v5060_v39, %v10222_v57  ;;  %v10225_v2 = vsub.f32 %v10223_v16, %v10224_v15 }
 0x8da   : > { %6307 = vmatmul.mubr.bf16.gmra.mrb[136].mxu0 %v5040_v27 }
 0x8db   : > { %v7021_v20 = vpop.eup %7020  ;;  %s796_s7 = sand.u32 1, %s10264_s30  }
 0x8dc   : > { %v4983_v14 = vmul.f32 %v7021_v20, %v4935_v40  ;;  %v10227_v40 = vld [vmem:[#allocation24_spill] sm:$0xff]  ;;  %s797_s29 = scalar_lea.vmem [#allocation7], %s796_s7  ;;  %s5381_s3 = scalar_lea.sflag [#allocation4], %s796_s7 }
 0x8dd   : > { %v7023_v26 = vpop.eup %7022  ;;  %v10228_v20 = vsub.f32 %v10226_v30, %v10227_v40  ;;  %v10253_v30 = vld [vmem:[#allocation40_spill] sm:$0xff]  ;;  %s5393_s23 = sshll.u32 %s797_s29, 4  ;;  %p10273_p1 = scmp.ne.s32.totalorder %s10271_s1, 0  ;;  %s9852_s23 = int_to_ptr.vmem [resolvable:$true] %s5393_s23 }
 0x8de   : > { %v4984_v56 = vmul.f32 %v7023_v26, %v4936_v62  ;;  %v5015_v7 = vmul.f32 %v4999_v63, %v4983_v14  ;;  %v10230_v63 = vld [vmem:[#allocation20_spill] sm:$0xff]  ;;  %s7086_s2 = scalar_lea.vmem %s9852_s23, 16  ;;  %p7093_p4 = scmp.lt.s32.totalorder %s9852_s23, %s7091_s0 }
 0x8df   : > { %v7025_v41 = vpop.eup %7024  ;;  %v10231_v42 = vsub.f32 %v10229_v35, %v10230_v63  ;;  %v10256_v35 = vld [vmem:[#allocation36_spill] sm:$0xff]  ;;  %p7087_p10 = scmp.ne.s32.totalorder %s9852_s23, %s7086_s2  ;;  %p7094_p7 = scmp.lt.s32.totalorder %s7092_s22, %s7086_s2 }
 0x8e0   : > { %v5016_v58 = vmul.f32 %v5000_v21, %v4984_v56  ;;  %v5031_v33 = vadd.f32 %v5015_v7, %v4761_v9  ;;  %v4985_v6 = vmul.f32 %v7025_v41, %v4937_v54 }
 0x8e1   : > { %v7027_v46 = vpop.eup %7026  ;;  %p7088_p2 = pnand %p7087_p10, %p10273_p1  ;;  %p7095_p8 = por %p7094_p7, %p7093_p4 }
 0x8e2   : > { %v5032_v45 = vadd.f32 %v5016_v58, %v4765_v29  ;;  %v4986_v10 = vmul.f32 %v7027_v46, %v4938_v11  ;;  %v5017_v13 = vmul.f32 %v5001_v3, %v4985_v6  ;;  %v10235_v29 = vld [vmem:[#allocation31_spill] sm:$0xff]  ;;  %v10238_v6 = vld [vmem:[#allocation26_spill] sm:$0xff] }
 0x8e3   : > { %v10236_v3 = vsub.f32 %v10234_v18, %v10235_v29  ;;  %v10259_v18 = vld [vmem:[#allocation47_spill] sm:$0xff]  ;;  %p7089_p3 = pneg %p7088_p2 }
 0x8e4   : > { %v5041_v34 = vpack.c.bf16 %v5032_v45, %v5031_v33  ;;  %v5018_v23 = vmul.f32 %v5002_v38, %v4986_v10  ;;  %v5033_v43 = vadd.f32 %v5017_v13, %v4771_v55  ;;  %v10237_v33 = vld [vmem:[#allocation25_spill] sm:$0xff]  ;;  %v10240_v38 = vld [vmem:[#allocation30_spill] sm:$0xff]  ;;  %v10241_v45 = vld [vmem:[#allocation32_spill] sm:$0xff] }
 0x8e5   : > { %v10239_v46 = vsub.f32 %v10237_v33, %v10238_v6  ;;  %v10242_v10 = vsub.f32 %v10240_v38, %v10241_v45  ;;  %v10262_v33 = vld [vmem:[#allocation42_spill] sm:$0xff]  ;;  %v10266_v38 = vld [vmem:[#allocation48_spill] sm:$0xff]  ;;  %p7096_p11 = pnand %p7095_p8, %p7089_p3 }
 0x8e6   : > { %6310 = vmatprep.mubr.bf16.mxu0 %v5041_v34  ;;  %v5034_v49 = vadd.f32 %v5018_v23, %v4775_v25  ;;  %v10244_v25 = vld [vmem:[#allocation28_spill] sm:$0xff] }
 0x8e7   : > { %v10245_v34 = vsub.f32 %v10243_v22, %v10244_v25  ;;  %v10269_v22 = vld [vmem:[#allocation44_spill] sm:$0xff] }
 0x8e8   : > { %v5042_v53 = vpack.c.bf16 %v5034_v49, %v5033_v43 }
 0x8ea   : > { %6311 = vmatmul.mubr.bf16.gmra.mrb[140].mxu0 %v5042_v53 }
 0x989   : > { %v6300_v32 = vpop.f32.mrb[128].mxu0 }
 0x98a   : > { %v5156_v8 = vadd.f32 %v6300_v32, %v9756_v52  ;;  %v5147_v0 = vpop.f32.mrb[129].mxu0 }
 0x98b   : > { %v5148_v31 = vadd.f32 %v5147_v0, %v9756_v52  ;;  %v6301_v36 = vpop.f32.mrb[130].mxu0  ;;  %v10247_v0 = vld [vmem:[#allocation39_spill] sm:$0xff] }
 0x98c   : > { %v5228_v17 = vsub.f32 %v5156_v8, %v10225_v2  ;;  %v5159_v60 = vadd.f32 %v6301_v36, %v9756_v52  ;;  %v5150_v27 = vpop.f32.mrb[131].mxu0  ;;  %v10246_v8 = vld [vmem:[#allocation37_spill] sm:$0xff] }
 0x98d   : > { %v5226_v47 = vsub.f32 %v5148_v31, %v5210_v1  ;;  %v5151_v50 = vadd.f32 %v5150_v27, %v9756_v52  ;;  %v10248_v31 = vsub.f32 %v10246_v8, %v10247_v0  ;;  %v10249_v2 = vld [vmem:[#allocation33_spill] sm:$0xff] }
 0x98e   : > { %v5229_v51 = vsub.f32 %v5159_v60, %v10228_v20  ;;  %v5244_v14 = vmul.f32 %v5228_v17, %v5228_v17  ;;  %v10250_v17 = vld [vmem:[#allocation34_spill] sm:$0xff] }
 0x98f   : > { %v5227_v62 = vsub.f32 %v5151_v50, %v10231_v42  ;;  %v5242_v4 = vmul.f32 %v5226_v47, %v5226_v47  ;;  %v10251_v60 = vsub.f32 %v10249_v2, %v10250_v17  ;;  %v10252_v50 = vld [vmem:[#allocation38_spill] sm:$0xff] }
 0x990   : > { %v5245_v26 = vmul.f32 %v5229_v51, %v5229_v51  ;;  %v10254_v40 = vsub.f32 %v10252_v50, %v10253_v30  ;;  %v10255_v51 = vld [vmem:[#allocation35_spill] sm:$0xff] }
 0x991   : > { %v5243_v9 = vmul.f32 %v5227_v62, %v5227_v62  ;;  %v10257_v63 = vsub.f32 %v10255_v51, %v10256_v35 }
 0x992   : > { %v6354_v21 = vpack.c.bf16 %v5245_v26, %v5244_v14 }
 0x993   : > { %v6350_v24 = vpack.c.bf16 %v5243_v9, %v5242_v4 }
 0x995   : > { %6352 = vmatpush3.bf16.xpose.msk.msra.mxu1 %vm9775_vm3, %v6350_v24 }
 0x996   : > { %6353 = vmatprep.subr.bf16.mxu1 %v7164_v12 }
 0x99c   : > { %v6304_v37 = vpop.f32.mrb[132].mxu0 }
 0x99d   : > { %v5172_v54 = vadd.f32 %v6304_v37, %v9756_v52  ;;  %v5163_v56 = vpop.f32.mrb[133].mxu0  ;;  %6356 = vmatpush3.bf16.xpose.msk.msra.mxu1 %vm9775_vm3, %v6354_v21 }
 0x99e   : > { %v5164_v7 = vadd.f32 %v5163_v56, %v9756_v52  ;;  %v6305_v41 = vpop.f32.mrb[134].mxu0  ;;  %6357 = vmatprep.subr.bf16.mxu1 %v7164_v12 }
 0x99f   : > { %v5232_v19 = vsub.f32 %v5172_v54, %v10236_v3  ;;  %v5175_v11 = vadd.f32 %v6305_v41, %v9756_v52  ;;  %v5166_v58 = vpop.f32.mrb[135].mxu0  ;;  %v10258_v41 = vld [vmem:[#allocation45_spill] sm:$0xff] }
 0x9a0   : > { %v5230_v28 = vsub.f32 %v5164_v7, %v10239_v46  ;;  %v5167_v55 = vadd.f32 %v5166_v58, %v9756_v52  ;;  %v10260_v29 = vsub.f32 %v10258_v41, %v10259_v18  ;;  %v10261_v58 = vld [vmem:[#allocation41_spill] sm:$0xff] }
 0x9a1   : > { %v5233_v13 = vsub.f32 %v5175_v11, %v10242_v10  ;;  %v5248_v43 = vmul.f32 %v5232_v19, %v5232_v19  ;;  %v10263_v6 = vsub.f32 %v10261_v58, %v10262_v33 }
 0x9a2   : > { %v5231_v23 = vsub.f32 %v5167_v55, %v10245_v34  ;;  %v5246_v53 = vmul.f32 %v5230_v28, %v5230_v28  ;;  %v10265_v55 = vld [vmem:[#allocation46_spill] sm:$0xff] }
 0x9a3   : > { %v5249_v49 = vmul.f32 %v5233_v13, %v5233_v13  ;;  %v10267_v45 = vsub.f32 %v10265_v55, %v10266_v38  ;;  %v10268_v13 = vld [vmem:[#allocation43_spill] sm:$0xff] }
 0x9a4   : > { %v5247_v61 = vmul.f32 %v5231_v23, %v5231_v23  ;;  %v10270_v25 = vsub.f32 %v10268_v13, %v10269_v22 }
 0x9a5   : > { %v6362_v44 = vpack.c.bf16 %v5249_v49, %v5248_v43 }
 0x9a6   : > { %v6358_v39 = vpack.c.bf16 %v5247_v61, %v5246_v53 }
 0x9a8   : > { %6360 = vmatpush3.bf16.xpose.msk.msra.mxu1 %vm9775_vm3, %v6358_v39 }
 0x9a9   : > { %6361 = vmatprep.subr.bf16.mxu1 %v7164_v12 }
 0x9ad   : > { %v6308_v57 = vpop.f32.mrb[136].mxu0 }
 0x9ae   : > { %v5188_v5 = vadd.f32 %v6308_v57, %v9756_v52  ;;  %v5179_v59 = vpop.f32.mrb[137].mxu0 }
 0x9af   : > { %v5180_v1 = vadd.f32 %v5179_v59, %v9756_v52  ;;  %v6309_v32 = vpop.f32.mrb[138].mxu0 }
 0x9b0   : > { %v5236_v36 = vsub.f32 %v5188_v5, %v10248_v31  ;;  %v5191_v16 = vadd.f32 %v6309_v32, %v9756_v52  ;;  %v5182_v15 = vpop.f32.mrb[139].mxu0  ;;  %6364 = vmatpush3.bf16.xpose.msk.msra.mxu1 %vm9775_vm3, %v6362_v44  ;;  %v7167_v44 = vmov 0.0625  }
 0x9b1   : > { %v5234_v27 = vsub.f32 %v5180_v1, %v10251_v60  ;;  %v5183_v47 = vadd.f32 %v5182_v15, %v9756_v52  ;;  %6365 = vmatprep.subr.bf16.mxu1 %v7164_v12 }
 0x9b2   : > { %v5237_v20 = vsub.f32 %v5191_v16, %v10254_v40  ;;  %v5252_v62 = vmul.f32 %v5236_v36, %v5236_v36 }
 0x9b3   : > { %v5235_v42 = vsub.f32 %v5183_v47, %v10257_v63  ;;  %v5250_v26 = vmul.f32 %v5234_v27, %v5234_v27 }
 0x9b4   : > { %v5253_v14 = vmul.f32 %v5237_v20, %v5237_v20 }
 0x9b5   : > { %v5251_v4 = vmul.f32 %v5235_v42, %v5235_v42 }
 0x9b6   : > { %v6370_v9 = vpack.c.bf16 %v5253_v14, %v5252_v62 }
 0x9b7   : > { %v6366_v21 = vpack.c.bf16 %v5251_v4, %v5250_v26 }
 0x9b9   : > { %6368 = vmatpush3.bf16.xpose.msk.msra.mxu1 %vm9775_vm3, %v6366_v21 }
 0x9ba   : > { %6369 = vmatprep.subr.bf16.mxu1 %v7164_v12 }
 0x9bd   : > { %v6312_v24 = vpop.f32.mrb[140].mxu0 }
 0x9be   : > { %v5204_v37 = vadd.f32 %v6312_v24, %v9756_v52  ;;  %v5195_v54 = vpop.f32.mrb[141].mxu0 }
 0x9bf   : > { %v5196_v56 = vadd.f32 %v5195_v54, %v9756_v52  ;;  %v6313_v7 = vpop.f32.mrb[142].mxu0 }
 0x9c0   : > { %v5240_v3 = vsub.f32 %v5204_v37, %v10260_v29  ;;  %v5207_v19 = vadd.f32 %v6313_v7, %v9756_v52  ;;  %v5198_v11 = vpop.f32.mrb[143].mxu0 }
 0x9c1   : > { %v5238_v46 = vsub.f32 %v5196_v56, %v10263_v6  ;;  %v5199_v28 = vadd.f32 %v5198_v11, %v9756_v52  ;;  %6372 = vmatpush3.bf16.xpose.msk.msra.mxu1 %vm9775_vm3, %v6370_v9 }
 0x9c2   : > { %v5241_v10 = vsub.f32 %v5207_v19, %v10267_v45  ;;  %6373 = vmatprep.subr.bf16.mxu1 %v7164_v12  ;;  %v5256_v23 = vmul.f32 %v5240_v3, %v5240_v3 }
 0x9c3   : > { %v5239_v34 = vsub.f32 %v5199_v28, %v10270_v25  ;;  %v5254_v49 = vmul.f32 %v5238_v46, %v5238_v46 }
 0x9c4   : > { %v5257_v43 = vmul.f32 %v5241_v10, %v5241_v10 }
 0x9c5   : > { %v5255_v53 = vmul.f32 %v5239_v34, %v5239_v34 }
 0x9c6   : > { %v6378_v52 = vpack.c.bf16 %v5257_v43, %v5256_v23 }
 0x9c7   : > { %v6374_v61 = vpack.c.bf16 %v5255_v53, %v5254_v49 }
 0x9c9   : > { %6376 = vmatpush3.bf16.xpose.msk.msra.mxu1 %vm9775_vm3, %v6374_v61 }
 0x9ca   : > { %6377 = vmatprep.subr.bf16.mxu1 %v7164_v12 }
 0x9d1   : > { %6380 = vmatpush3.bf16.xpose.msk.msra.mxu1 %vm9775_vm3, %v6378_v52 }
 0x9d8   : > { %6347 = vmatmul.mubr.msk.f32.vlgmr.msra.gmra.mrb[144].mxu1 %vm1796_vm0, %v7167_v44 }
 0xaab   : > { %v5375_v12 = vpop.f32.mrb[144].mxu1 }
 0xaac   : > { %5379 = vst [vmem:[%s797_s29] sm:$0x1] %v5375_v12  ;;  %v6348_v48 = vpop.f32.mrb[145].mxu1 }
 0xaad   : > { %7099 = shalt.err (!%p7096_p11)
}
 0xaae   : > { %s7100_s4 = scalar_lea.hbm %s9858_s28, 16  ;;  %s7104_s29 = scalar_lea.hbm %s10272_s27, 32 }
 0xaaf   : > { %p7101_p13 = scmp.ne.s32.totalorder %s9858_s28, %s7100_s4  ;;  %p7105_p6 = scmp.lt.u32.totalorder %s9858_s28, %s10272_s27 }
 0xab0   : > { %p7106_p9 = scmp.lt.u32.totalorder %s7104_s29, %s7100_s4  ;;  %p7108_p10 = scmp.lt.u32.totalorder %s7100_s4, %s9858_s28 }
 0xab1   : > { %p7102_p0 = pnand %p7101_p13, %p10273_p1 }
 0xab2   : > { %p7107_p12 = por %p7106_p9, %p7105_p6 }
 0xab3   : > { %p7103_p5 = pneg %p7102_p0 }
 0xab4   : > { %p7109_p2 = por %p7108_p10, %p7107_p12 }
 0xab6   : > { %p7110_p3 = pnand %p7109_p2, %p7103_p5 }
 0xab8   : > { %7113 = shalt.err (!%p7110_p3)
}
 0xab9   : > { %6389 = dma.vmem_to_hbm [thread:$0]  (%p10273_p1), %s9852_s23, 16, %s9858_s28, %s5381_s3  }
 0xaba PF: > { %s10274_s2 = sld [smem:[#allocation14_spill]]  ;;  %s10275_s5 = sld [smem:[#allocation11_spill]] }
 0xabb   : > { %s10276_s0 = sld [smem:[#allocation18_spill]] }
 0xac0   : > { %p6406_p4 = scmp.ge.s32.totalorder %s10274_s2, 2  ;;  %s5405_s22 = sand.u32 1, %s10275_s5  }
 0xac1   : > { %p10277_p7 = scmp.ne.s32.totalorder %s10276_s0, 0  ;;  %s5406_s30 = scalar_lea.sflag [#allocation4], %s5405_s22 }
 0xac3   : > { %p6399_p8 = pnand %p6406_p4, %p10277_p7 }
 0xac5   : > { %7139 = dma.done.wait (!%p6399_p8), %s5406_s30, 16  }
 0xac6   : > { %7141 = vsyncadd (!%p6399_p8), %s5406_s30, 4294967280  ;;  %s10278_s25 = sld [smem:[#allocation15_spill]]  ;;  %s10279_s4 = sld [smem:[#allocation12_spill]] }
 0xac7   : > { %s10280_s30 = sld [smem:[#allocation13_spill]]  ;;  %s10281_s24 = sld [smem:[#allocation16_spill]] }
 0xacc   : > { %p35_p11 = scmp.ge.s32.totalorder %s10278_s25, 4  }
 0xace   :  { %37 = sbr.rel (!%p35_p11) target bundleno = 16 (0x10), region = 176 }
 0xad5   :  { %5410 = vsyncpa [#allocation3], 1 }
 0xad6   :  { %5412 = vsyncpa [#allocation3 + $0x1], 1 }
 0xad7   :  { %5413 = vsyncpa [#allocation6], 1 }
 0xad8   :  { %5414 = vsyncpa [#allocation4], 1 }
 0xad9   :  { %5416 = vsyncpa [#allocation4 + $0x1], 1 }

</bundles_post_ra>
